<compile_context>
chip_gen: v7x
topology: tpu7x:2x2x1
jax: 0.10.0
libtpu: 0.0.40
codegen_flags: <defaults>
</compile_context>

<pallas_src>
import math

import jax
import jax.numpy as jnp
from jax.experimental import pallas as pl
from jax.experimental.pallas import tpu as pltpu

_BN_EPS = 1e-5
_FAT_K_MAX_CH = 64   # im2col-concat (K = 9*C) only while C <= this


# -----------------------------------------------------------------------------
# Fused Pallas kernel
# -----------------------------------------------------------------------------
def _make_basic_block_kernel(B, H, W, Cin, P, stride, has_proj,
                             fuse_sc, fat1, fat2, lane_dense):
    """Builds the fused BasicBlock kernel for a static shape/config."""
    Hout = (H - 1) // stride + 1
    Wout = (W - 1) // stride + 1
    M = B * Hout * Wout
    Pw = 2 * P if fuse_sc else P          # conv1 output cols (augmented weight)
    f32 = jnp.float32

    def _tap(pad_ref, kh, kw, hd, wd, ch, s):
        """(B*hd*wd, ch) view of one 3x3 tap of the padded scratch."""
        if s == 1:
            t = pad_ref[:, kh:kh + hd, kw:kw + wd, :]
        else:
            # TODO(synk): stride>1 (ref-level strided pl.ds) is not exercised in
            # __main__; validate lowering and the decimation offset vs lax.conv
            # before enabling downsampling blocks.
            t = pad_ref[:, pl.ds(kh, hd, stride=s), pl.ds(kw, wd, stride=s), :]
        return t.reshape(B * hd * wd, ch)

    def _conv3x3(pad_ref, w_ref, hd, wd, ch, s, n_out, fat):
        if fat:
            # Small ch: one fat MXU contraction, K = 9*ch.
            patches = jnp.concatenate(
                [_tap(pad_ref, kh, kw, hd, wd, ch, s)
                 for kh in range(3) for kw in range(3)], axis=-1)
            return jnp.dot(patches, w_ref[...], preferred_element_type=f32)
        # Large ch: 9 accumulating dots straight off ref slices; avoids the
        # 9x im2col materialization, each dot already has full-K occupancy.
        acc = jnp.zeros((B * hd * wd, n_out), f32)
        for kh in range(3):
            for kw in range(3):
                t = _tap(pad_ref, kh, kw, hd, wd, ch, s)
                wk = w_ref[(kh * 3 + kw) * ch:(kh * 3 + kw + 1) * ch, :]
                acc = acc + jnp.dot(t, wk, preferred_element_type=f32)
        return acc

    def kernel(*args):
        if has_proj and not fuse_sc:
            (x_ref, w1_ref, s1_ref, b1_ref, w2_ref, s2_ref, b2_ref,
             wsc_ref, ssc_ref, bsc_ref, out_ref, xpad, o1pad) = args
        else:
            (x_ref, w1_ref, s1_ref, b1_ref, w2_ref, s2_ref, b2_ref,
             out_ref, xpad, o1pad) = args
            wsc_ref = ssc_ref = bsc_ref = None

        cd = xpad.dtype   # MXU / staging dtype; elementwise math stays fp32.

        # ---- in-kernel zero padding: zero only the thin halo (in the staging
        # ---- dtype), write the interior straight from the streamed block ----
        xpad[:, 0:1, :, :] = jnp.zeros((B, 1, W + 2, Cin), cd)
        xpad[:, H + 1:H + 2, :, :] = jnp.zeros((B, 1, W + 2, Cin), cd)
        xpad[:, 1:H + 1, 0:1, :] = jnp.zeros((B, H, 1, Cin), cd)
        xpad[:, 1:H + 1, W + 1:W + 2, :] = jnp.zeros((B, H, 1, Cin), cd)
        xpad[:, 1:H + 1, 1:W + 1, :] = x_ref[...]

        # ---- conv1 (+ fused 1x1 projection shortcut), fp32 accumulate --------
        acc1 = _conv3x3(xpad, w1_ref, Hout, Wout, Cin, stride, Pw, fat1)
        bn1 = acc1 * s1_ref[...] + b1_ref[...]           # fp32; aug: [bn1 | sc]
        if fuse_sc:
            out1 = jnp.maximum(bn1[:, :P], 0.0)          # BN1 + ReLU
            sc = bn1[:, P:]                              # projected shortcut
        else:
            out1 = jnp.maximum(bn1, 0.0)
            if has_proj:
                # Separate skinny projection (only taken when Cin is large).
                xin = _tap(xpad, 1, 1, Hout, Wout, Cin, stride)
                sc = jnp.dot(xin, wsc_ref[...], preferred_element_type=f32)
                sc = sc * ssc_ref[...] + bsc_ref[...]
            else:
                sc = x_ref[...].reshape(M, P).astype(f32)

        # ---- stage padded conv1 activation for conv2 (single cast to cd) -----
        o1pad[:, 0:1, :, :] = jnp.zeros((B, 1, Wout + 2, P), cd)
        o1pad[:, Hout + 1:Hout + 2, :, :] = jnp.zeros((B, 1, Wout + 2, P), cd)
        o1pad[:, 1:Hout + 1, 0:1, :] = jnp.zeros((B, Hout, 1, P), cd)
        o1pad[:, 1:Hout + 1, Wout + 1:Wout + 2, :] = jnp.zeros((B, Hout, 1, P), cd)
        o1pad[:, 1:Hout + 1, 1:Wout + 1, :] = (
            out1.astype(cd).reshape(B, Hout, Wout, P))

        # ---- conv2 (stride 1) + BN2, residual add + ReLU in fp32 -------------
        acc2 = _conv3x3(o1pad, w2_ref, Hout, Wout, P, 1, P, fat2)
        out2 = acc2 * s2_ref[...] + b2_ref[...]
        res = jnp.maximum(out2 + sc, 0.0).astype(out_ref.dtype)

        if lane_dense:
            # Lane-dense slab: last dim Wout*P is a large multiple of 128 even
            # when P < 128 -> unmasked full-lane stores.
            out_ref[...] = res.reshape(B, Hout, Wout * P)
        else:
            out_ref[...] = res.reshape(B, Hout * Wout, P)

    return kernel


# -----------------------------------------------------------------------------
# Wrappers (glue): weight packing, BlockSpecs, pallas_call
# -----------------------------------------------------------------------------
def basic_block_forward_nhwc(x, params, *, stride=1,
                             compute_dtype=jnp.bfloat16,
                             out_dtype=jnp.float32,
                             batch_block=1,
                             lane_dense_out=None,
                             vmem_limit_bytes=None):
    """Fused BasicBlock forward on an NHWC input; returns NHWC output."""
    N, H, W, Cin = x.shape
    P = params["w1"].shape[-1]
    has_proj = (stride != 1) or (Cin != P)
    fat1 = Cin <= _FAT_K_MAX_CH
    fat2 = P <= _FAT_K_MAX_CH
    fuse_sc = has_proj and fat1
    B = math.gcd(N, max(1, int(batch_block)))   # images per grid step

    Hout = (H - 1) // stride + 1
    Wout = (W - 1) // stride + 1

    f32 = jnp.float32
    cd = compute_dtype
    x = x.astype(cd)

    w1 = params["w1"].reshape(9 * Cin, P).astype(cd)   # rows ordered (kh,kw,ci)
    s1 = params["s1"].reshape(1, P).astype(f32)
    b1 = params["b1"].reshape(1, P).astype(f32)
    if fuse_sc:
        # Fold the 1x1 projection into the centre tap of an augmented conv1
        # weight: one MXU dot yields [conv1 | shortcut] (better N-dim fill
        # than a separate skinny K=Cin matmul).
        w1aug = jnp.zeros((9 * Cin, 2 * P), cd)
        w1aug = w1aug.at[:, :P].set(w1)
        w1aug = w1aug.at[4 * Cin:5 * Cin, P:].set(
            params["wsc"].reshape(Cin, P).astype(cd))
        w1 = w1aug
        s1 = jnp.concatenate([s1, params["ssc"].reshape(1, P).astype(f32)], -1)
        b1 = jnp.concatenate([b1, params["bsc"].reshape(1, P).astype(f32)], -1)

    inputs = [
        x, w1, s1, b1,
        params["w2"].reshape(9 * P, P).astype(cd),
        params["s2"].reshape(1, P).astype(f32),
        params["b2"].reshape(1, P).astype(f32),
    ]

    def resident(*shape):
        # Weights / BN params: constant index map -> stay VMEM-resident while
        # activation blocks are streamed and double-buffered.
        # TODO(synk): add pipeline_mode=pl.Buffered(1) (single-buffer the
        # never-refetched resident blocks) once verified on the target jax
        # version; recovers ~10 MB for P=512 stages inside v7x's 64 MiB.
        return pl.BlockSpec(shape, lambda n: (0,) * len(shape))

    in_specs = [
        pl.BlockSpec((B, H, W, Cin), lambda n: (n, 0, 0, 0)),   # streamed
        resident(*w1.shape), resident(*s1.shape), resident(*b1.shape),
        resident(9 * P, P), resident(1, P), resident(1, P),
    ]
    if has_proj and not fuse_sc:
        inputs += [params["wsc"].reshape(Cin, P).astype(cd),
                   params["ssc"].reshape(1, P).astype(f32),
                   params["bsc"].reshape(1, P).astype(f32)]
        in_specs += [resident(Cin, P), resident(1, P), resident(1, P)]

    if vmem_limit_bytes is None:
        # Size the scoped VMEM limit from the actual chip (v7x: 64 MiB total,
        # v5e/v6e: 128 MiB) instead of a fixed conservative number.
        try:
            cap = getattr(pltpu.get_tpu_info(), "vmem_capacity_bytes",
                          64 * 1024 * 1024)
        except Exception:
            cap = 64 * 1024 * 1024
        vmem_limit_bytes = min(int(cap) * 3 // 4, 112 * 1024 * 1024)

    Pw = 2 * P if fuse_sc else P
    flops = 2 * N * Hout * Wout * (9 * Cin * Pw + 9 * P * P)
    if has_proj and not fuse_sc:
        flops += 2 * N * Hout * Wout * Cin * P
    bytes_accessed = (sum(int(a.size) * a.dtype.itemsize for a in inputs)
                      + N * Hout * Wout * P * jnp.dtype(out_dtype).itemsize)

    def run(lane_dense):
        kernel = _make_basic_block_kernel(
            B, H, W, Cin, P, stride, has_proj, fuse_sc, fat1, fat2, lane_dense)
        if lane_dense:
            out_shape = jax.ShapeDtypeStruct((N, Hout, Wout * P), out_dtype)
            out_spec = pl.BlockSpec((B, Hout, Wout * P), lambda n: (n, 0, 0))
        else:
            out_shape = jax.ShapeDtypeStruct((N, Hout * Wout, P), out_dtype)
            out_spec = pl.BlockSpec((B, Hout * Wout, P), lambda n: (n, 0, 0))
        return pl.pallas_call(
            kernel,
            out_shape=out_shape,
            grid=(N // B,),
            in_specs=in_specs,
            out_specs=out_spec,
            scratch_shapes=[
                pltpu.VMEM((B, H + 2, W + 2, Cin), cd),       # padded input
                pltpu.VMEM((B, Hout + 2, Wout + 2, P), cd),   # padded conv1 act
            ],
            compiler_params=pltpu.CompilerParams(
                dimension_semantics=("parallel",),   # shard batch over TCs
                vmem_limit_bytes=vmem_limit_bytes,
            ),
            cost_estimate=pl.CostEstimate(
                flops=flops, transcendentals=0, bytes_accessed=bytes_accessed),
        )(*inputs)

    # TODO(synk): for large H*W*C stages on v7x (64 MiB VMEM), add a spatial
    # grid axis over Hout row-blocks (1-row halo) instead of whole images.
    want_dense = (lane_dense_out if lane_dense_out is not None
                  else (P < 128 and (Wout * P) % 128 == 0))
    if want_dense and lane_dense_out is None:
        # Auto mode (eager): attempt the lane-dense repack, fall back if the
        # (M, P) -> (Hout, Wout*P) reshape does not lower on this Mosaic build.
        # TODO(synk): pin lane_dense_out explicitly when tracing under an
        # outer jit (compile errors are not catchable at trace time).
        try:
            out = run(True)
        except Exception:
            out = run(False)
    else:
        out = run(bool(want_dense))
    return out.reshape(N, Hout, Wout, P)


def basic_block_forward(x_nchw, params, *, stride=1,
                        compute_dtype=jnp.bfloat16, out_dtype=jnp.float32,
                        batch_block=1, lane_dense_out=None):
    # PyTorch-layout (NCHW) shim. In a full network, stay NHWC end-to-end and
    # call basic_block_forward_nhwc directly so both boundary transposes (and
    # the extra HBM passes they imply) disappear.
    x = jnp.transpose(x_nchw, (0, 2, 3, 1))
    y = basic_block_forward_nhwc(
        x, params, stride=stride, compute_dtype=compute_dtype,
        out_dtype=out_dtype, batch_block=batch_block,
        lane_dense_out=lane_dense_out)
    return jnp.transpose(y, (0, 3, 1, 2))


# -----------------------------------------------------------------------------
# Deterministic parameter init (synthetic; BatchNorm folded to scale/bias)
# -----------------------------------------------------------------------------
def _fold_bn(kg, kb, planes):
    gamma = 1.0 + 0.1 * jax.random.normal(kg, (planes,), jnp.float32)
    beta = 0.1 * jax.random.normal(kb, (planes,), jnp.float32)
    running_mean = jnp.zeros((planes,), jnp.float32)
    running_var = jnp.ones((planes,), jnp.float32)
    scale = gamma * jax.lax.rsqrt(running_var + _BN_EPS)
    bias = beta - running_mean * scale
    return scale, bias


def init_params(key, in_planes, planes, stride=1):
    ks = jax.random.split(key, 9)
    params = {}
    params["w1"] = jax.random.normal(ks[0], (3, 3, in_planes, planes),
                                     jnp.float32) * (2.0 / (9 * in_planes)) ** 0.5
    params["w2"] = jax.random.normal(ks[1], (3, 3, planes, planes),
                                     jnp.float32) * (2.0 / (9 * planes)) ** 0.5
    params["s1"], params["b1"] = _fold_bn(ks[2], ks[3], planes)
    params["s2"], params["b2"] = _fold_bn(ks[4], ks[5], planes)
    if stride != 1 or in_planes != planes:
        params["wsc"] = jax.random.normal(ks[6], (1, 1, in_planes, planes),
                                          jnp.float32) * (2.0 / in_planes) ** 0.5
        params["ssc"], params["bsc"] = _fold_bn(ks[7], ks[8], planes)
    return params


# -----------------------------------------------------------------------------
# Pure-JAX reference (same conv-operand dtype, fp32 accumulate + fp32 epilogue)
# -----------------------------------------------------------------------------
def ref_basic_block(x_nchw, params, stride=1, compute_dtype=jnp.float32):
    cd = compute_dtype
    x = jnp.transpose(x_nchw, (0, 2, 3, 1)).astype(cd)
    dn = ("NHWC", "HWIO", "NHWC")

    def conv(inp, w, s, pad):
        return jax.lax.conv_general_dilated(
            inp.astype(cd), w.astype(cd), (s, s), pad,
            dimension_numbers=dn, preferred_element_type=jnp.float32)

    P = params["w1"].shape[-1]
    out = jnp.maximum(
        conv(x, params["w1"], stride, [(1, 1), (1, 1)]) * params["s1"]
        + params["b1"], 0.0)
    out = (conv(out, params["w2"], 1, [(1, 1), (1, 1)]) * params["s2"]
           + params["b2"])
    if stride != 1 or x.shape[-1] != P:
        sc = (conv(x, params["wsc"], stride, [(0, 0), (0, 0)]) * params["ssc"]
              + params["bsc"])
    else:
        sc = x.astype(jnp.float32)
    out = jnp.maximum(out + sc, 0.0)
    return jnp.transpose(out, (0, 3, 1, 2))


if __name__ == "__main__":
    key = jax.random.PRNGKey(0)
    kx, kp1, kp2 = jax.random.split(key, 3)

    N, C, H, W = 2, 8, 16, 16
    x = jax.random.normal(kx, (N, C, H, W), jnp.float32)

    # Config 1: identity shortcut (stride=1, in_planes == planes); fp32 MXU
    # operands for a tight-tolerance structural check.
    p1 = init_params(kp1, C, C, stride=1)
    out1 = jax.block_until_ready(
        basic_block_forward(x, p1, stride=1, compute_dtype=jnp.float32))
    ref1 = ref_basic_block(x, p1, stride=1, compute_dtype=jnp.float32)
    assert out1.shape == (N, C, H, W)
    assert jnp.allclose(out1, ref1, atol=1e-4, rtol=1e-4), "identity mismatch"

    # Config 2: projection shortcut fused into conv1, bf16 MXU operands with
    # fp32 accumulation, batch-blocked grid (2 images/step -> fatter MXU M).
    planes2 = 2 * C
    p2 = init_params(kp2, C, planes2, stride=1)
    out2 = jax.block_until_ready(
        basic_block_forward(x, p2, stride=1, compute_dtype=jnp.bfloat16,
                            batch_block=2))
    ref2 = ref_basic_block(x, p2, stride=1, compute_dtype=jnp.bfloat16)
    assert out2.shape == (N, planes2, H, W)
    assert jnp.allclose(out2, ref2, atol=2e-2, rtol=2e-2), "projection mismatch"

    print("KERNEL_OK")
</pallas_src>

<mosaic_0001>
module attributes {stable_mosaic.version = 11 : i64} {
  func.func @kernel(%arg0: i32, %arg1: memref<1x16x16x8xf32, #tpu.memory_space<vmem>>, %arg2: memref<72x8xf32, #tpu.memory_space<vmem>>, %arg3: memref<1x8xf32, #tpu.memory_space<vmem>>, %arg4: memref<1x8xf32, #tpu.memory_space<vmem>>, %arg5: memref<72x8xf32, #tpu.memory_space<vmem>>, %arg6: memref<1x8xf32, #tpu.memory_space<vmem>>, %arg7: memref<1x8xf32, #tpu.memory_space<vmem>>, %arg8: memref<1x16x128xf32, #tpu.memory_space<vmem>>, %arg9: memref<1x18x18x8xf32, #tpu.memory_space<vmem>>, %arg10: memref<1x18x18x8xf32, #tpu.memory_space<vmem>>) attributes {dimension_semantics = [#tpu.dimension_semantics<parallel>], iteration_bounds = array<i64: 2>, scalar_prefetch = 0 : i64, scratch_operands = 2 : i64, tpu.core_type = #tpu.core_type<tc>, window_params = [{transform_indices = @transform_0, window_bounds = array<i64: 1, 16, 16, 8>}, {pipeline_mode = #tpu.pipeline_mode<synchronous>, transform_indices = @transform_1, window_bounds = array<i64: 72, 8>}, {pipeline_mode = #tpu.pipeline_mode<synchronous>, transform_indices = @transform_2, window_bounds = array<i64: 1, 8>}, {pipeline_mode = #tpu.pipeline_mode<synchronous>, transform_indices = @transform_3, window_bounds = array<i64: 1, 8>}, {pipeline_mode = #tpu.pipeline_mode<synchronous>, transform_indices = @transform_4, window_bounds = array<i64: 72, 8>}, {pipeline_mode = #tpu.pipeline_mode<synchronous>, transform_indices = @transform_5, window_bounds = array<i64: 1, 8>}, {pipeline_mode = #tpu.pipeline_mode<synchronous>, transform_indices = @transform_6, window_bounds = array<i64: 1, 8>}, {transform_indices = @transform_7, window_bounds = array<i64: 1, 16, 128>}]} {
    %cst = arith.constant 0.000000e+00 : f32
    %0 = vector.broadcast %cst : f32 to vector<1x1x18x8xf32>
    %c0 = arith.constant 0 : index
    %c0_0 = arith.constant 0 : index
    %c0_1 = arith.constant 0 : index
    %c0_2 = arith.constant 0 : index
    %1 = vector.load %arg9[%c0, %c0_0, %c0_1, %c0_2] : memref<1x18x18x8xf32, #tpu.memory_space<vmem>>, vector<1x1x18x8xf32>
    tpu.vector_store %arg9[%c0, %c0_0, %c0_1, %c0_2], %0 {strides = array<i32>} : memref<1x18x18x8xf32, #tpu.memory_space<vmem>>, vector<1x1x18x8xf32>,
    %cst_3 = arith.constant 0.000000e+00 : f32
    %2 = vector.broadcast %cst_3 : f32 to vector<1x1x18x8xf32>
    %c0_4 = arith.constant 0 : index
    %c17 = arith.constant 17 : index
    %c0_5 = arith.constant 0 : index
    %c0_6 = arith.constant 0 : index
    %3 = vector.load %arg9[%c0_4, %c17, %c0_5, %c0_6] : memref<1x18x18x8xf32, #tpu.memory_space<vmem>>, vector<1x1x18x8xf32>
    tpu.vector_store %arg9[%c0_4, %c17, %c0_5, %c0_6], %2 {strides = array<i32>} : memref<1x18x18x8xf32, #tpu.memory_space<vmem>>, vector<1x1x18x8xf32>,
    %cst_7 = arith.constant 0.000000e+00 : f32
    %4 = vector.broadcast %cst_7 : f32 to vector<1x16x1x8xf32>
    %c0_8 = arith.constant 0 : index
    %c1 = arith.constant 1 : index
    %c0_9 = arith.constant 0 : index
    %c0_10 = arith.constant 0 : index
    %5 = vector.load %arg9[%c0_8, %c1, %c0_9, %c0_10] : memref<1x18x18x8xf32, #tpu.memory_space<vmem>>, vector<1x16x1x8xf32>
    tpu.vector_store %arg9[%c0_8, %c1, %c0_9, %c0_10], %4 {strides = array<i32>} : memref<1x18x18x8xf32, #tpu.memory_space<vmem>>, vector<1x16x1x8xf32>,
    %cst_11 = arith.constant 0.000000e+00 : f32
    %6 = vector.broadcast %cst_11 : f32 to vector<1x16x1x8xf32>
    %c0_12 = arith.constant 0 : index
    %c1_13 = arith.constant 1 : index
    %c17_14 = arith.constant 17 : index
    %c0_15 = arith.constant 0 : index
    %7 = vector.load %arg9[%c0_12, %c1_13, %c17_14, %c0_15] : memref<1x18x18x8xf32, #tpu.memory_space<vmem>>, vector<1x16x1x8xf32>
    tpu.vector_store %arg9[%c0_12, %c1_13, %c17_14, %c0_15], %6 {strides = array<i32>} : memref<1x18x18x8xf32, #tpu.memory_space<vmem>>, vector<1x16x1x8xf32>,
    %c0_16 = arith.constant 0 : index
    %c0_17 = arith.constant 0 : index
    %c0_18 = arith.constant 0 : index
    %c0_19 = arith.constant 0 : index
    %8 = vector.load %arg1[%c0_16, %c0_17, %c0_18, %c0_19] : memref<1x16x16x8xf32, #tpu.memory_space<vmem>>, vector<1x16x16x8xf32>
    %c0_20 = arith.constant 0 : index
    %c1_21 = arith.constant 1 : index
    %c1_22 = arith.constant 1 : index
    %c0_23 = arith.constant 0 : index
    %9 = vector.load %arg9[%c0_20, %c1_21, %c1_22, %c0_23] : memref<1x18x18x8xf32, #tpu.memory_space<vmem>>, vector<1x16x16x8xf32>
    tpu.vector_store %arg9[%c0_20, %c1_21, %c1_22, %c0_23], %8 {strides = array<i32>} : memref<1x18x18x8xf32, #tpu.memory_space<vmem>>, vector<1x16x16x8xf32>,
    %c0_24 = arith.constant 0 : index
    %c0_25 = arith.constant 0 : index
    %c0_26 = arith.constant 0 : index
    %c0_27 = arith.constant 0 : index
    %10 = vector.load %arg9[%c0_24, %c0_25, %c0_26, %c0_27] : memref<1x18x18x8xf32, #tpu.memory_space<vmem>>, vector<1x16x16x8xf32>
    %11 = vector.shape_cast %10 : vector<1x16x16x8xf32> to vector<256x8xf32>
    %c0_28 = arith.constant 0 : index
    %c0_29 = arith.constant 0 : index
    %c1_30 = arith.constant 1 : index
    %c0_31 = arith.constant 0 : index
    %12 = vector.load %arg9[%c0_28, %c0_29, %c1_30, %c0_31] : memref<1x18x18x8xf32, #tpu.memory_space<vmem>>, vector<1x16x16x8xf32>
    %13 = vector.shape_cast %12 : vector<1x16x16x8xf32> to vector<256x8xf32>
    %c0_32 = arith.constant 0 : index
    %c0_33 = arith.constant 0 : index
    %c2 = arith.constant 2 : index
    %c0_34 = arith.constant 0 : index
    %14 = vector.load %arg9[%c0_32, %c0_33, %c2, %c0_34] : memref<1x18x18x8xf32, #tpu.memory_space<vmem>>, vector<1x16x16x8xf32>
    %15 = vector.shape_cast %14 : vector<1x16x16x8xf32> to vector<256x8xf32>
    %c0_35 = arith.constant 0 : index
    %c1_36 = arith.constant 1 : index
    %c0_37 = arith.constant 0 : index
    %c0_38 = arith.constant 0 : index
    %16 = vector.load %arg9[%c0_35, %c1_36, %c0_37, %c0_38] : memref<1x18x18x8xf32, #tpu.memory_space<vmem>>, vector<1x16x16x8xf32>
    %17 = vector.shape_cast %16 : vector<1x16x16x8xf32> to vector<256x8xf32>
    %c0_39 = arith.constant 0 : index
    %c1_40 = arith.constant 1 : index
    %c1_41 = arith.constant 1 : index
    %c0_42 = arith.constant 0 : index
    %18 = vector.load %arg9[%c0_39, %c1_40, %c1_41, %c0_42] : memref<1x18x18x8xf32, #tpu.memory_space<vmem>>, vector<1x16x16x8xf32>
    %19 = vector.shape_cast %18 : vector<1x16x16x8xf32> to vector<256x8xf32>
    %c0_43 = arith.constant 0 : index
    %c1_44 = arith.constant 1 : index
    %c2_45 = arith.constant 2 : index
    %c0_46 = arith.constant 0 : index
    %20 = vector.load %arg9[%c0_43, %c1_44, %c2_45, %c0_46] : memref<1x18x18x8xf32, #tpu.memory_space<vmem>>, vector<1x16x16x8xf32>
    %21 = vector.shape_cast %20 : vector<1x16x16x8xf32> to vector<256x8xf32>
    %c0_47 = arith.constant 0 : index
    %c2_48 = arith.constant 2 : index
    %c0_49 = arith.constant 0 : index
    %c0_50 = arith.constant 0 : index
    %22 = vector.load %arg9[%c0_47, %c2_48, %c0_49, %c0_50] : memref<1x18x18x8xf32, #tpu.memory_space<vmem>>, vector<1x16x16x8xf32>
    %23 = vector.shape_cast %22 : vector<1x16x16x8xf32> to vector<256x8xf32>
    %c0_51 = arith.constant 0 : index
    %c2_52 = arith.constant 2 : index
    %c1_53 = arith.constant 1 : index
    %c0_54 = arith.constant 0 : index
    %24 = vector.load %arg9[%c0_51, %c2_52, %c1_53, %c0_54] : memref<1x18x18x8xf32, #tpu.memory_space<vmem>>, vector<1x16x16x8xf32>
    %25 = vector.shape_cast %24 : vector<1x16x16x8xf32> to vector<256x8xf32>
    %c0_55 = arith.constant 0 : index
    %c2_56 = arith.constant 2 : index
    %c2_57 = arith.constant 2 : index
    %c0_58 = arith.constant 0 : index
    %26 = vector.load %arg9[%c0_55, %c2_56, %c2_57, %c0_58] : memref<1x18x18x8xf32, #tpu.memory_space<vmem>>, vector<1x16x16x8xf32>
    %27 = vector.shape_cast %26 : vector<1x16x16x8xf32> to vector<256x8xf32>
    %28 = tpu.concatenate %11, %13, %15, %17, %19, %21, %23, %25, %27 in 1 : vector<256x8xf32>, vector<256x8xf32>, vector<256x8xf32>, vector<256x8xf32>, vector<256x8xf32>, vector<256x8xf32>, vector<256x8xf32>, vector<256x8xf32>, vector<256x8xf32> -> vector<256x72xf32>
    %c0_59 = arith.constant 0 : index
    %c0_60 = arith.constant 0 : index
    %29 = vector.load %arg2[%c0_59, %c0_60] : memref<72x8xf32, #tpu.memory_space<vmem>>, vector<72x8xf32>
    %cst_61 = arith.constant dense<0.000000e+00> : vector<256x8xf32>
    %30 = tpu.matmul %28, %29, %cst_61 {dimension_numbers = #tpu.dot_dimension_numbers<[1], [0], [0], [1], [0, 0, 1, 1], [], []>} : vector<256x72xf32>, vector<72x8xf32>, vector<256x8xf32> -> vector<256x8xf32>
    %c0_62 = arith.constant 0 : index
    %c0_63 = arith.constant 0 : index
    %31 = vector.load %arg3[%c0_62, %c0_63] : memref<1x8xf32, #tpu.memory_space<vmem>>, vector<1x8xf32>
    %32 = vector.broadcast %31 : vector<1x8xf32> to vector<256x8xf32>
    %33 = arith.mulf %30, %32 : vector<256x8xf32>
    %c0_64 = arith.constant 0 : index
    %c0_65 = arith.constant 0 : index
    %34 = vector.load %arg4[%c0_64, %c0_65] : memref<1x8xf32, #tpu.memory_space<vmem>>, vector<1x8xf32>
    %35 = vector.broadcast %34 : vector<1x8xf32> to vector<256x8xf32>
    %36 = arith.addf %33, %35 : vector<256x8xf32>
    %cst_66 = arith.constant 0.000000e+00 : f32
    %37 = vector.broadcast %cst_66 : f32 to vector<256x8xf32>
    %38 = arith.maximumf %36, %37 : vector<256x8xf32>
    %c0_67 = arith.constant 0 : index
    %c0_68 = arith.constant 0 : index
    %c0_69 = arith.constant 0 : index
    %c0_70 = arith.constant 0 : index
    %39 = vector.load %arg1[%c0_67, %c0_68, %c0_69, %c0_70] : memref<1x16x16x8xf32, #tpu.memory_space<vmem>>, vector<1x16x16x8xf32>
    %40 = vector.shape_cast %39 : vector<1x16x16x8xf32> to vector<256x8xf32>
    %cst_71 = arith.constant 0.000000e+00 : f32
    %41 = vector.broadcast %cst_71 : f32 to vector<1x1x18x8xf32>
    %c0_72 = arith.constant 0 : index
    %c0_73 = arith.constant 0 : index
    %c0_74 = arith.constant 0 : index
    %c0_75 = arith.constant 0 : index
    %42 = vector.load %arg10[%c0_72, %c0_73, %c0_74, %c0_75] : memref<1x18x18x8xf32, #tpu.memory_space<vmem>>, vector<1x1x18x8xf32>
    tpu.vector_store %arg10[%c0_72, %c0_73, %c0_74, %c0_75], %41 {strides = array<i32>} : memref<1x18x18x8xf32, #tpu.memory_space<vmem>>, vector<1x1x18x8xf32>,
    %cst_76 = arith.constant 0.000000e+00 : f32
    %43 = vector.broadcast %cst_76 : f32 to vector<1x1x18x8xf32>
    %c0_77 = arith.constant 0 : index
    %c17_78 = arith.constant 17 : index
    %c0_79 = arith.constant 0 : index
    %c0_80 = arith.constant 0 : index
    %44 = vector.load %arg10[%c0_77, %c17_78, %c0_79, %c0_80] : memref<1x18x18x8xf32, #tpu.memory_space<vmem>>, vector<1x1x18x8xf32>
    tpu.vector_store %arg10[%c0_77, %c17_78, %c0_79, %c0_80], %43 {strides = array<i32>} : memref<1x18x18x8xf32, #tpu.memory_space<vmem>>, vector<1x1x18x8xf32>,
    %cst_81 = arith.constant 0.000000e+00 : f32
    %45 = vector.broadcast %cst_81 : f32 to vector<1x16x1x8xf32>
    %c0_82 = arith.constant 0 : index
    %c1_83 = arith.constant 1 : index
    %c0_84 = arith.constant 0 : index
    %c0_85 = arith.constant 0 : index
    %46 = vector.load %arg10[%c0_82, %c1_83, %c0_84, %c0_85] : memref<1x18x18x8xf32, #tpu.memory_space<vmem>>, vector<1x16x1x8xf32>
    tpu.vector_store %arg10[%c0_82, %c1_83, %c0_84, %c0_85], %45 {strides = array<i32>} : memref<1x18x18x8xf32, #tpu.memory_space<vmem>>, vector<1x16x1x8xf32>,
    %cst_86 = arith.constant 0.000000e+00 : f32
    %47 = vector.broadcast %cst_86 : f32 to vector<1x16x1x8xf32>
    %c0_87 = arith.constant 0 : index
    %c1_88 = arith.constant 1 : index
    %c17_89 = arith.constant 17 : index
    %c0_90 = arith.constant 0 : index
    %48 = vector.load %arg10[%c0_87, %c1_88, %c17_89, %c0_90] : memref<1x18x18x8xf32, #tpu.memory_space<vmem>>, vector<1x16x1x8xf32>
    tpu.vector_store %arg10[%c0_87, %c1_88, %c17_89, %c0_90], %47 {strides = array<i32>} : memref<1x18x18x8xf32, #tpu.memory_space<vmem>>, vector<1x16x1x8xf32>,
    %49 = vector.shape_cast %38 : vector<256x8xf32> to vector<1x16x16x8xf32>
    %c0_91 = arith.constant 0 : index
    %c1_92 = arith.constant 1 : index
    %c1_93 = arith.constant 1 : index
    %c0_94 = arith.constant 0 : index
    %50 = vector.load %arg10[%c0_91, %c1_92, %c1_93, %c0_94] : memref<1x18x18x8xf32, #tpu.memory_space<vmem>>, vector<1x16x16x8xf32>
    tpu.vector_store %arg10[%c0_91, %c1_92, %c1_93, %c0_94], %49 {strides = array<i32>} : memref<1x18x18x8xf32, #tpu.memory_space<vmem>>, vector<1x16x16x8xf32>,
    %c0_95 = arith.constant 0 : index
    %c0_96 = arith.constant 0 : index
    %c0_97 = arith.constant 0 : index
    %c0_98 = arith.constant 0 : index
    %51 = vector.load %arg10[%c0_95, %c0_96, %c0_97, %c0_98] : memref<1x18x18x8xf32, #tpu.memory_space<vmem>>, vector<1x16x16x8xf32>
    %52 = vector.shape_cast %51 : vector<1x16x16x8xf32> to vector<256x8xf32>
    %c0_99 = arith.constant 0 : index
    %c0_100 = arith.constant 0 : index
    %c1_101 = arith.constant 1 : index
    %c0_102 = arith.constant 0 : index
    %53 = vector.load %arg10[%c0_99, %c0_100, %c1_101, %c0_102] : memref<1x18x18x8xf32, #tpu.memory_space<vmem>>, vector<1x16x16x8xf32>
    %54 = vector.shape_cast %53 : vector<1x16x16x8xf32> to vector<256x8xf32>
    %c0_103 = arith.constant 0 : index
    %c0_104 = arith.constant 0 : index
    %c2_105 = arith.constant 2 : index
    %c0_106 = arith.constant 0 : index
    %55 = vector.load %arg10[%c0_103, %c0_104, %c2_105, %c0_106] : memref<1x18x18x8xf32, #tpu.memory_space<vmem>>, vector<1x16x16x8xf32>
    %56 = vector.shape_cast %55 : vector<1x16x16x8xf32> to vector<256x8xf32>
    %c0_107 = arith.constant 0 : index
    %c1_108 = arith.constant 1 : index
    %c0_109 = arith.constant 0 : index
    %c0_110 = arith.constant 0 : index
    %57 = vector.load %arg10[%c0_107, %c1_108, %c0_109, %c0_110] : memref<1x18x18x8xf32, #tpu.memory_space<vmem>>, vector<1x16x16x8xf32>
    %58 = vector.shape_cast %57 : vector<1x16x16x8xf32> to vector<256x8xf32>
    %c0_111 = arith.constant 0 : index
    %c1_112 = arith.constant 1 : index
    %c1_113 = arith.constant 1 : index
    %c0_114 = arith.constant 0 : index
    %59 = vector.load %arg10[%c0_111, %c1_112, %c1_113, %c0_114] : memref<1x18x18x8xf32, #tpu.memory_space<vmem>>, vector<1x16x16x8xf32>
    %60 = vector.shape_cast %59 : vector<1x16x16x8xf32> to vector<256x8xf32>
    %c0_115 = arith.constant 0 : index
    %c1_116 = arith.constant 1 : index
    %c2_117 = arith.constant 2 : index
    %c0_118 = arith.constant 0 : index
    %61 = vector.load %arg10[%c0_115, %c1_116, %c2_117, %c0_118] : memref<1x18x18x8xf32, #tpu.memory_space<vmem>>, vector<1x16x16x8xf32>
    %62 = vector.shape_cast %61 : vector<1x16x16x8xf32> to vector<256x8xf32>
    %c0_119 = arith.constant 0 : index
    %c2_120 = arith.constant 2 : index
    %c0_121 = arith.constant 0 : index
    %c0_122 = arith.constant 0 : index
    %63 = vector.load %arg10[%c0_119, %c2_120, %c0_121, %c0_122] : memref<1x18x18x8xf32, #tpu.memory_space<vmem>>, vector<1x16x16x8xf32>
    %64 = vector.shape_cast %63 : vector<1x16x16x8xf32> to vector<256x8xf32>
    %c0_123 = arith.constant 0 : index
    %c2_124 = arith.constant 2 : index
    %c1_125 = arith.constant 1 : index
    %c0_126 = arith.constant 0 : index
    %65 = vector.load %arg10[%c0_123, %c2_124, %c1_125, %c0_126] : memref<1x18x18x8xf32, #tpu.memory_space<vmem>>, vector<1x16x16x8xf32>
    %66 = vector.shape_cast %65 : vector<1x16x16x8xf32> to vector<256x8xf32>
    %c0_127 = arith.constant 0 : index
    %c2_128 = arith.constant 2 : index
    %c2_129 = arith.constant 2 : index
    %c0_130 = arith.constant 0 : index
    %67 = vector.load %arg10[%c0_127, %c2_128, %c2_129, %c0_130] : memref<1x18x18x8xf32, #tpu.memory_space<vmem>>, vector<1x16x16x8xf32>
    %68 = vector.shape_cast %67 : vector<1x16x16x8xf32> to vector<256x8xf32>
    %69 = tpu.concatenate %52, %54, %56, %58, %60, %62, %64, %66, %68 in 1 : vector<256x8xf32>, vector<256x8xf32>, vector<256x8xf32>, vector<256x8xf32>, vector<256x8xf32>, vector<256x8xf32>, vector<256x8xf32>, vector<256x8xf32>, vector<256x8xf32> -> vector<256x72xf32>
    %c0_131 = arith.constant 0 : index
    %c0_132 = arith.constant 0 : index
    %70 = vector.load %arg5[%c0_131, %c0_132] : memref<72x8xf32, #tpu.memory_space<vmem>>, vector<72x8xf32>
    %cst_133 = arith.constant dense<0.000000e+00> : vector<256x8xf32>
    %71 = tpu.matmul %69, %70, %cst_133 {dimension_numbers = #tpu.dot_dimension_numbers<[1], [0], [0], [1], [0, 0, 1, 1], [], []>} : vector<256x72xf32>, vector<72x8xf32>, vector<256x8xf32> -> vector<256x8xf32>
    %c0_134 = arith.constant 0 : index
    %c0_135 = arith.constant 0 : index
    %72 = vector.load %arg6[%c0_134, %c0_135] : memref<1x8xf32, #tpu.memory_space<vmem>>, vector<1x8xf32>
    %73 = vector.broadcast %72 : vector<1x8xf32> to vector<256x8xf32>
    %74 = arith.mulf %71, %73 : vector<256x8xf32>
    %c0_136 = arith.constant 0 : index
    %c0_137 = arith.constant 0 : index
    %75 = vector.load %arg7[%c0_136, %c0_137] : memref<1x8xf32, #tpu.memory_space<vmem>>, vector<1x8xf32>
    %76 = vector.broadcast %75 : vector<1x8xf32> to vector<256x8xf32>
    %77 = arith.addf %74, %76 : vector<256x8xf32>
    %78 = arith.addf %77, %40 : vector<256x8xf32>
    %cst_138 = arith.constant 0.000000e+00 : f32
    %79 = vector.broadcast %cst_138 : f32 to vector<256x8xf32>
    %80 = arith.maximumf %78, %79 : vector<256x8xf32>
    %81 = vector.shape_cast %80 : vector<256x8xf32> to vector<1x16x128xf32>
    %c0_139 = arith.constant 0 : index
    %c0_140 = arith.constant 0 : index
    %c0_141 = arith.constant 0 : index
    %82 = vector.load %arg8[%c0_139, %c0_140, %c0_141] : memref<1x16x128xf32, #tpu.memory_space<vmem>>, vector<1x16x128xf32>
    tpu.vector_store %arg8[%c0_139, %c0_140, %c0_141], %81 {strides = array<i32>} : memref<1x16x128xf32, #tpu.memory_space<vmem>>, vector<1x16x128xf32>,
    return
  }
  func.func @transform_0(%arg0: i32) -> (i32, i32, i32, i32) {
    %c0_i32 = arith.constant 0 : i32
    %c0_i32_0 = arith.constant 0 : i32
    %c0_i32_1 = arith.constant 0 : i32
    %c0_i32_2 = arith.constant 0 : i32
    return %arg0, %c0_i32, %c0_i32_0, %c0_i32_1 : i32, i32, i32, i32
  }
  func.func @transform_1(%arg0: i32) -> (i32, i32) {
    %c0_i32 = arith.constant 0 : i32
    %c0_i32_0 = arith.constant 0 : i32
    %c0_i32_1 = arith.constant 0 : i32
    return %c0_i32, %c0_i32_0 : i32, i32
  }
  func.func @transform_2(%arg0: i32) -> (i32, i32) {
    %c0_i32 = arith.constant 0 : i32
    %c0_i32_0 = arith.constant 0 : i32
    %c0_i32_1 = arith.constant 0 : i32
    return %c0_i32, %c0_i32_0 : i32, i32
  }
  func.func @transform_3(%arg0: i32) -> (i32, i32) {
    %c0_i32 = arith.constant 0 : i32
    %c0_i32_0 = arith.constant 0 : i32
    %c0_i32_1 = arith.constant 0 : i32
    return %c0_i32, %c0_i32_0 : i32, i32
  }
  func.func @transform_4(%arg0: i32) -> (i32, i32) {
    %c0_i32 = arith.constant 0 : i32
    %c0_i32_0 = arith.constant 0 : i32
    %c0_i32_1 = arith.constant 0 : i32
    return %c0_i32, %c0_i32_0 : i32, i32
  }
  func.func @transform_5(%arg0: i32) -> (i32, i32) {
    %c0_i32 = arith.constant 0 : i32
    %c0_i32_0 = arith.constant 0 : i32
    %c0_i32_1 = arith.constant 0 : i32
    return %c0_i32, %c0_i32_0 : i32, i32
  }
  func.func @transform_6(%arg0: i32) -> (i32, i32) {
    %c0_i32 = arith.constant 0 : i32
    %c0_i32_0 = arith.constant 0 : i32
    %c0_i32_1 = arith.constant 0 : i32
    return %c0_i32, %c0_i32_0 : i32, i32
  }
  func.func @transform_7(%arg0: i32) -> (i32, i32, i32) {
    %c0_i32 = arith.constant 0 : i32
    %c0_i32_0 = arith.constant 0 : i32
    %c0_i32_1 = arith.constant 0 : i32
    return %arg0, %c0_i32, %c0_i32_0 : i32, i32, i32
  }
}

module attributes {stable_mosaic.version = 11 : i64} {
  func.func @kernel(%arg0: i32, %arg1: memref<1x16x16x8xf32, #tpu.memory_space<vmem>>, %arg2: memref<72x8xf32, #tpu.memory_space<vmem>>, %arg3: memref<1x8xf32, #tpu.memory_space<vmem>>, %arg4: memref<1x8xf32, #tpu.memory_space<vmem>>, %arg5: memref<72x8xf32, #tpu.memory_space<vmem>>, %arg6: memref<1x8xf32, #tpu.memory_space<vmem>>, %arg7: memref<1x8xf32, #tpu.memory_space<vmem>>, %arg8: memref<1x256x8xf32, #tpu.memory_space<vmem>>, %arg9: memref<1x18x18x8xf32, #tpu.memory_space<vmem>>, %arg10: memref<1x18x18x8xf32, #tpu.memory_space<vmem>>) attributes {dimension_semantics = [#tpu.dimension_semantics<parallel>], iteration_bounds = array<i64: 2>, scalar_prefetch = 0 : i64, scratch_operands = 2 : i64, tpu.core_type = #tpu.core_type<tc>, window_params = [{transform_indices = @transform_0, window_bounds = array<i64: 1, 16, 16, 8>}, {pipeline_mode = #tpu.pipeline_mode<synchronous>, transform_indices = @transform_1, window_bounds = array<i64: 72, 8>}, {pipeline_mode = #tpu.pipeline_mode<synchronous>, transform_indices = @transform_2, window_bounds = array<i64: 1, 8>}, {pipeline_mode = #tpu.pipeline_mode<synchronous>, transform_indices = @transform_3, window_bounds = array<i64: 1, 8>}, {pipeline_mode = #tpu.pipeline_mode<synchronous>, transform_indices = @transform_4, window_bounds = array<i64: 72, 8>}, {pipeline_mode = #tpu.pipeline_mode<synchronous>, transform_indices = @transform_5, window_bounds = array<i64: 1, 8>}, {pipeline_mode = #tpu.pipeline_mode<synchronous>, transform_indices = @transform_6, window_bounds = array<i64: 1, 8>}, {transform_indices = @transform_7, window_bounds = array<i64: 1, 256, 8>}]} {
    %cst = arith.constant 0.000000e+00 : f32
    %0 = vector.broadcast %cst : f32 to vector<1x1x18x8xf32>
    %c0 = arith.constant 0 : index
    %c0_0 = arith.constant 0 : index
    %c0_1 = arith.constant 0 : index
    %c0_2 = arith.constant 0 : index
    %1 = vector.load %arg9[%c0, %c0_0, %c0_1, %c0_2] : memref<1x18x18x8xf32, #tpu.memory_space<vmem>>, vector<1x1x18x8xf32>
    tpu.vector_store %arg9[%c0, %c0_0, %c0_1, %c0_2], %0 {strides = array<i32>} : memref<1x18x18x8xf32, #tpu.memory_space<vmem>>, vector<1x1x18x8xf32>,
    %cst_3 = arith.constant 0.000000e+00 : f32
    %2 = vector.broadcast %cst_3 : f32 to vector<1x1x18x8xf32>
    %c0_4 = arith.constant 0 : index
    %c17 = arith.constant 17 : index
    %c0_5 = arith.constant 0 : index
    %c0_6 = arith.constant 0 : index
    %3 = vector.load %arg9[%c0_4, %c17, %c0_5, %c0_6] : memref<1x18x18x8xf32, #tpu.memory_space<vmem>>, vector<1x1x18x8xf32>
    tpu.vector_store %arg9[%c0_4, %c17, %c0_5, %c0_6], %2 {strides = array<i32>} : memref<1x18x18x8xf32, #tpu.memory_space<vmem>>, vector<1x1x18x8xf32>,
    %cst_7 = arith.constant 0.000000e+00 : f32
    %4 = vector.broadcast %cst_7 : f32 to vector<1x16x1x8xf32>
    %c0_8 = arith.constant 0 : index
    %c1 = arith.constant 1 : index
    %c0_9 = arith.constant 0 : index
    %c0_10 = arith.constant 0 : index
    %5 = vector.load %arg9[%c0_8, %c1, %c0_9, %c0_10] : memref<1x18x18x8xf32, #tpu.memory_space<vmem>>, vector<1x16x1x8xf32>
    tpu.vector_store %arg9[%c0_8, %c1, %c0_9, %c0_10], %4 {strides = array<i32>} : memref<1x18x18x8xf32, #tpu.memory_space<vmem>>, vector<1x16x1x8xf32>,
    %cst_11 = arith.constant 0.000000e+00 : f32
    %6 = vector.broadcast %cst_11 : f32 to vector<1x16x1x8xf32>
    %c0_12 = arith.constant 0 : index
    %c1_13 = arith.constant 1 : index
    %c17_14 = arith.constant 17 : index
    %c0_15 = arith.constant 0 : index
    %7 = vector.load %arg9[%c0_12, %c1_13, %c17_14, %c0_15] : memref<1x18x18x8xf32, #tpu.memory_space<vmem>>, vector<1x16x1x8xf32>
    tpu.vector_store %arg9[%c0_12, %c1_13, %c17_14, %c0_15], %6 {strides = array<i32>} : memref<1x18x18x8xf32, #tpu.memory_space<vmem>>, vector<1x16x1x8xf32>,
    %c0_16 = arith.constant 0 : index
    %c0_17 = arith.constant 0 : index
    %c0_18 = arith.constant 0 : index
    %c0_19 = arith.constant 0 : index
    %8 = vector.load %arg1[%c0_16, %c0_17, %c0_18, %c0_19] : memref<1x16x16x8xf32, #tpu.memory_space<vmem>>, vector<1x16x16x8xf32>
    %c0_20 = arith.constant 0 : index
    %c1_21 = arith.constant 1 : index
    %c1_22 = arith.constant 1 : index
    %c0_23 = arith.constant 0 : index
    %9 = vector.load %arg9[%c0_20, %c1_21, %c1_22, %c0_23] : memref<1x18x18x8xf32, #tpu.memory_space<vmem>>, vector<1x16x16x8xf32>
    tpu.vector_store %arg9[%c0_20, %c1_21, %c1_22, %c0_23], %8 {strides = array<i32>} : memref<1x18x18x8xf32, #tpu.memory_space<vmem>>, vector<1x16x16x8xf32>,
    %c0_24 = arith.constant 0 : index
    %c0_25 = arith.constant 0 : index
    %c0_26 = arith.constant 0 : index
    %c0_27 = arith.constant 0 : index
    %10 = vector.load %arg9[%c0_24, %c0_25, %c0_26, %c0_27] : memref<1x18x18x8xf32, #tpu.memory_space<vmem>>, vector<1x16x16x8xf32>
    %11 = vector.shape_cast %10 : vector<1x16x16x8xf32> to vector<256x8xf32>
    %c0_28 = arith.constant 0 : index
    %c0_29 = arith.constant 0 : index
    %c1_30 = arith.constant 1 : index
    %c0_31 = arith.constant 0 : index
    %12 = vector.load %arg9[%c0_28, %c0_29, %c1_30, %c0_31] : memref<1x18x18x8xf32, #tpu.memory_space<vmem>>, vector<1x16x16x8xf32>
    %13 = vector.shape_cast %12 : vector<1x16x16x8xf32> to vector<256x8xf32>
    %c0_32 = arith.constant 0 : index
    %c0_33 = arith.constant 0 : index
    %c2 = arith.constant 2 : index
    %c0_34 = arith.constant 0 : index
    %14 = vector.load %arg9[%c0_32, %c0_33, %c2, %c0_34] : memref<1x18x18x8xf32, #tpu.memory_space<vmem>>, vector<1x16x16x8xf32>
    %15 = vector.shape_cast %14 : vector<1x16x16x8xf32> to vector<256x8xf32>
    %c0_35 = arith.constant 0 : index
    %c1_36 = arith.constant 1 : index
    %c0_37 = arith.constant 0 : index
    %c0_38 = arith.constant 0 : index
    %16 = vector.load %arg9[%c0_35, %c1_36, %c0_37, %c0_38] : memref<1x18x18x8xf32, #tpu.memory_space<vmem>>, vector<1x16x16x8xf32>
    %17 = vector.shape_cast %16 : vector<1x16x16x8xf32> to vector<256x8xf32>
    %c0_39 = arith.constant 0 : index
    %c1_40 = arith.constant 1 : index
    %c1_41 = arith.constant 1 : index
    %c0_42 = arith.constant 0 : index
    %18 = vector.load %arg9[%c0_39, %c1_40, %c1_41, %c0_42] : memref<1x18x18x8xf32, #tpu.memory_space<vmem>>, vector<1x16x16x8xf32>
    %19 = vector.shape_cast %18 : vector<1x16x16x8xf32> to vector<256x8xf32>
    %c0_43 = arith.constant 0 : index
    %c1_44 = arith.constant 1 : index
    %c2_45 = arith.constant 2 : index
    %c0_46 = arith.constant 0 : index
    %20 = vector.load %arg9[%c0_43, %c1_44, %c2_45, %c0_46] : memref<1x18x18x8xf32, #tpu.memory_space<vmem>>, vector<1x16x16x8xf32>
    %21 = vector.shape_cast %20 : vector<1x16x16x8xf32> to vector<256x8xf32>
    %c0_47 = arith.constant 0 : index
    %c2_48 = arith.constant 2 : index
    %c0_49 = arith.constant 0 : index
    %c0_50 = arith.constant 0 : index
    %22 = vector.load %arg9[%c0_47, %c2_48, %c0_49, %c0_50] : memref<1x18x18x8xf32, #tpu.memory_space<vmem>>, vector<1x16x16x8xf32>
    %23 = vector.shape_cast %22 : vector<1x16x16x8xf32> to vector<256x8xf32>
    %c0_51 = arith.constant 0 : index
    %c2_52 = arith.constant 2 : index
    %c1_53 = arith.constant 1 : index
    %c0_54 = arith.constant 0 : index
    %24 = vector.load %arg9[%c0_51, %c2_52, %c1_53, %c0_54] : memref<1x18x18x8xf32, #tpu.memory_space<vmem>>, vector<1x16x16x8xf32>
    %25 = vector.shape_cast %24 : vector<1x16x16x8xf32> to vector<256x8xf32>
    %c0_55 = arith.constant 0 : index
    %c2_56 = arith.constant 2 : index
    %c2_57 = arith.constant 2 : index
    %c0_58 = arith.constant 0 : index
    %26 = vector.load %arg9[%c0_55, %c2_56, %c2_57, %c0_58] : memref<1x18x18x8xf32, #tpu.memory_space<vmem>>, vector<1x16x16x8xf32>
    %27 = vector.shape_cast %26 : vector<1x16x16x8xf32> to vector<256x8xf32>
    %28 = tpu.concatenate %11, %13, %15, %17, %19, %21, %23, %25, %27 in 1 : vector<256x8xf32>, vector<256x8xf32>, vector<256x8xf32>, vector<256x8xf32>, vector<256x8xf32>, vector<256x8xf32>, vector<256x8xf32>, vector<256x8xf32>, vector<256x8xf32> -> vector<256x72xf32>
    %c0_59 = arith.constant 0 : index
    %c0_60 = arith.constant 0 : index
    %29 = vector.load %arg2[%c0_59, %c0_60] : memref<72x8xf32, #tpu.memory_space<vmem>>, vector<72x8xf32>
    %cst_61 = arith.constant dense<0.000000e+00> : vector<256x8xf32>
    %30 = tpu.matmul %28, %29, %cst_61 {dimension_numbers = #tpu.dot_dimension_numbers<[1], [0], [0], [1], [0, 0, 1, 1], [], []>} : vector<256x72xf32>, vector<72x8xf32>, vector<256x8xf32> -> vector<256x8xf32>
    %c0_62 = arith.constant 0 : index
    %c0_63 = arith.constant 0 : index
    %31 = vector.load %arg3[%c0_62, %c0_63] : memref<1x8xf32, #tpu.memory_space<vmem>>, vector<1x8xf32>
    %32 = vector.broadcast %31 : vector<1x8xf32> to vector<256x8xf32>
    %33 = arith.mulf %30, %32 : vector<256x8xf32>
    %c0_64 = arith.constant 0 : index
    %c0_65 = arith.constant 0 : index
    %34 = vector.load %arg4[%c0_64, %c0_65] : memref<1x8xf32, #tpu.memory_space<vmem>>, vector<1x8xf32>
    %35 = vector.broadcast %34 : vector<1x8xf32> to vector<256x8xf32>
    %36 = arith.addf %33, %35 : vector<256x8xf32>
    %cst_66 = arith.constant 0.000000e+00 : f32
    %37 = vector.broadcast %cst_66 : f32 to vector<256x8xf32>
    %38 = arith.maximumf %36, %37 : vector<256x8xf32>
    %c0_67 = arith.constant 0 : index
    %c0_68 = arith.constant 0 : index
    %c0_69 = arith.constant 0 : index
    %c0_70 = arith.constant 0 : index
    %39 = vector.load %arg1[%c0_67, %c0_68, %c0_69, %c0_70] : memref<1x16x16x8xf32, #tpu.memory_space<vmem>>, vector<1x16x16x8xf32>
    %40 = vector.shape_cast %39 : vector<1x16x16x8xf32> to vector<256x8xf32>
    %cst_71 = arith.constant 0.000000e+00 : f32
    %41 = vector.broadcast %cst_71 : f32 to vector<1x1x18x8xf32>
    %c0_72 = arith.constant 0 : index
    %c0_73 = arith.constant 0 : index
    %c0_74 = arith.constant 0 : index
    %c0_75 = arith.constant 0 : index
    %42 = vector.load %arg10[%c0_72, %c0_73, %c0_74, %c0_75] : memref<1x18x18x8xf32, #tpu.memory_space<vmem>>, vector<1x1x18x8xf32>
    tpu.vector_store %arg10[%c0_72, %c0_73, %c0_74, %c0_75], %41 {strides = array<i32>} : memref<1x18x18x8xf32, #tpu.memory_space<vmem>>, vector<1x1x18x8xf32>,
    %cst_76 = arith.constant 0.000000e+00 : f32
    %43 = vector.broadcast %cst_76 : f32 to vector<1x1x18x8xf32>
    %c0_77 = arith.constant 0 : index
    %c17_78 = arith.constant 17 : index
    %c0_79 = arith.constant 0 : index
    %c0_80 = arith.constant 0 : index
    %44 = vector.load %arg10[%c0_77, %c17_78, %c0_79, %c0_80] : memref<1x18x18x8xf32, #tpu.memory_space<vmem>>, vector<1x1x18x8xf32>
    tpu.vector_store %arg10[%c0_77, %c17_78, %c0_79, %c0_80], %43 {strides = array<i32>} : memref<1x18x18x8xf32, #tpu.memory_space<vmem>>, vector<1x1x18x8xf32>,
    %cst_81 = arith.constant 0.000000e+00 : f32
    %45 = vector.broadcast %cst_81 : f32 to vector<1x16x1x8xf32>
    %c0_82 = arith.constant 0 : index
    %c1_83 = arith.constant 1 : index
    %c0_84 = arith.constant 0 : index
    %c0_85 = arith.constant 0 : index
    %46 = vector.load %arg10[%c0_82, %c1_83, %c0_84, %c0_85] : memref<1x18x18x8xf32, #tpu.memory_space<vmem>>, vector<1x16x1x8xf32>
    tpu.vector_store %arg10[%c0_82, %c1_83, %c0_84, %c0_85], %45 {strides = array<i32>} : memref<1x18x18x8xf32, #tpu.memory_space<vmem>>, vector<1x16x1x8xf32>,
    %cst_86 = arith.constant 0.000000e+00 : f32
    %47 = vector.broadcast %cst_86 : f32 to vector<1x16x1x8xf32>
    %c0_87 = arith.constant 0 : index
    %c1_88 = arith.constant 1 : index
    %c17_89 = arith.constant 17 : index
    %c0_90 = arith.constant 0 : index
    %48 = vector.load %arg10[%c0_87, %c1_88, %c17_89, %c0_90] : memref<1x18x18x8xf32, #tpu.memory_space<vmem>>, vector<1x16x1x8xf32>
    tpu.vector_store %arg10[%c0_87, %c1_88, %c17_89, %c0_90], %47 {strides = array<i32>} : memref<1x18x18x8xf32, #tpu.memory_space<vmem>>, vector<1x16x1x8xf32>,
    %49 = vector.shape_cast %38 : vector<256x8xf32> to vector<1x16x16x8xf32>
    %c0_91 = arith.constant 0 : index
    %c1_92 = arith.constant 1 : index
    %c1_93 = arith.constant 1 : index
    %c0_94 = arith.constant 0 : index
    %50 = vector.load %arg10[%c0_91, %c1_92, %c1_93, %c0_94] : memref<1x18x18x8xf32, #tpu.memory_space<vmem>>, vector<1x16x16x8xf32>
    tpu.vector_store %arg10[%c0_91, %c1_92, %c1_93, %c0_94], %49 {strides = array<i32>} : memref<1x18x18x8xf32, #tpu.memory_space<vmem>>, vector<1x16x16x8xf32>,
    %c0_95 = arith.constant 0 : index
    %c0_96 = arith.constant 0 : index
    %c0_97 = arith.constant 0 : index
    %c0_98 = arith.constant 0 : index
    %51 = vector.load %arg10[%c0_95, %c0_96, %c0_97, %c0_98] : memref<1x18x18x8xf32, #tpu.memory_space<vmem>>, vector<1x16x16x8xf32>
    %52 = vector.shape_cast %51 : vector<1x16x16x8xf32> to vector<256x8xf32>
    %c0_99 = arith.constant 0 : index
    %c0_100 = arith.constant 0 : index
    %c1_101 = arith.constant 1 : index
    %c0_102 = arith.constant 0 : index
    %53 = vector.load %arg10[%c0_99, %c0_100, %c1_101, %c0_102] : memref<1x18x18x8xf32, #tpu.memory_space<vmem>>, vector<1x16x16x8xf32>
    %54 = vector.shape_cast %53 : vector<1x16x16x8xf32> to vector<256x8xf32>
    %c0_103 = arith.constant 0 : index
    %c0_104 = arith.constant 0 : index
    %c2_105 = arith.constant 2 : index
    %c0_106 = arith.constant 0 : index
    %55 = vector.load %arg10[%c0_103, %c0_104, %c2_105, %c0_106] : memref<1x18x18x8xf32, #tpu.memory_space<vmem>>, vector<1x16x16x8xf32>
    %56 = vector.shape_cast %55 : vector<1x16x16x8xf32> to vector<256x8xf32>
    %c0_107 = arith.constant 0 : index
    %c1_108 = arith.constant 1 : index
    %c0_109 = arith.constant 0 : index
    %c0_110 = arith.constant 0 : index
    %57 = vector.load %arg10[%c0_107, %c1_108, %c0_109, %c0_110] : memref<1x18x18x8xf32, #tpu.memory_space<vmem>>, vector<1x16x16x8xf32>
    %58 = vector.shape_cast %57 : vector<1x16x16x8xf32> to vector<256x8xf32>
    %c0_111 = arith.constant 0 : index
    %c1_112 = arith.constant 1 : index
    %c1_113 = arith.constant 1 : index
    %c0_114 = arith.constant 0 : index
    %59 = vector.load %arg10[%c0_111, %c1_112, %c1_113, %c0_114] : memref<1x18x18x8xf32, #tpu.memory_space<vmem>>, vector<1x16x16x8xf32>
    %60 = vector.shape_cast %59 : vector<1x16x16x8xf32> to vector<256x8xf32>
    %c0_115 = arith.constant 0 : index
    %c1_116 = arith.constant 1 : index
    %c2_117 = arith.constant 2 : index
    %c0_118 = arith.constant 0 : index
    %61 = vector.load %arg10[%c0_115, %c1_116, %c2_117, %c0_118] : memref<1x18x18x8xf32, #tpu.memory_space<vmem>>, vector<1x16x16x8xf32>
    %62 = vector.shape_cast %61 : vector<1x16x16x8xf32> to vector<256x8xf32>
    %c0_119 = arith.constant 0 : index
    %c2_120 = arith.constant 2 : index
    %c0_121 = arith.constant 0 : index
    %c0_122 = arith.constant 0 : index
    %63 = vector.load %arg10[%c0_119, %c2_120, %c0_121, %c0_122] : memref<1x18x18x8xf32, #tpu.memory_space<vmem>>, vector<1x16x16x8xf32>
    %64 = vector.shape_cast %63 : vector<1x16x16x8xf32> to vector<256x8xf32>
    %c0_123 = arith.constant 0 : index
    %c2_124 = arith.constant 2 : index
    %c1_125 = arith.constant 1 : index
    %c0_126 = arith.constant 0 : index
    %65 = vector.load %arg10[%c0_123, %c2_124, %c1_125, %c0_126] : memref<1x18x18x8xf32, #tpu.memory_space<vmem>>, vector<1x16x16x8xf32>
    %66 = vector.shape_cast %65 : vector<1x16x16x8xf32> to vector<256x8xf32>
    %c0_127 = arith.constant 0 : index
    %c2_128 = arith.constant 2 : index
    %c2_129 = arith.constant 2 : index
    %c0_130 = arith.constant 0 : index
    %67 = vector.load %arg10[%c0_127, %c2_128, %c2_129, %c0_130] : memref<1x18x18x8xf32, #tpu.memory_space<vmem>>, vector<1x16x16x8xf32>
    %68 = vector.shape_cast %67 : vector<1x16x16x8xf32> to vector<256x8xf32>
    %69 = tpu.concatenate %52, %54, %56, %58, %60, %62, %64, %66, %68 in 1 : vector<256x8xf32>, vector<256x8xf32>, vector<256x8xf32>, vector<256x8xf32>, vector<256x8xf32>, vector<256x8xf32>, vector<256x8xf32>, vector<256x8xf32>, vector<256x8xf32> -> vector<256x72xf32>
    %c0_131 = arith.constant 0 : index
    %c0_132 = arith.constant 0 : index
    %70 = vector.load %arg5[%c0_131, %c0_132] : memref<72x8xf32, #tpu.memory_space<vmem>>, vector<72x8xf32>
    %cst_133 = arith.constant dense<0.000000e+00> : vector<256x8xf32>
    %71 = tpu.matmul %69, %70, %cst_133 {dimension_numbers = #tpu.dot_dimension_numbers<[1], [0], [0], [1], [0, 0, 1, 1], [], []>} : vector<256x72xf32>, vector<72x8xf32>, vector<256x8xf32> -> vector<256x8xf32>
    %c0_134 = arith.constant 0 : index
    %c0_135 = arith.constant 0 : index
    %72 = vector.load %arg6[%c0_134, %c0_135] : memref<1x8xf32, #tpu.memory_space<vmem>>, vector<1x8xf32>
    %73 = vector.broadcast %72 : vector<1x8xf32> to vector<256x8xf32>
    %74 = arith.mulf %71, %73 : vector<256x8xf32>
    %c0_136 = arith.constant 0 : index
    %c0_137 = arith.constant 0 : index
    %75 = vector.load %arg7[%c0_136, %c0_137] : memref<1x8xf32, #tpu.memory_space<vmem>>, vector<1x8xf32>
    %76 = vector.broadcast %75 : vector<1x8xf32> to vector<256x8xf32>
    %77 = arith.addf %74, %76 : vector<256x8xf32>
    %78 = arith.addf %77, %40 : vector<256x8xf32>
    %cst_138 = arith.constant 0.000000e+00 : f32
    %79 = vector.broadcast %cst_138 : f32 to vector<256x8xf32>
    %80 = arith.maximumf %78, %79 : vector<256x8xf32>
    %81 = vector.shape_cast %80 : vector<256x8xf32> to vector<1x256x8xf32>
    %c0_139 = arith.constant 0 : index
    %c0_140 = arith.constant 0 : index
    %c0_141 = arith.constant 0 : index
    %82 = vector.load %arg8[%c0_139, %c0_140, %c0_141] : memref<1x256x8xf32, #tpu.memory_space<vmem>>, vector<1x256x8xf32>
    tpu.vector_store %arg8[%c0_139, %c0_140, %c0_141], %81 {strides = array<i32>} : memref<1x256x8xf32, #tpu.memory_space<vmem>>, vector<1x256x8xf32>,
    return
  }
  func.func @transform_0(%arg0: i32) -> (i32, i32, i32, i32) {
    %c0_i32 = arith.constant 0 : i32
    %c0_i32_0 = arith.constant 0 : i32
    %c0_i32_1 = arith.constant 0 : i32
    %c0_i32_2 = arith.constant 0 : i32
    return %arg0, %c0_i32, %c0_i32_0, %c0_i32_1 : i32, i32, i32, i32
  }
  func.func @transform_1(%arg0: i32) -> (i32, i32) {
    %c0_i32 = arith.constant 0 : i32
    %c0_i32_0 = arith.constant 0 : i32
    %c0_i32_1 = arith.constant 0 : i32
    return %c0_i32, %c0_i32_0 : i32, i32
  }
  func.func @transform_2(%arg0: i32) -> (i32, i32) {
    %c0_i32 = arith.constant 0 : i32
    %c0_i32_0 = arith.constant 0 : i32
    %c0_i32_1 = arith.constant 0 : i32
    return %c0_i32, %c0_i32_0 : i32, i32
  }
  func.func @transform_3(%arg0: i32) -> (i32, i32) {
    %c0_i32 = arith.constant 0 : i32
    %c0_i32_0 = arith.constant 0 : i32
    %c0_i32_1 = arith.constant 0 : i32
    return %c0_i32, %c0_i32_0 : i32, i32
  }
  func.func @transform_4(%arg0: i32) -> (i32, i32) {
    %c0_i32 = arith.constant 0 : i32
    %c0_i32_0 = arith.constant 0 : i32
    %c0_i32_1 = arith.constant 0 : i32
    return %c0_i32, %c0_i32_0 : i32, i32
  }
  func.func @transform_5(%arg0: i32) -> (i32, i32) {
    %c0_i32 = arith.constant 0 : i32
    %c0_i32_0 = arith.constant 0 : i32
    %c0_i32_1 = arith.constant 0 : i32
    return %c0_i32, %c0_i32_0 : i32, i32
  }
  func.func @transform_6(%arg0: i32) -> (i32, i32) {
    %c0_i32 = arith.constant 0 : i32
    %c0_i32_0 = arith.constant 0 : i32
    %c0_i32_1 = arith.constant 0 : i32
    return %c0_i32, %c0_i32_0 : i32, i32
  }
  func.func @transform_7(%arg0: i32) -> (i32, i32, i32) {
    %c0_i32 = arith.constant 0 : i32
    %c0_i32_0 = arith.constant 0 : i32
    %c0_i32_1 = arith.constant 0 : i32
    return %arg0, %c0_i32, %c0_i32_0 : i32, i32, i32
  }
}

</mosaic_0001>

<bundles_post_ra>
// kernel: tpu_custom_call.1
= control target key start
LH: loop header
LB: loop body
LE: loop exit
PB: predicated region body
PF: predicated region fallthrough
CT: control target
= control target key end

     0   :  { %s5070_s24 = smov 0   ;;  %s8228_s0 = inlined_call_operand.vmem [shape: f32[2,16,16,8], index: 0, kind: input, shape index: {}]   ;;  %s8229_s1 = inlined_call_operand.vmem [shape: f32[72,8], index: 1, kind: input, shape index: {}]   ;;  %s8230_s2 = inlined_call_operand.vmem [shape: f32[1,8], index: 2, kind: input, shape index: {}]   ;;  %s8231_s3 = inlined_call_operand.vmem [shape: f32[1,8], index: 3, kind: input, shape index: {}]   ;;  %s8232_s4 = inlined_call_operand.vmem [shape: f32[72,8], index: 4, kind: input, shape index: {}]   ;;  %s8233_s5 = inlined_call_operand.vmem [shape: f32[1,8], index: 5, kind: input, shape index: {}]   ;;  %s8234_s6 = inlined_call_operand.vmem [shape: f32[1,8], index: 6, kind: input, shape index: {}]   ;;  %s8235_s7 = inlined_call_operand.vmem [shape: f32[2,256,8], index: 7, kind: output, shape index: {}]  }
   0x1 LB: > { %s4635_s25 = sadd.s32 4294967295, %s5019_s24   ;;  %p4639_p0 = scmp.ge.s32.totalorder %s5019_s24, 1  ;;  %s5019_s24 = sphi %s5070_s24, %s17_s24  }
   0x2   : > { %p237_p1 = scmp.lt.s32.totalorder %s5019_s24, 3 }
   0x4   : > { %p238_p2 = pnand %p4639_p0, %p237_p1 }
   0x6   : > { %241 = sbr.rel (%p238_p2) target bundleno = 1690 (0x69a), region = 48 }
   0xd   : > { %vm279_vm0 = vcmask 64512   ;;  %vm282_vm1 = vcmask 58368   ;;  %p5080_p3 = scmp.lt.s32.totalorder %s4635_s25, 1  ;;  %vm289_vm2 = vcmask 57344   ;;  %v5021_v0 = vmov 0.0   ;;  %s5022_s8 = smov 8  }
   0xe   : > { %280 = vst.msk [vmem:[#allocation2] sm:$0xff] %vm279_vm0, %v5021_v0  ;;  %281 = vst.msk [vmem:[#allocation2 + $0x8] sm:$0xff] %vm279_vm0, %v5021_v0  ;;  %s5023_s9 = smov 16   ;;  %s5024_s10 = smov 24   ;;  %vm1731_vm3 = vcmask 130048   ;;  %vm1764_vm4 = vcmask 195584  }
   0xf   : > { %285 = vst.msk [vmem:[#allocation2 + $0x198] sm:$0xff] %vm279_vm0, %v5021_v0  ;;  %286 = vst.msk [vmem:[#allocation2 + $0x1a0] sm:$0xff] %vm279_vm0, %v5021_v0  ;;  %s8750_s25 = smov (!%p5080_p3, %s4635_s25), 1  ;;  %s5025_s11 = smov 32   ;;  %vm1797_vm5 = vcmask 261120   ;;  %vm1830_vm6 = vcmask 326656  }
  0x10   : > { %2435 = vst.msk [vmem:[#allocation3] sm:$0xff] %vm279_vm0, %v5021_v0  ;;  %2436 = vst.msk [vmem:[#allocation3 + $0x8] sm:$0xff] %vm279_vm0, %v5021_v0  ;;  %s4714_s27 = sshll.u32 %s8750_s25, 8  ;;  %s5026_s12 = smov 40   ;;  %vm1863_vm7 = vcmask 392192   ;;  %vm1896_vm8 = vcmask 457728  }
  0x11   : > { %2439 = vst.msk [vmem:[#allocation3 + $0x198] sm:$0xff] %vm279_vm0, %v5021_v0  ;;  %2440 = vst.msk [vmem:[#allocation3 + $0x1a0] sm:$0xff] %vm279_vm0, %v5021_v0  ;;  %s5244_s30 = scalar_lea.vmem %s8228_s0, %s4714_s27  ;;  %s5027_s13 = smov 48   ;;  %vm1929_vm9 = vcmask 523264   ;;  %vm1971_vm10 = vcmask 588800  }
  0x12   : > { %283 = vst.msk [vmem:[#allocation2 + $0x10] sm:$0x3] %vm282_vm1, %v5021_v0  ;;  %287 = vst.msk [vmem:[#allocation2 + $0x1a8] sm:$0x3] %vm282_vm1, %v5021_v0  ;;  %v322_v1 = vld [vmem:[%s5244_s30] sm:$0xff]  ;;  %v324_v2 = vld [vmem:[%s5244_s30 + $0x10] sm:$0xff]  ;;  %s7953_s15 = scalar_lea.vmem %s8235_s7, %s4714_s27 }
  0x13   : > { %2437 = vst.msk [vmem:[#allocation3 + $0x10] sm:$0x3] %vm282_vm1, %v5021_v0  ;;  %2441 = vst.msk [vmem:[#allocation3 + $0x1a8] sm:$0x3] %vm282_vm1, %v5021_v0  ;;  %v323_v3 = vld [vmem:[%s5244_s30 + $0x8] sm:$0xff]  ;;  %v326_v4 = vld [vmem:[%s5244_s30 + $0x20] sm:$0xff] }
  0x14   : > { %306 = vst.msk [vmem:[#allocation2 + $0x29] sm:$0x1] %vm289_vm2, %v5021_v0  ;;  %290 = vst.msk [vmem:[#allocation2 + $0x18] sm:$0x1] %vm289_vm2, %v5021_v0  ;;  %v325_v5 = vld [vmem:[%s5244_s30 + $0x18] sm:$0xff]  ;;  %v328_v6 = vld [vmem:[%s5244_s30 + $0x30] sm:$0xff] }
  0x15   : > { %291 = vst.msk [vmem:[#allocation2 + $0x30] sm:$0x1] %vm289_vm2, %v5021_v0  ;;  %292 = vst.msk [vmem:[#allocation2 + $0x48] sm:$0x1] %vm289_vm2, %v5021_v0  ;;  %v418_v7 = vld [vmem:[#allocation2 + $0x1] sm:$0xff]  ;;  %v329_v11 = vld [vmem:[%s5244_s30 + $0x38] sm:$0xff] }
  0x16   : > { %293 = vst.msk [vmem:[#allocation2 + $0x60] sm:$0x1] %vm289_vm2, %v5021_v0  ;;  %294 = vst.msk [vmem:[#allocation2 + $0x78] sm:$0x1] %vm289_vm2, %v5021_v0  ;;  %v327_v9 = vld [vmem:[%s5244_s30 + $0x28] sm:$0xff]  ;;  %707 = vrot.lane.b32.xlu0 %v418_v7, %s5022_s8  ;;  %v330_v10 = vld [vmem:[%s5244_s30 + $0x40] sm:$0xff] }
  0x17   : > { %295 = vst.msk [vmem:[#allocation2 + $0x90] sm:$0x1] %vm289_vm2, %v5021_v0  ;;  %296 = vst.msk [vmem:[#allocation2 + $0xa8] sm:$0x1] %vm289_vm2, %v5021_v0  ;;  %v332_v12 = vld [vmem:[%s5244_s30 + $0x50] sm:$0xff]  ;;  %v331_v13 = vld [vmem:[%s5244_s30 + $0x48] sm:$0xff] }
  0x18   : > { %297 = vst.msk [vmem:[#allocation2 + $0xc0] sm:$0x1] %vm289_vm2, %v5021_v0  ;;  %298 = vst.msk [vmem:[#allocation2 + $0xd8] sm:$0x1] %vm289_vm2, %v5021_v0  ;;  %v334_v14 = vld [vmem:[%s5244_s30 + $0x60] sm:$0xff]  ;;  %v333_v15 = vld [vmem:[%s5244_s30 + $0x58] sm:$0xff] }
  0x19   : > { %299 = vst.msk [vmem:[#allocation2 + $0xf0] sm:$0x1] %vm289_vm2, %v5021_v0  ;;  %300 = vst.msk [vmem:[#allocation2 + $0x108] sm:$0x1] %vm289_vm2, %v5021_v0  ;;  %v419_v8 = vld [vmem:[#allocation2 + $0x9] sm:$0xff]  ;;  %v338_v18 = vld [vmem:[%s5244_s30 + $0x80] sm:$0xff] }
  0x1a   : > { %301 = vst.msk [vmem:[#allocation2 + $0x120] sm:$0x1] %vm289_vm2, %v5021_v0  ;;  %302 = vst.msk [vmem:[#allocation2 + $0x138] sm:$0x1] %vm289_vm2, %v5021_v0  ;;  %v336_v16 = vld [vmem:[%s5244_s30 + $0x70] sm:$0xff]  ;;  %v335_v17 = vld [vmem:[%s5244_s30 + $0x68] sm:$0xff]  ;;  %709 = vrot.lane.b32.xlu0 %v419_v8, %s5022_s8 }
  0x1b   : > { %303 = vst.msk [vmem:[#allocation2 + $0x150] sm:$0x1] %vm289_vm2, %v5021_v0  ;;  %304 = vst.msk [vmem:[#allocation2 + $0x168] sm:$0x1] %vm289_vm2, %v5021_v0  ;;  %v337_v19 = vld [vmem:[%s5244_s30 + $0x78] sm:$0xff]  ;;  %v340_v20 = vld [vmem:[%s5244_s30 + $0x90] sm:$0xff] }
  0x1c   : > { %305 = vst.msk [vmem:[#allocation2 + $0x180] sm:$0x1] %vm289_vm2, %v5021_v0  ;;  %307 = vst.msk [vmem:[#allocation2 + $0x41] sm:$0x1] %vm289_vm2, %v5021_v0  ;;  %v339_v21 = vld [vmem:[%s5244_s30 + $0x88] sm:$0xff]  ;;  %v342_v22 = vld [vmem:[%s5244_s30 + $0xa0] sm:$0xff] }
  0x1d   : > { %308 = vst.msk [vmem:[#allocation2 + $0x59] sm:$0x1] %vm289_vm2, %v5021_v0  ;;  %309 = vst.msk [vmem:[#allocation2 + $0x71] sm:$0x1] %vm289_vm2, %v5021_v0  ;;  %v341_v23 = vld [vmem:[%s5244_s30 + $0x98] sm:$0xff]  ;;  %v344_v24 = vld [vmem:[%s5244_s30 + $0xb0] sm:$0xff] }
  0x1e   : > { %310 = vst.msk [vmem:[#allocation2 + $0x89] sm:$0x1] %vm289_vm2, %v5021_v0  ;;  %311 = vst.msk [vmem:[#allocation2 + $0xa1] sm:$0x1] %vm289_vm2, %v5021_v0  ;;  %v343_v28 = vld [vmem:[%s5244_s30 + $0xa8] sm:$0xff]  ;;  %v346_v29 = vld [vmem:[%s5244_s30 + $0xc0] sm:$0xff] }
  0x1f   : > { %312 = vst.msk [vmem:[#allocation2 + $0xb9] sm:$0x1] %vm289_vm2, %v5021_v0  ;;  %313 = vst.msk [vmem:[#allocation2 + $0xd1] sm:$0x1] %vm289_vm2, %v5021_v0  ;;  %v345_v33 = vld [vmem:[%s5244_s30 + $0xb8] sm:$0xff]  ;;  %v348_v34 = vld [vmem:[%s5244_s30 + $0xd0] sm:$0xff] }
  0x20   : > { %314 = vst.msk [vmem:[#allocation2 + $0xe9] sm:$0x1] %vm289_vm2, %v5021_v0  ;;  %315 = vst.msk [vmem:[#allocation2 + $0x101] sm:$0x1] %vm289_vm2, %v5021_v0  ;;  %v347_v35 = vld [vmem:[%s5244_s30 + $0xc8] sm:$0xff]  ;;  %v350_v36 = vld [vmem:[%s5244_s30 + $0xe0] sm:$0xff] }
  0x21   : > { %316 = vst.msk [vmem:[#allocation2 + $0x119] sm:$0x1] %vm289_vm2, %v5021_v0  ;;  %317 = vst.msk [vmem:[#allocation2 + $0x131] sm:$0x1] %vm289_vm2, %v5021_v0  ;;  %v349_v37 = vld [vmem:[%s5244_s30 + $0xd8] sm:$0xff]  ;;  %v351_v39 = vld [vmem:[%s5244_s30 + $0xe8] sm:$0xff] }
  0x22   : > { %318 = vst.msk [vmem:[#allocation2 + $0x149] sm:$0x1] %vm289_vm2, %v5021_v0  ;;  %319 = vst.msk [vmem:[#allocation2 + $0x161] sm:$0x1] %vm289_vm2, %v5021_v0  ;;  %v352_v58 = vld [vmem:[%s5244_s30 + $0xf0] sm:$0xff]  ;;  %v353_v62 = vld [vmem:[%s5244_s30 + $0xf8] sm:$0xff] }
  0x23   : > { %320 = vst.msk [vmem:[#allocation2 + $0x179] sm:$0x1] %vm289_vm2, %v5021_v0  ;;  %321 = vst.msk [vmem:[#allocation2 + $0x191] sm:$0x1] %vm289_vm2, %v5021_v0  ;;  %s5028_s19 = smov 56   ;;  %s5029_s20 = smov 64  }
  0x24   : > { %2443 = vst.msk [vmem:[#allocation3 + $0x18] sm:$0x1] %vm289_vm2, %v5021_v0  ;;  %2444 = vst.msk [vmem:[#allocation3 + $0x30] sm:$0x1] %vm289_vm2, %v5021_v0 }
  0x25   : > { %2445 = vst.msk [vmem:[#allocation3 + $0x48] sm:$0x1] %vm289_vm2, %v5021_v0  ;;  %2446 = vst.msk [vmem:[#allocation3 + $0x60] sm:$0x1] %vm289_vm2, %v5021_v0 }
  0x26   : > { %2447 = vst.msk [vmem:[#allocation3 + $0x78] sm:$0x1] %vm289_vm2, %v5021_v0  ;;  %2448 = vst.msk [vmem:[#allocation3 + $0x90] sm:$0x1] %vm289_vm2, %v5021_v0 }
  0x27   : > { %2449 = vst.msk [vmem:[#allocation3 + $0xa8] sm:$0x1] %vm289_vm2, %v5021_v0  ;;  %2450 = vst.msk [vmem:[#allocation3 + $0xc0] sm:$0x1] %vm289_vm2, %v5021_v0 }
  0x28   : > { %2451 = vst.msk [vmem:[#allocation3 + $0xd8] sm:$0x1] %vm289_vm2, %v5021_v0  ;;  %2452 = vst.msk [vmem:[#allocation3 + $0xf0] sm:$0x1] %vm289_vm2, %v5021_v0 }
  0x29   : > { %2453 = vst.msk [vmem:[#allocation3 + $0x108] sm:$0x1] %vm289_vm2, %v5021_v0  ;;  %2454 = vst.msk [vmem:[#allocation3 + $0x120] sm:$0x1] %vm289_vm2, %v5021_v0 }
  0x2a   : > { %2455 = vst.msk [vmem:[#allocation3 + $0x138] sm:$0x1] %vm289_vm2, %v5021_v0  ;;  %2456 = vst.msk [vmem:[#allocation3 + $0x150] sm:$0x1] %vm289_vm2, %v5021_v0 }
  0x2b   : > { %2457 = vst.msk [vmem:[#allocation3 + $0x168] sm:$0x1] %vm289_vm2, %v5021_v0  ;;  %2458 = vst.msk [vmem:[#allocation3 + $0x180] sm:$0x1] %vm289_vm2, %v5021_v0 }
  0x2c   : > { %2459 = vst.msk [vmem:[#allocation3 + $0x29] sm:$0x1] %vm289_vm2, %v5021_v0  ;;  %2460 = vst.msk [vmem:[#allocation3 + $0x41] sm:$0x1] %vm289_vm2, %v5021_v0 }
  0x2d   : > { %2461 = vst.msk [vmem:[#allocation3 + $0x59] sm:$0x1] %vm289_vm2, %v5021_v0  ;;  %2462 = vst.msk [vmem:[#allocation3 + $0x71] sm:$0x1] %vm289_vm2, %v5021_v0 }
  0x2e   : > { %2463 = vst.msk [vmem:[#allocation3 + $0x89] sm:$0x1] %vm289_vm2, %v5021_v0  ;;  %2464 = vst.msk [vmem:[#allocation3 + $0xa1] sm:$0x1] %vm289_vm2, %v5021_v0 }
  0x2f   : > { %2465 = vst.msk [vmem:[#allocation3 + $0xb9] sm:$0x1] %vm289_vm2, %v5021_v0  ;;  %2466 = vst.msk [vmem:[#allocation3 + $0xd1] sm:$0x1] %vm289_vm2, %v5021_v0 }
  0x30   : > { %2467 = vst.msk [vmem:[#allocation3 + $0xe9] sm:$0x1] %vm289_vm2, %v5021_v0  ;;  %2468 = vst.msk [vmem:[#allocation3 + $0x101] sm:$0x1] %vm289_vm2, %v5021_v0 }
  0x31   : > { %2469 = vst.msk [vmem:[#allocation3 + $0x119] sm:$0x1] %vm289_vm2, %v5021_v0  ;;  %2470 = vst.msk [vmem:[#allocation3 + $0x131] sm:$0x1] %vm289_vm2, %v5021_v0 }
  0x32   : > { %2471 = vst.msk [vmem:[#allocation3 + $0x149] sm:$0x1] %vm289_vm2, %v5021_v0  ;;  %2472 = vst.msk [vmem:[#allocation3 + $0x161] sm:$0x1] %vm289_vm2, %v5021_v0 }
  0x33   : > { %2473 = vst.msk [vmem:[#allocation3 + $0x179] sm:$0x1] %vm289_vm2, %v5021_v0  ;;  %2474 = vst.msk [vmem:[#allocation3 + $0x191] sm:$0x1] %vm289_vm2, %v5021_v0  ;;  %v450_v0 = vld [vmem:[#allocation2 + $0x2] sm:$0xff] }
  0x34   : > { %354 = vst.msk [vmem:[#allocation2 + $0x19] sm:$0xff] %vm279_vm0, %v322_v1  ;;  %356 = vst.msk [vmem:[#allocation2 + $0x31] sm:$0xff] %vm279_vm0, %v324_v2 }
  0x35   : > { %355 = vst.msk [vmem:[#allocation2 + $0x21] sm:$0xff] %vm279_vm0, %v323_v3  ;;  %358 = vst.msk [vmem:[#allocation2 + $0x49] sm:$0xff] %vm279_vm0, %v326_v4  ;;  %v451_v3 = vld [vmem:[#allocation2 + $0xa] sm:$0xff] }
  0x36   : > { %357 = vst.msk [vmem:[#allocation2 + $0x39] sm:$0xff] %vm279_vm0, %v325_v5  ;;  %360 = vst.msk [vmem:[#allocation2 + $0x61] sm:$0xff] %vm279_vm0, %v328_v6 }
  0x37   : > { %359 = vst.msk [vmem:[#allocation2 + $0x51] sm:$0xff] %vm279_vm0, %v327_v9  ;;  %362 = vst.msk [vmem:[#allocation2 + $0x79] sm:$0xff] %vm279_vm0, %v330_v10 }
  0x38   : > { %361 = vst.msk [vmem:[#allocation2 + $0x69] sm:$0xff] %vm279_vm0, %v329_v11  ;;  %364 = vst.msk [vmem:[#allocation2 + $0x91] sm:$0xff] %vm279_vm0, %v332_v12 }
  0x39   : > { %363 = vst.msk [vmem:[#allocation2 + $0x81] sm:$0xff] %vm279_vm0, %v331_v13  ;;  %366 = vst.msk [vmem:[#allocation2 + $0xa9] sm:$0xff] %vm279_vm0, %v334_v14 }
  0x3a   : > { %365 = vst.msk [vmem:[#allocation2 + $0x99] sm:$0xff] %vm279_vm0, %v333_v15  ;;  %368 = vst.msk [vmem:[#allocation2 + $0xc1] sm:$0xff] %vm279_vm0, %v336_v16 }
  0x3b   : > { %367 = vst.msk [vmem:[#allocation2 + $0xb1] sm:$0xff] %vm279_vm0, %v335_v17  ;;  %370 = vst.msk [vmem:[#allocation2 + $0xd9] sm:$0xff] %vm279_vm0, %v338_v18  ;;  %v5289_v25 = vld [vmem:[#allocation2 + $0x19] sm:$0xff]  ;;  %v5291_v26 = vld [vmem:[#allocation2 + $0x31] sm:$0xff] }
  0x3c   : > { %369 = vst.msk [vmem:[#allocation2 + $0xc9] sm:$0xff] %vm279_vm0, %v337_v19  ;;  %372 = vst.msk [vmem:[#allocation2 + $0xf1] sm:$0xff] %vm279_vm0, %v340_v20  ;;  %711 = vrot.lane.b32.xlu1 %v5289_v25, %s5022_s8  ;;  %v5298_v27 = vld [vmem:[#allocation2 + $0x21] sm:$0xff]  ;;  %715 = vrot.lane.b32.xlu0 %v5291_v26, %s5022_s8  ;;  %v5306_v30 = vld [vmem:[#allocation2 + $0x49] sm:$0xff] }
  0x3d   : > { %371 = vst.msk [vmem:[#allocation2 + $0xe1] sm:$0xff] %vm279_vm0, %v339_v21  ;;  %374 = vst.msk [vmem:[#allocation2 + $0x109] sm:$0xff] %vm279_vm0, %v342_v22  ;;  %v5310_v31 = vld [vmem:[#allocation2 + $0x39] sm:$0xff]  ;;  %v5314_v32 = vld [vmem:[#allocation2 + $0x61] sm:$0xff] }
  0x3e   : > { %373 = vst.msk [vmem:[#allocation2 + $0xf9] sm:$0xff] %vm279_vm0, %v341_v23  ;;  %376 = vst.msk [vmem:[#allocation2 + $0x121] sm:$0xff] %vm279_vm0, %v344_v24  ;;  %v5326_v38 = vld [vmem:[#allocation2 + $0x51] sm:$0xff]  ;;  %v5334_v40 = vld [vmem:[#allocation2 + $0x79] sm:$0xff] }
  0x3f   : > { %375 = vst.msk [vmem:[#allocation2 + $0x111] sm:$0xff] %vm279_vm0, %v343_v28  ;;  %378 = vst.msk [vmem:[#allocation2 + $0x139] sm:$0xff] %vm279_vm0, %v346_v29  ;;  %v5338_v41 = vld [vmem:[#allocation2 + $0x69] sm:$0xff]  ;;  %v5342_v42 = vld [vmem:[#allocation2 + $0x91] sm:$0xff] }
  0x40   : > { %713 = vrot.lane.b32.xlu1 %v5298_v27, %s5022_s8  ;;  %719 = vrot.lane.b32.xlu0 %v5306_v30, %s5022_s8  ;;  %377 = vst.msk [vmem:[#allocation2 + $0x129] sm:$0xff] %vm279_vm0, %v345_v33  ;;  %380 = vst.msk [vmem:[#allocation2 + $0x151] sm:$0xff] %vm279_vm0, %v348_v34  ;;  %v5346_v43 = vld [vmem:[#allocation2 + $0x81] sm:$0xff]  ;;  %v5350_v44 = vld [vmem:[#allocation2 + $0xa9] sm:$0xff] }
  0x41   : > { %379 = vst.msk [vmem:[#allocation2 + $0x141] sm:$0xff] %vm279_vm0, %v347_v35  ;;  %382 = vst.msk [vmem:[#allocation2 + $0x169] sm:$0xff] %vm279_vm0, %v350_v36  ;;  %v5354_v45 = vld [vmem:[#allocation2 + $0x99] sm:$0xff]  ;;  %v5358_v46 = vld [vmem:[#allocation2 + $0xc1] sm:$0xff] }
  0x42   : > { %381 = vst.msk [vmem:[#allocation2 + $0x159] sm:$0xff] %vm279_vm0, %v349_v37  ;;  %383 = vst.msk [vmem:[#allocation2 + $0x171] sm:$0xff] %vm279_vm0, %v351_v39  ;;  %v5362_v47 = vld [vmem:[#allocation2 + $0xb1] sm:$0xff]  ;;  %v5366_v48 = vld [vmem:[#allocation2 + $0xd9] sm:$0xff] }
  0x43   : > { %v5370_v49 = vld [vmem:[#allocation2 + $0xc9] sm:$0xff]  ;;  %v5374_v50 = vld [vmem:[#allocation2 + $0xf1] sm:$0xff]  ;;  %384 = vst.msk [vmem:[#allocation2 + $0x181] sm:$0xff] %vm279_vm0, %v352_v58  ;;  %385 = vst.msk [vmem:[#allocation2 + $0x189] sm:$0xff] %vm279_vm0, %v353_v62 }
  0x44   : > { %717 = vrot.lane.b32.xlu1 %v5310_v31, %s5022_s8  ;;  %723 = vrot.lane.b32.xlu0 %v5314_v32, %s5022_s8  ;;  %v5378_v51 = vld [vmem:[#allocation2 + $0xe1] sm:$0xff]  ;;  %v5382_v52 = vld [vmem:[#allocation2 + $0x109] sm:$0xff]  ;;  %v5437_v4 = vld [vmem:[#allocation2 + $0x32] sm:$0xff] }
  0x45   : > { %v5386_v53 = vld [vmem:[#allocation2 + $0xf9] sm:$0xff]  ;;  %v5390_v54 = vld [vmem:[#allocation2 + $0x121] sm:$0xff]  ;;  %v5444_v6 = vld [vmem:[#allocation2 + $0x4a] sm:$0xff] }
  0x46   : > { %v5394_v55 = vld [vmem:[#allocation2 + $0x111] sm:$0xff]  ;;  %v5398_v56 = vld [vmem:[#allocation2 + $0x139] sm:$0xff]  ;;  %v5440_v5 = vld [vmem:[#allocation2 + $0x22] sm:$0xff] }
  0x47   : > { %v5402_v57 = vld [vmem:[#allocation2 + $0x129] sm:$0xff]  ;;  %v5408_v59 = vld [vmem:[#allocation2 + $0x151] sm:$0xff]  ;;  %v5431_v2 = vld [vmem:[#allocation2 + $0x1a] sm:$0xff] }
  0x48   : > { %721 = vrot.lane.b32.xlu1 %v5326_v38, %s5022_s8  ;;  %727 = vrot.lane.b32.xlu0 %v5334_v40, %s5022_s8  ;;  %v5412_v60 = vld [vmem:[#allocation2 + $0x141] sm:$0xff]  ;;  %v5416_v61 = vld [vmem:[#allocation2 + $0x169] sm:$0xff]  ;;  %v5456_v9 = vld [vmem:[#allocation2 + $0x52] sm:$0xff] }
  0x49   : > { %v5422_v63 = vld [vmem:[#allocation2 + $0x159] sm:$0xff]  ;;  %v5428_v1 = vld [vmem:[#allocation2 + $0x171] sm:$0xff]  ;;  %v5452_v8 = vld [vmem:[#allocation2 + $0x62] sm:$0xff] }
  0x4a   : > { %v5448_v7 = vld [vmem:[#allocation2 + $0x3a] sm:$0xff]  ;;  %v5464_v11 = vld [vmem:[#allocation2 + $0x6a] sm:$0xff]  ;;  %v5468_v12 = vld [vmem:[#allocation2 + $0x92] sm:$0xff] }
  0x4b   : > { %v5460_v10 = vld [vmem:[#allocation2 + $0x7a] sm:$0xff]  ;;  %v5472_v13 = vld [vmem:[#allocation2 + $0x82] sm:$0xff]  ;;  %v5476_v14 = vld [vmem:[#allocation2 + $0xaa] sm:$0xff] }
  0x4c   : > { %725 = vrot.lane.b32.xlu1 %v5338_v41, %s5022_s8  ;;  %731 = vrot.lane.b32.xlu0 %v5342_v42, %s5022_s8  ;;  %v5480_v15 = vld [vmem:[#allocation2 + $0x9a] sm:$0xff]  ;;  %v5484_v16 = vld [vmem:[#allocation2 + $0xc2] sm:$0xff]  ;;  %v5488_v17 = vld [vmem:[#allocation2 + $0xb2] sm:$0xff] }
  0x4d   : > { %v5492_v18 = vld [vmem:[#allocation2 + $0xda] sm:$0xff]  ;;  %v5496_v19 = vld [vmem:[#allocation2 + $0xca] sm:$0xff]  ;;  %v5500_v20 = vld [vmem:[#allocation2 + $0xf2] sm:$0xff] }
  0x4e   : > { %v5504_v21 = vld [vmem:[#allocation2 + $0xe2] sm:$0xff]  ;;  %v5508_v22 = vld [vmem:[#allocation2 + $0x10a] sm:$0xff]  ;;  %v5512_v23 = vld [vmem:[#allocation2 + $0xfa] sm:$0xff] }
  0x4f   : > { %v5516_v24 = vld [vmem:[#allocation2 + $0x122] sm:$0xff]  ;;  %v5520_v28 = vld [vmem:[#allocation2 + $0x112] sm:$0xff]  ;;  %v5524_v29 = vld [vmem:[#allocation2 + $0x13a] sm:$0xff] }
  0x50   : > { %729 = vrot.lane.b32.xlu1 %v5346_v43, %s5022_s8  ;;  %735 = vrot.lane.b32.xlu0 %v5350_v44, %s5022_s8  ;;  %v5530_v34 = vld [vmem:[#allocation2 + $0x12a] sm:$0xff]  ;;  %v5534_v35 = vld [vmem:[#allocation2 + $0x152] sm:$0xff]  ;;  %v5540_v37 = vld [vmem:[#allocation2 + $0x142] sm:$0xff] }
  0x51   : > { %8277 = vst [vmem:[#allocation6_spill] sm:$0xff] %v5540_v37  ;;  %v5546_v58 = vld [vmem:[#allocation2 + $0x16a] sm:$0xff] }
  0x52   : > { %8279 = vst [vmem:[#allocation8_spill] sm:$0xff] %v5546_v58 }
  0x54   : > { %733 = vrot.lane.b32.xlu1 %v5354_v45, %s5022_s8  ;;  %739 = vrot.lane.b32.xlu0 %v5358_v46, %s5022_s8 }
  0x58   : > { %737 = vrot.lane.b32.xlu1 %v5362_v47, %s5022_s8  ;;  %743 = vrot.lane.b32.xlu0 %v5366_v48, %s5022_s8 }
  0x5c   : > { %741 = vrot.lane.b32.xlu1 %v5370_v49, %s5022_s8  ;;  %747 = vrot.lane.b32.xlu0 %v5374_v50, %s5022_s8 }
  0x60   : > { %745 = vrot.lane.b32.xlu1 %v5378_v51, %s5022_s8  ;;  %751 = vrot.lane.b32.xlu0 %v5382_v52, %s5022_s8 }
  0x64   : > { %749 = vrot.lane.b32.xlu1 %v5386_v53, %s5022_s8  ;;  %755 = vrot.lane.b32.xlu0 %v5390_v54, %s5022_s8 }
  0x68   : > { %753 = vrot.lane.b32.xlu1 %v5394_v55, %s5022_s8  ;;  %759 = vrot.lane.b32.xlu0 %v5398_v56, %s5022_s8 }
  0x6c   : > { %757 = vrot.lane.b32.xlu1 %v5402_v57, %s5022_s8  ;;  %763 = vrot.lane.b32.xlu0 %v5408_v59, %s5022_s8 }
  0x70   : > { %761 = vrot.lane.b32.xlu1 %v5412_v60, %s5022_s8  ;;  %767 = vrot.lane.b32.xlu0 %v5416_v61, %s5022_s8 }
  0x74   : > { %765 = vrot.lane.b32.xlu1 %v5422_v63, %s5022_s8  ;;  %835 = vrot.lane.b32.xlu0 %v450_v0, %s5023_s9  ;;  %v5552_v0 = vld [vmem:[#allocation2 + $0x15a] sm:$0xff] }
  0x75   : > { %8281 = vst [vmem:[#allocation10_spill] sm:$0xff] %v5552_v0 }
  0x78   : > { %769 = vrot.lane.b32.xlu1 %v5428_v1, %s5022_s8  ;;  %839 = vrot.lane.b32.xlu0 %v5431_v2, %s5023_s9 }
  0x7c   : > { %837 = vrot.lane.b32.xlu1 %v451_v3, %s5023_s9  ;;  %843 = vrot.lane.b32.xlu0 %v5437_v4, %s5023_s9 }
  0x80   : > { %841 = vrot.lane.b32.xlu1 %v5440_v5, %s5023_s9  ;;  %847 = vrot.lane.b32.xlu0 %v5444_v6, %s5023_s9 }
  0x84   : > { %845 = vrot.lane.b32.xlu1 %v5448_v7, %s5023_s9  ;;  %851 = vrot.lane.b32.xlu0 %v5452_v8, %s5023_s9 }
  0x88   : > { %849 = vrot.lane.b32.xlu1 %v5456_v9, %s5023_s9  ;;  %855 = vrot.lane.b32.xlu0 %v5460_v10, %s5023_s9  ;;  %v5526_v33 = vpop.permute.xlu0 %707 }
  0x89   : > { %8275 = vst [vmem:[#allocation4_spill] sm:$0xff] %v5526_v33 }
  0x8c   : > { %853 = vrot.lane.b32.xlu1 %v5464_v11, %s5023_s9  ;;  %859 = vrot.lane.b32.xlu0 %v5468_v12, %s5023_s9  ;;  %v5536_v36 = vpop.permute.xlu0 %709 }
  0x8d   : > { %8276 = vst [vmem:[#allocation5_spill] sm:$0xff] %v5536_v36  ;;  %v5564_v36 = vld [vmem:[#allocation2 + $0x172] sm:$0xff] }
  0x8e   : > { %8285 = vst [vmem:[#allocation14_spill] sm:$0xff] %v5564_v36 }
  0x90   : > { %857 = vrot.lane.b32.xlu1 %v5472_v13, %s5023_s9  ;;  %863 = vrot.lane.b32.xlu0 %v5476_v14, %s5023_s9 }
  0x94   : > { %861 = vrot.lane.b32.xlu1 %v5480_v15, %s5023_s9  ;;  %867 = vrot.lane.b32.xlu0 %v5484_v16, %s5023_s9 }
  0x98   : > { %865 = vrot.lane.b32.xlu1 %v5488_v17, %s5023_s9  ;;  %871 = vrot.lane.b32.xlu0 %v5492_v18, %s5023_s9 }
  0x9c   : > { %869 = vrot.lane.b32.xlu1 %v5496_v19, %s5023_s9  ;;  %875 = vrot.lane.b32.xlu0 %v5500_v20, %s5023_s9 }
  0xa0   : > { %873 = vrot.lane.b32.xlu1 %v5504_v21, %s5023_s9  ;;  %879 = vrot.lane.b32.xlu0 %v5508_v22, %s5023_s9 }
  0xa4   : > { %877 = vrot.lane.b32.xlu1 %v5512_v23, %s5023_s9  ;;  %883 = vrot.lane.b32.xlu0 %v5516_v24, %s5023_s9 }
  0xa8   : > { %881 = vrot.lane.b32.xlu1 %v5520_v28, %s5023_s9  ;;  %887 = vrot.lane.b32.xlu0 %v5524_v29, %s5023_s9 }
  0xac   : > { %885 = vrot.lane.b32.xlu1 %v5530_v34, %s5023_s9  ;;  %891 = vrot.lane.b32.xlu0 %v5534_v35, %s5023_s9 }
  0xae   : > { %v5544_v39 = vpop.permute.xlu1 %711  ;;  %v5548_v62 = vpop.permute.xlu0 %715 }
  0xaf   : > { %8278 = vst [vmem:[#allocation7_spill] sm:$0xff] %v5544_v39  ;;  %8280 = vst [vmem:[#allocation9_spill] sm:$0xff] %v5548_v62  ;;  %v5562_v39 = vld [vmem:[#allocation2 + $0x18] sm:$0xff] }
  0xb0   : > { %889 = vrot.lane.b32.xlu1 %v5540_v37, %s5023_s9  ;;  %895 = vrot.lane.b32.xlu0 %v5546_v58, %s5023_s9  ;;  %8284 = vst [vmem:[#allocation13_spill] sm:$0xff] %v5562_v39 }
  0xb2   : > { %v5556_v3 = vpop.permute.xlu1 %713  ;;  %v5558_v33 = vpop.permute.xlu0 %719 }
  0xb3   : > { %8282 = vst [vmem:[#allocation11_spill] sm:$0xff] %v5556_v3  ;;  %8283 = vst [vmem:[#allocation12_spill] sm:$0xff] %v5558_v33  ;;  %v5574_v3 = vld [vmem:[#allocation2 + $0x30] sm:$0xff] }
  0xb4   : > { %893 = vrot.lane.b32.xlu1 %v5552_v0, %s5023_s9  ;;  %963 = vrot.lane.b32.xlu0 %v5562_v39, %s5024_s10  ;;  %8288 = vst [vmem:[#allocation17_spill] sm:$0xff] %v5574_v3  ;;  %v389_v0 = vld [vmem:[#allocation2 + $0x20] sm:$0xff]  ;;  %v5583_v39 = vld [vmem:[#allocation2 + $0x48] sm:$0xff] }
  0xb5   : > { %8291 = vst [vmem:[#allocation20_spill] sm:$0xff] %v5583_v39 }
  0xb6   : > { %v5568_v62 = vpop.permute.xlu1 %717  ;;  %v5570_v37 = vpop.permute.xlu0 %723 }
  0xb7   : > { %8286 = vst [vmem:[#allocation15_spill] sm:$0xff] %v5568_v62  ;;  %8287 = vst [vmem:[#allocation16_spill] sm:$0xff] %v5570_v37  ;;  %v5589_v62 = vld [vmem:[#allocation2 + $0x38] sm:$0xff] }
  0xb8   : > { %897 = vrot.lane.b32.xlu1 %v5564_v36, %s5023_s9  ;;  %967 = vrot.lane.b32.xlu0 %v5574_v3, %s5024_s10  ;;  %8293 = vst [vmem:[#allocation22_spill] sm:$0xff] %v5589_v62 }
  0xba   : > { %v5578_v33 = vpop.permute.xlu1 %721  ;;  %v5580_v58 = vpop.permute.xlu0 %727 }
  0xbb   : > { %8289 = vst [vmem:[#allocation18_spill] sm:$0xff] %v5578_v33  ;;  %8290 = vst [vmem:[#allocation19_spill] sm:$0xff] %v5580_v58  ;;  %v5595_v33 = vld [vmem:[#allocation2 + $0x60] sm:$0xff]  ;;  %v5601_v58 = vld [vmem:[#allocation2 + $0x50] sm:$0xff] }
  0xbc   : > { %965 = vrot.lane.b32.xlu1 %v389_v0, %s5024_s10  ;;  %971 = vrot.lane.b32.xlu0 %v5583_v39, %s5024_s10  ;;  %8295 = vst [vmem:[#allocation24_spill] sm:$0xff] %v5595_v33  ;;  %8297 = vst [vmem:[#allocation26_spill] sm:$0xff] %v5601_v58 }
  0xbe   : > { %v5587_v37 = vpop.permute.xlu1 %725  ;;  %v5591_v36 = vpop.permute.xlu0 %731 }
  0xbf   : > { %8292 = vst [vmem:[#allocation21_spill] sm:$0xff] %v5587_v37  ;;  %8294 = vst [vmem:[#allocation23_spill] sm:$0xff] %v5591_v36  ;;  %v5607_v37 = vld [vmem:[#allocation2 + $0x78] sm:$0xff] }
  0xc0   : > { %969 = vrot.lane.b32.xlu1 %v5589_v62, %s5024_s10  ;;  %975 = vrot.lane.b32.xlu0 %v5595_v33, %s5024_s10  ;;  %8299 = vst [vmem:[#allocation28_spill] sm:$0xff] %v5607_v37  ;;  %v5613_v62 = vld [vmem:[#allocation2 + $0x68] sm:$0xff] }
  0xc1   : > { %8301 = vst [vmem:[#allocation30_spill] sm:$0xff] %v5613_v62 }
  0xc2   : > { %v5599_v0 = vpop.permute.xlu1 %729  ;;  %v5603_v3 = vpop.permute.xlu0 %735 }
  0xc3   : > { %8296 = vst [vmem:[#allocation25_spill] sm:$0xff] %v5599_v0  ;;  %8298 = vst [vmem:[#allocation27_spill] sm:$0xff] %v5603_v3  ;;  %v5619_v0 = vld [vmem:[#allocation2 + $0x90] sm:$0xff] }
  0xc4   : > { %973 = vrot.lane.b32.xlu1 %v5601_v58, %s5024_s10  ;;  %979 = vrot.lane.b32.xlu0 %v5607_v37, %s5024_s10  ;;  %8303 = vst [vmem:[#allocation32_spill] sm:$0xff] %v5619_v0  ;;  %v5625_v58 = vld [vmem:[#allocation2 + $0x80] sm:$0xff] }
  0xc5   : > { %8305 = vst [vmem:[#allocation34_spill] sm:$0xff] %v5625_v58 }
  0xc6   : > { %v5611_v36 = vpop.permute.xlu1 %733  ;;  %v5615_v39 = vpop.permute.xlu0 %739 }
  0xc7   : > { %8300 = vst [vmem:[#allocation29_spill] sm:$0xff] %v5611_v36  ;;  %8302 = vst [vmem:[#allocation31_spill] sm:$0xff] %v5615_v39  ;;  %v5631_v36 = vld [vmem:[#allocation2 + $0xa8] sm:$0xff] }
  0xc8   : > { %977 = vrot.lane.b32.xlu1 %v5613_v62, %s5024_s10  ;;  %983 = vrot.lane.b32.xlu0 %v5619_v0, %s5024_s10  ;;  %8307 = vst [vmem:[#allocation36_spill] sm:$0xff] %v5631_v36  ;;  %v5637_v62 = vld [vmem:[#allocation2 + $0x98] sm:$0xff] }
  0xc9   : > { %8309 = vst [vmem:[#allocation38_spill] sm:$0xff] %v5637_v62 }
  0xca   : > { %v5623_v3 = vpop.permute.xlu1 %737  ;;  %v5627_v33 = vpop.permute.xlu0 %743 }
  0xcb   : > { %8304 = vst [vmem:[#allocation33_spill] sm:$0xff] %v5623_v3  ;;  %8306 = vst [vmem:[#allocation35_spill] sm:$0xff] %v5627_v33  ;;  %v5643_v3 = vld [vmem:[#allocation2 + $0xc0] sm:$0xff] }
  0xcc   : > { %981 = vrot.lane.b32.xlu1 %v5625_v58, %s5024_s10  ;;  %987 = vrot.lane.b32.xlu0 %v5631_v36, %s5024_s10  ;;  %8311 = vst [vmem:[#allocation40_spill] sm:$0xff] %v5643_v3  ;;  %v5649_v58 = vld [vmem:[#allocation2 + $0xb0] sm:$0xff] }
  0xcd   : > { %8313 = vst [vmem:[#allocation42_spill] sm:$0xff] %v5649_v58 }
  0xce   : > { %v5635_v39 = vpop.permute.xlu1 %741  ;;  %v5639_v37 = vpop.permute.xlu0 %747 }
  0xcf   : > { %8308 = vst [vmem:[#allocation37_spill] sm:$0xff] %v5635_v39  ;;  %8310 = vst [vmem:[#allocation39_spill] sm:$0xff] %v5639_v37  ;;  %v5655_v39 = vld [vmem:[#allocation2 + $0xd8] sm:$0xff] }
  0xd0   : > { %985 = vrot.lane.b32.xlu1 %v5637_v62, %s5024_s10  ;;  %991 = vrot.lane.b32.xlu0 %v5643_v3, %s5024_s10  ;;  %8315 = vst [vmem:[#allocation44_spill] sm:$0xff] %v5655_v39  ;;  %v5661_v62 = vld [vmem:[#allocation2 + $0xc8] sm:$0xff] }
  0xd1   : > { %8317 = vst [vmem:[#allocation46_spill] sm:$0xff] %v5661_v62 }
  0xd2   : > { %v5647_v33 = vpop.permute.xlu1 %745  ;;  %v5651_v0 = vpop.permute.xlu0 %751 }
  0xd3   : > { %8312 = vst [vmem:[#allocation41_spill] sm:$0xff] %v5647_v33  ;;  %8314 = vst [vmem:[#allocation43_spill] sm:$0xff] %v5651_v0  ;;  %v5667_v33 = vld [vmem:[#allocation2 + $0xf0] sm:$0xff] }
  0xd4   : > { %989 = vrot.lane.b32.xlu1 %v5649_v58, %s5024_s10  ;;  %995 = vrot.lane.b32.xlu0 %v5655_v39, %s5024_s10  ;;  %8319 = vst [vmem:[#allocation48_spill] sm:$0xff] %v5667_v33  ;;  %v5673_v58 = vld [vmem:[#allocation2 + $0xe0] sm:$0xff] }
  0xd5   : > { %8321 = vst [vmem:[#allocation50_spill] sm:$0xff] %v5673_v58 }
  0xd6   : > { %v5659_v37 = vpop.permute.xlu1 %749  ;;  %v5663_v36 = vpop.permute.xlu0 %755 }
  0xd7   : > { %8316 = vst [vmem:[#allocation45_spill] sm:$0xff] %v5659_v37  ;;  %8318 = vst [vmem:[#allocation47_spill] sm:$0xff] %v5663_v36  ;;  %v5679_v37 = vld [vmem:[#allocation2 + $0x108] sm:$0xff] }
  0xd8   : > { %993 = vrot.lane.b32.xlu1 %v5661_v62, %s5024_s10  ;;  %999 = vrot.lane.b32.xlu0 %v5667_v33, %s5024_s10  ;;  %8323 = vst [vmem:[#allocation52_spill] sm:$0xff] %v5679_v37  ;;  %v5685_v62 = vld [vmem:[#allocation2 + $0xf8] sm:$0xff] }
  0xd9   : > { %8325 = vst [vmem:[#allocation54_spill] sm:$0xff] %v5685_v62 }
  0xda   : > { %v5671_v0 = vpop.permute.xlu1 %753  ;;  %v5675_v3 = vpop.permute.xlu0 %759 }
  0xdb   : > { %8320 = vst [vmem:[#allocation49_spill] sm:$0xff] %v5671_v0  ;;  %8322 = vst [vmem:[#allocation51_spill] sm:$0xff] %v5675_v3  ;;  %v5691_v0 = vld [vmem:[#allocation2 + $0x120] sm:$0xff] }
  0xdc   : > { %997 = vrot.lane.b32.xlu1 %v5673_v58, %s5024_s10  ;;  %1003 = vrot.lane.b32.xlu0 %v5679_v37, %s5024_s10  ;;  %8327 = vst [vmem:[#allocation56_spill] sm:$0xff] %v5691_v0  ;;  %v5697_v58 = vld [vmem:[#allocation2 + $0x110] sm:$0xff] }
  0xdd   : > { %8329 = vst [vmem:[#allocation58_spill] sm:$0xff] %v5697_v58 }
  0xde   : > { %v5683_v36 = vpop.permute.xlu1 %757  ;;  %v5687_v39 = vpop.permute.xlu0 %763 }
  0xdf   : > { %8324 = vst [vmem:[#allocation53_spill] sm:$0xff] %v5683_v36  ;;  %8326 = vst [vmem:[#allocation55_spill] sm:$0xff] %v5687_v39  ;;  %v5703_v36 = vld [vmem:[#allocation2 + $0x138] sm:$0xff] }
  0xe0   : > { %1001 = vrot.lane.b32.xlu1 %v5685_v62, %s5024_s10  ;;  %1007 = vrot.lane.b32.xlu0 %v5691_v0, %s5024_s10  ;;  %8331 = vst [vmem:[#allocation60_spill] sm:$0xff] %v5703_v36  ;;  %v5709_v62 = vld [vmem:[#allocation2 + $0x128] sm:$0xff] }
  0xe1   : > { %8333 = vst [vmem:[#allocation62_spill] sm:$0xff] %v5709_v62 }
  0xe2   : > { %v5695_v3 = vpop.permute.xlu1 %761  ;;  %v5699_v33 = vpop.permute.xlu0 %767 }
  0xe3   : > { %8328 = vst [vmem:[#allocation57_spill] sm:$0xff] %v5695_v3  ;;  %8330 = vst [vmem:[#allocation59_spill] sm:$0xff] %v5699_v33  ;;  %v5715_v3 = vld [vmem:[#allocation2 + $0x150] sm:$0xff] }
  0xe4   : > { %1005 = vrot.lane.b32.xlu1 %v5697_v58, %s5024_s10  ;;  %1011 = vrot.lane.b32.xlu0 %v5703_v36, %s5024_s10  ;;  %8335 = vst [vmem:[#allocation64_spill] sm:$0xff] %v5715_v3  ;;  %v5721_v58 = vld [vmem:[#allocation2 + $0x140] sm:$0xff] }
  0xe5   : > { %8337 = vst [vmem:[#allocation66_spill] sm:$0xff] %v5721_v58  ;;  %v5735_v36 = vld [vmem:[#allocation2 + $0x180] sm:$0xff] }
  0xe6   : > { %v5707_v39 = vpop.permute.xlu1 %765  ;;  %v5711_v37 = vpop.permute.xlu0 %835 }
  0xe7   : > { %8332 = vst [vmem:[#allocation61_spill] sm:$0xff] %v5707_v39  ;;  %8334 = vst [vmem:[#allocation63_spill] sm:$0xff] %v5711_v37  ;;  %v5727_v39 = vld [vmem:[#allocation2 + $0x168] sm:$0xff] }
  0xe8   : > { %1009 = vrot.lane.b32.xlu1 %v5709_v62, %s5024_s10  ;;  %1015 = vrot.lane.b32.xlu0 %v5715_v3, %s5024_s10  ;;  %v5733_v62 = vld [vmem:[#allocation2 + $0x158] sm:$0xff] }
  0xe9   : > { %8340 = vst [vmem:[#allocation69_spill] sm:$0xff] %v5733_v62 }
  0xea   : > { %v5719_v33 = vpop.permute.xlu1 %769  ;;  %v5723_v0 = vpop.permute.xlu0 %839 }
  0xeb   : > { %8336 = vst [vmem:[#allocation65_spill] sm:$0xff] %v5719_v33  ;;  %8338 = vst [vmem:[#allocation67_spill] sm:$0xff] %v5723_v0  ;;  %v5745_v0 = vld [vmem:[#allocation2 + $0x170] sm:$0xff] }
  0xec   : > { %1013 = vrot.lane.b32.xlu1 %v5721_v58, %s5024_s10  ;;  %1019 = vrot.lane.b32.xlu0 %v5727_v39, %s5024_s10 }
  0xee   : > { %v5731_v37 = vpop.permute.xlu1 %837  ;;  %v5737_v3 = vpop.permute.xlu0 %843 }
  0xef   : > { %8339 = vst [vmem:[#allocation68_spill] sm:$0xff] %v5731_v37  ;;  %8341 = vst [vmem:[#allocation70_spill] sm:$0xff] %v5737_v3  ;;  %v5751_v37 = vld [vmem:[#allocation2 + $0x188] sm:$0xff] }
  0xf0   : > { %1017 = vrot.lane.b32.xlu1 %v5733_v62, %s5024_s10  ;;  %1023 = vrot.lane.b32.xlu0 %v5735_v36, %s5024_s10 }
  0xf2   : > { %v5743_v33 = vpop.permute.xlu1 %841  ;;  %v5747_v58 = vpop.permute.xlu0 %847 }
  0xf3   : > { %8342 = vst [vmem:[#allocation71_spill] sm:$0xff] %v5743_v33  ;;  %8343 = vst [vmem:[#allocation72_spill] sm:$0xff] %v5747_v58 }
  0xf4   : > { %1021 = vrot.lane.b32.xlu1 %v5745_v0, %s5024_s10  ;;  %1091 = vrot.lane.b32.xlu0 %v5289_v25, %s5025_s11 }
  0xf6   : > { %v5755_v3 = vpop.permute.xlu1 %845  ;;  %v5757_v62 = vpop.permute.xlu0 %851 }
  0xf7   : > { %8344 = vst [vmem:[#allocation73_spill] sm:$0xff] %v5755_v3  ;;  %8345 = vst [vmem:[#allocation74_spill] sm:$0xff] %v5757_v62 }
  0xf8   : > { %1025 = vrot.lane.b32.xlu1 %v5751_v37, %s5024_s10  ;;  %1095 = vrot.lane.b32.xlu0 %v5291_v26, %s5025_s11 }
  0xfa   : > { %v5763_v58 = vpop.permute.xlu1 %849  ;;  %v5765_v33 = vpop.permute.xlu0 %855 }
  0xfc   : > { %1093 = vrot.lane.b32.xlu1 %v5298_v27, %s5025_s11  ;;  %1099 = vrot.lane.b32.xlu0 %v5306_v30, %s5025_s11 }
  0xfe   : > { %v5771_v25 = vpop.permute.xlu1 %853  ;;  %v5773_v3 = vpop.permute.xlu0 %859 }
  0xff   : > { %8346 = vst [vmem:[#allocation75_spill] sm:$0xff] %v5773_v3 }
 0x100   : > { %1097 = vrot.lane.b32.xlu1 %v5310_v31, %s5025_s11  ;;  %1103 = vrot.lane.b32.xlu0 %v5314_v32, %s5025_s11 }
 0x102   : > { %v5779_v26 = vpop.permute.xlu1 %857  ;;  %v5781_v62 = vpop.permute.xlu0 %863 }
 0x103   : > { %8347 = vst [vmem:[#allocation76_spill] sm:$0xff] %v5779_v26  ;;  %8348 = vst [vmem:[#allocation77_spill] sm:$0xff] %v5781_v62  ;;  %v8486_v26 = vld [vmem:[#allocation63_spill] sm:$0xff] }
 0x104   : > { %1101 = vrot.lane.b32.xlu1 %v5326_v38, %s5025_s11  ;;  %1107 = vrot.lane.b32.xlu0 %v5334_v40, %s5025_s11 }
 0x106   : > { %v5787_v27 = vpop.permute.xlu1 %861  ;;  %v5789_v30 = vpop.permute.xlu0 %867 }
 0x107   : > { %8349 = vst [vmem:[#allocation78_spill] sm:$0xff] %v5787_v27  ;;  %8350 = vst [vmem:[#allocation79_spill] sm:$0xff] %v5789_v30  ;;  %v647_v30 = vld [vmem:[#allocation2 + $0x62] sm:$0xff] }
 0x108   : > { %1105 = vrot.lane.b32.xlu1 %v5338_v41, %s5025_s11  ;;  %1111 = vrot.lane.b32.xlu0 %v5342_v42, %s5025_s11 }
 0x10a   : > { %v5795_v31 = vpop.permute.xlu1 %865  ;;  %v5797_v32 = vpop.permute.xlu0 %871 }
 0x10b   : > { %8351 = vst [vmem:[#allocation80_spill] sm:$0xff] %v5795_v31  ;;  %8352 = vst [vmem:[#allocation81_spill] sm:$0xff] %v5797_v32  ;;  %v617_v31 = vld [vmem:[#allocation2 + $0x79] sm:$0xff] }
 0x10c   : > { %1109 = vrot.lane.b32.xlu1 %v5346_v43, %s5025_s11  ;;  %1115 = vrot.lane.b32.xlu0 %v5350_v44, %s5025_s11 }
 0x10e   : > { %v5803_v38 = vpop.permute.xlu1 %869  ;;  %v5805_v40 = vpop.permute.xlu0 %875 }
 0x10f   : > { %8353 = vst [vmem:[#allocation82_spill] sm:$0xff] %v5803_v38  ;;  %8354 = vst [vmem:[#allocation83_spill] sm:$0xff] %v5805_v40 }
 0x110   : > { %1113 = vrot.lane.b32.xlu1 %v5354_v45, %s5025_s11  ;;  %1119 = vrot.lane.b32.xlu0 %v5358_v46, %s5025_s11 }
 0x112   : > { %v5811_v41 = vpop.permute.xlu1 %873  ;;  %v5813_v42 = vpop.permute.xlu0 %879 }
 0x113   : > { %8355 = vst [vmem:[#allocation84_spill] sm:$0xff] %v5811_v41  ;;  %8356 = vst [vmem:[#allocation85_spill] sm:$0xff] %v5813_v42 }
 0x114   : > { %1117 = vrot.lane.b32.xlu1 %v5362_v47, %s5025_s11  ;;  %1123 = vrot.lane.b32.xlu0 %v5366_v48, %s5025_s11 }
 0x116   : > { %v5819_v43 = vpop.permute.xlu1 %877  ;;  %v5821_v44 = vpop.permute.xlu0 %883 }
 0x117   : > { %8357 = vst [vmem:[#allocation86_spill] sm:$0xff] %v5819_v43  ;;  %8358 = vst [vmem:[#allocation87_spill] sm:$0xff] %v5821_v44  ;;  %v8397_v44 = vld [vmem:[#allocation26_spill] sm:$0xff] }
 0x118   : > { %1121 = vrot.lane.b32.xlu1 %v5370_v49, %s5025_s11  ;;  %1127 = vrot.lane.b32.xlu0 %v5374_v50, %s5025_s11 }
 0x11a   : > { %v5827_v45 = vpop.permute.xlu1 %881  ;;  %v5829_v46 = vpop.permute.xlu0 %887 }
 0x11b   : > { %8359 = vst [vmem:[#allocation88_spill] sm:$0xff] %v5827_v45  ;;  %8360 = vst [vmem:[#allocation89_spill] sm:$0xff] %v5829_v46 }
 0x11c   : > { %1125 = vrot.lane.b32.xlu1 %v5378_v51, %s5025_s11  ;;  %1131 = vrot.lane.b32.xlu0 %v5382_v52, %s5025_s11 }
 0x11e   : > { %v5835_v47 = vpop.permute.xlu1 %885  ;;  %v5837_v48 = vpop.permute.xlu0 %891 }
 0x11f   : > { %8361 = vst [vmem:[#allocation90_spill] sm:$0xff] %v5835_v47  ;;  %8362 = vst [vmem:[#allocation91_spill] sm:$0xff] %v5837_v48  ;;  %v8395_v47 = vld [vmem:[#allocation24_spill] sm:$0xff] }
 0x120   : > { %1129 = vrot.lane.b32.xlu1 %v5386_v53, %s5025_s11  ;;  %1135 = vrot.lane.b32.xlu0 %v5390_v54, %s5025_s11 }
 0x122   : > { %v5843_v49 = vpop.permute.xlu1 %889  ;;  %v5845_v50 = vpop.permute.xlu0 %895 }
 0x123   : > { %8363 = vst [vmem:[#allocation92_spill] sm:$0xff] %v5843_v49  ;;  %8364 = vst [vmem:[#allocation93_spill] sm:$0xff] %v5845_v50 }
 0x124   : > { %1133 = vrot.lane.b32.xlu1 %v5394_v55, %s5025_s11  ;;  %1139 = vrot.lane.b32.xlu0 %v5398_v56, %s5025_s11  ;;  %v5869_v56 = vld [vmem:[#allocation2 + $0x181] sm:$0xff] }
 0x126   : > { %v5851_v51 = vpop.permute.xlu1 %893  ;;  %v5853_v52 = vpop.permute.xlu0 %963 }
 0x127   : > { %8365 = vst [vmem:[#allocation94_spill] sm:$0xff] %v5851_v51 }
 0x128   : > { %1137 = vrot.lane.b32.xlu1 %v5402_v57, %s5025_s11  ;;  %1143 = vrot.lane.b32.xlu0 %v5408_v59, %s5025_s11 }
 0x12a   : > { %v5859_v53 = vpop.permute.xlu1 %897  ;;  %v5861_v54 = vpop.permute.xlu0 %967 }
 0x12b   : > { %8366 = vst [vmem:[#allocation95_spill] sm:$0xff] %v5859_v53 }
 0x12c   : > { %1141 = vrot.lane.b32.xlu1 %v5412_v60, %s5025_s11  ;;  %1147 = vrot.lane.b32.xlu0 %v5416_v61, %s5025_s11  ;;  %v5883_v60 = vld [vmem:[#allocation2 + $0x189] sm:$0xff] }
 0x12e   : > { %v5867_v55 = vpop.permute.xlu1 %965  ;;  %v5871_v50 = vpop.permute.xlu0 %971 }
 0x130   : > { %1145 = vrot.lane.b32.xlu1 %v5422_v63, %s5025_s11  ;;  %1151 = vrot.lane.b32.xlu0 %v5869_v56, %s5025_s11 }
 0x132   : > { %v5877_v57 = vpop.permute.xlu1 %969  ;;  %v5879_v59 = vpop.permute.xlu0 %975 }
 0x134   : > { %1149 = vrot.lane.b32.xlu1 %v5428_v1, %s5025_s11  ;;  %1219 = vrot.lane.b32.xlu0 %v5431_v2, %s5026_s12 }
 0x136   : > { %v5887_v61 = vpop.permute.xlu1 %973  ;;  %v5889_v53 = vpop.permute.xlu0 %979 }
 0x138   : > { %1153 = vrot.lane.b32.xlu1 %v5883_v60, %s5025_s11  ;;  %1223 = vrot.lane.b32.xlu0 %v5437_v4, %s5026_s12 }
 0x13a   : > { %v5895_v63 = vpop.permute.xlu1 %977  ;;  %v5897_v51 = vpop.permute.xlu0 %983 }
 0x13c   : > { %1221 = vrot.lane.b32.xlu1 %v5440_v5, %s5026_s12  ;;  %1227 = vrot.lane.b32.xlu0 %v5444_v6, %s5026_s12 }
 0x13e   : > { %v5903_v1 = vpop.permute.xlu1 %981  ;;  %v5905_v2 = vpop.permute.xlu0 %987 }
 0x13f   : > { %8367 = vst [vmem:[#allocation96_spill] sm:$0xff] %v5905_v2 }
 0x140   : > { %1225 = vrot.lane.b32.xlu1 %v5448_v7, %s5026_s12  ;;  %1231 = vrot.lane.b32.xlu0 %v5452_v8, %s5026_s12 }
 0x142   : > { %v5911_v4 = vpop.permute.xlu1 %985  ;;  %v5913_v48 = vpop.permute.xlu0 %991 }
 0x143   : > { %8368 = vst [vmem:[#allocation97_spill] sm:$0xff] %v5911_v4  ;;  %8369 = vst [vmem:[#allocation98_spill] sm:$0xff] %v5913_v48  ;;  %v8484_v4 = vld [vmem:[#allocation7_spill] sm:$0xff] }
 0x144   : > { %1229 = vrot.lane.b32.xlu1 %v5456_v9, %s5026_s12  ;;  %1235 = vrot.lane.b32.xlu0 %v5460_v10, %s5026_s12 }
 0x146   : > { %v5919_v5 = vpop.permute.xlu1 %989  ;;  %v5921_v6 = vpop.permute.xlu0 %995 }
 0x147   : > { %8370 = vst [vmem:[#allocation99_spill] sm:$0xff] %v5919_v5  ;;  %8371 = vst [vmem:[#allocation100_spill] sm:$0xff] %v5921_v6  ;;  %v615_v6 = vld [vmem:[#allocation2 + $0x61] sm:$0xff]  ;;  %v629_v5 = vld [vmem:[#allocation2 + $0x109] sm:$0xff] }
 0x148   : > { %1233 = vrot.lane.b32.xlu1 %v5464_v11, %s5026_s12  ;;  %1239 = vrot.lane.b32.xlu0 %v5468_v12, %s5026_s12 }
 0x14a   : > { %v5927_v7 = vpop.permute.xlu1 %993  ;;  %v5929_v8 = vpop.permute.xlu0 %999 }
 0x14b   : > { %8372 = vst [vmem:[#allocation101_spill] sm:$0xff] %v5927_v7  ;;  %8373 = vst [vmem:[#allocation102_spill] sm:$0xff] %v5929_v8 }
 0x14c   : > { %1237 = vrot.lane.b32.xlu1 %v5472_v13, %s5026_s12  ;;  %1243 = vrot.lane.b32.xlu0 %v5476_v14, %s5026_s12 }
 0x14e   : > { %v5935_v9 = vpop.permute.xlu1 %997  ;;  %v5937_v10 = vpop.permute.xlu0 %1003 }
 0x14f   : > { %8374 = vst [vmem:[#allocation103_spill] sm:$0xff] %v5935_v9  ;;  %8375 = vst [vmem:[#allocation104_spill] sm:$0xff] %v5937_v10  ;;  %v8409_v10 = vld [vmem:[#allocation38_spill] sm:$0xff]  ;;  %v644_v9 = vld [vmem:[#allocation2 + $0x3a] sm:$0xff] }
 0x150   : > { %1241 = vrot.lane.b32.xlu1 %v5480_v15, %s5026_s12  ;;  %1247 = vrot.lane.b32.xlu0 %v5484_v16, %s5026_s12 }
 0x152   : > { %v5943_v11 = vpop.permute.xlu1 %1001  ;;  %v5945_v12 = vpop.permute.xlu0 %1007 }
 0x153   : > { %8376 = vst [vmem:[#allocation105_spill] sm:$0xff] %v5943_v11  ;;  %8377 = vst [vmem:[#allocation106_spill] sm:$0xff] %v5945_v12  ;;  %v8401_v12 = vld [vmem:[#allocation30_spill] sm:$0xff] }
 0x154   : > { %1245 = vrot.lane.b32.xlu1 %v5488_v17, %s5026_s12  ;;  %1251 = vrot.lane.b32.xlu0 %v5492_v18, %s5026_s12  ;;  %v8413_v11 = vld [vmem:[#allocation42_spill] sm:$0xff] }
 0x156   : > { %v5951_v13 = vpop.permute.xlu1 %1005  ;;  %v5953_v14 = vpop.permute.xlu0 %1011 }
 0x157   : > { %8378 = vst [vmem:[#allocation107_spill] sm:$0xff] %v5951_v13  ;;  %8379 = vst [vmem:[#allocation108_spill] sm:$0xff] %v5953_v14  ;;  %v8405_v13 = vld [vmem:[#allocation34_spill] sm:$0xff] }
 0x158   : > { %1249 = vrot.lane.b32.xlu1 %v5496_v19, %s5026_s12  ;;  %1255 = vrot.lane.b32.xlu0 %v5500_v20, %s5026_s12 }
 0x15a   : > { %v5959_v15 = vpop.permute.xlu1 %1009  ;;  %v5961_v16 = vpop.permute.xlu0 %1015 }
 0x15b   : > { %8380 = vst [vmem:[#allocation109_spill] sm:$0xff] %v5959_v15  ;;  %8381 = vst [vmem:[#allocation110_spill] sm:$0xff] %v5961_v16  ;;  %v8398_v15 = vld [vmem:[#allocation28_spill] sm:$0xff] }
 0x15c   : > { %1253 = vrot.lane.b32.xlu1 %v5504_v21, %s5026_s12  ;;  %1259 = vrot.lane.b32.xlu0 %v5508_v22, %s5026_s12 }
 0x15e   : > { %v5967_v17 = vpop.permute.xlu1 %1013  ;;  %v5969_v18 = vpop.permute.xlu0 %1019 }
 0x15f   : > { %8382 = vst [vmem:[#allocation111_spill] sm:$0xff] %v5967_v17  ;;  %8383 = vst [vmem:[#allocation112_spill] sm:$0xff] %v5969_v18 }
 0x160   : > { %1257 = vrot.lane.b32.xlu1 %v5512_v23, %s5026_s12  ;;  %1263 = vrot.lane.b32.xlu0 %v5516_v24, %s5026_s12 }
 0x162   : > { %v5975_v19 = vpop.permute.xlu1 %1017  ;;  %v5977_v20 = vpop.permute.xlu0 %1023 }
 0x163   : > { %8384 = vst [vmem:[#allocation113_spill] sm:$0xff] %v5975_v19  ;;  %8385 = vst [vmem:[#allocation114_spill] sm:$0xff] %v5977_v20  ;;  %v8388_v20 = vld [vmem:[#allocation6_spill] sm:$0xff]  ;;  %v8392_v19 = vld [vmem:[#allocation17_spill] sm:$0xff] }
 0x164   : > { %1261 = vrot.lane.b32.xlu1 %v5520_v28, %s5026_s12  ;;  %1267 = vrot.lane.b32.xlu0 %v5524_v29, %s5026_s12  ;;  %v8389_v28 = vld [vmem:[#allocation8_spill] sm:$0xff] }
 0x166   : > { %v5983_v21 = vpop.permute.xlu1 %1021  ;;  %v5985_v22 = vpop.permute.xlu0 %1091 }
 0x167   : > { %8386 = vst [vmem:[#allocation115_spill] sm:$0xff] %v5983_v21  ;;  %v6001_v21 = vld [vmem:[#allocation2 + $0x182] sm:$0xff] }
 0x168   : > { %1265 = vrot.lane.b32.xlu1 %v5530_v34, %s5026_s12  ;;  %1271 = vrot.lane.b32.xlu0 %v5534_v35, %s5026_s12  ;;  %v8390_v34 = vld [vmem:[#allocation10_spill] sm:$0xff] }
 0x16a   : > { %v5991_v23 = vpop.permute.xlu1 %1025  ;;  %v5993_v24 = vpop.permute.xlu0 %1095 }
 0x16b   : > { %8387 = vst [vmem:[#allocation116_spill] sm:$0xff] %v5991_v23 }
 0x16c   : > { %1269 = vrot.lane.b32.xlu1 %v8388_v20, %s5026_s12  ;;  %1275 = vrot.lane.b32.xlu0 %v8389_v28, %s5026_s12  ;;  %v8391_v20 = vld [vmem:[#allocation14_spill] sm:$0xff] }
 0x16d   : > { %v6015_v28 = vld [vmem:[#allocation2 + $0x18a] sm:$0xff] }
 0x16e   : > { %v5999_v29 = vpop.permute.xlu1 %1093  ;;  %v6003_v18 = vpop.permute.xlu0 %1099 }
 0x170   : > { %1273 = vrot.lane.b32.xlu1 %v8390_v34, %s5026_s12  ;;  %1279 = vrot.lane.b32.xlu0 %v6001_v21, %s5026_s12  ;;  %v8393_v34 = vld [vmem:[#allocation20_spill] sm:$0xff] }
 0x172   : > { %v6009_v35 = vpop.permute.xlu1 %1097  ;;  %v6011_v23 = vpop.permute.xlu0 %1103 }
 0x174   : > { %1277 = vrot.lane.b32.xlu1 %v8391_v20, %s5026_s12  ;;  %1347 = vrot.lane.b32.xlu0 %v8392_v19, %s5027_s13  ;;  %v8394_v20 = vld [vmem:[#allocation22_spill] sm:$0xff] }
 0x176   : > { %v6019_v49 = vpop.permute.xlu1 %1101  ;;  %v6021_v16 = vpop.permute.xlu0 %1107 }
 0x178   : > { %1281 = vrot.lane.b32.xlu1 %v6015_v28, %s5026_s12  ;;  %1351 = vrot.lane.b32.xlu0 %v8393_v34, %s5027_s13 }
 0x17a   : > { %v6027_v46 = vpop.permute.xlu1 %1105  ;;  %v6029_v17 = vpop.permute.xlu0 %1111 }
 0x17c   : > { %1349 = vrot.lane.b32.xlu1 %v8394_v20, %s5027_s13  ;;  %1355 = vrot.lane.b32.xlu0 %v8395_v47, %s5027_s13  ;;  %v8402_v20 = vld [vmem:[#allocation32_spill] sm:$0xff] }
 0x17e   : > { %v6035_v19 = vpop.permute.xlu1 %1109  ;;  %v6037_v14 = vpop.permute.xlu0 %1115 }
 0x17f   : > { %8396 = vst [vmem:[#allocation6_spill] sm:$0xff] %v6037_v14 }
 0x180   : > { %1353 = vrot.lane.b32.xlu1 %v8397_v44, %s5027_s13  ;;  %1359 = vrot.lane.b32.xlu0 %v8398_v15, %s5027_s13  ;;  %v8406_v44 = vld [vmem:[#allocation36_spill] sm:$0xff] }
 0x182   : > { %v6043_v34 = vpop.permute.xlu1 %1113  ;;  %v6045_v45 = vpop.permute.xlu0 %1119 }
 0x183   : > { %8399 = vst [vmem:[#allocation8_spill] sm:$0xff] %v6043_v34  ;;  %8400 = vst [vmem:[#allocation10_spill] sm:$0xff] %v6045_v45  ;;  %v663_v34 = vld [vmem:[#allocation2 + $0x122] sm:$0xff] }
 0x184   : > { %1357 = vrot.lane.b32.xlu1 %v8401_v12, %s5027_s13  ;;  %1363 = vrot.lane.b32.xlu0 %v8402_v20, %s5027_s13  ;;  %v8410_v12 = vld [vmem:[#allocation40_spill] sm:$0xff] }
 0x186   : > { %v6051_v47 = vpop.permute.xlu1 %1117  ;;  %v6053_v42 = vpop.permute.xlu0 %1123 }
 0x187   : > { %8403 = vst [vmem:[#allocation14_spill] sm:$0xff] %v6051_v47  ;;  %8404 = vst [vmem:[#allocation17_spill] sm:$0xff] %v6053_v42  ;;  %v659_v47 = vld [vmem:[#allocation2 + $0xf2] sm:$0xff] }
 0x188   : > { %1361 = vrot.lane.b32.xlu1 %v8405_v13, %s5027_s13  ;;  %1367 = vrot.lane.b32.xlu0 %v8406_v44, %s5027_s13  ;;  %v8414_v13 = vld [vmem:[#allocation44_spill] sm:$0xff] }
 0x18a   : > { %v6059_v15 = vpop.permute.xlu1 %1121  ;;  %v6061_v43 = vpop.permute.xlu0 %1127 }
 0x18b   : > { %8407 = vst [vmem:[#allocation20_spill] sm:$0xff] %v6059_v15  ;;  %8408 = vst [vmem:[#allocation22_spill] sm:$0xff] %v6061_v43  ;;  %v8417_v43 = vld [vmem:[#allocation46_spill] sm:$0xff] }
 0x18c   : > { %1365 = vrot.lane.b32.xlu1 %v8409_v10, %s5027_s13  ;;  %1371 = vrot.lane.b32.xlu0 %v8410_v12, %s5027_s13  ;;  %v8418_v10 = vld [vmem:[#allocation48_spill] sm:$0xff] }
 0x18e   : > { %v6067_v20 = vpop.permute.xlu1 %1125  ;;  %v6069_v40 = vpop.permute.xlu0 %1131 }
 0x18f   : > { %8411 = vst [vmem:[#allocation24_spill] sm:$0xff] %v6067_v20  ;;  %8412 = vst [vmem:[#allocation26_spill] sm:$0xff] %v6069_v40  ;;  %v8421_v40 = vld [vmem:[#allocation50_spill] sm:$0xff]  ;;  %v612_v20 = vld [vmem:[#allocation2 + $0x39] sm:$0xff] }
 0x190   : > { %1369 = vrot.lane.b32.xlu1 %v8413_v11, %s5027_s13  ;;  %1375 = vrot.lane.b32.xlu0 %v8414_v13, %s5027_s13  ;;  %v8422_v11 = vld [vmem:[#allocation52_spill] sm:$0xff] }
 0x192   : > { %v6075_v44 = vpop.permute.xlu1 %1129  ;;  %v6077_v41 = vpop.permute.xlu0 %1135 }
 0x193   : > { %8415 = vst [vmem:[#allocation28_spill] sm:$0xff] %v6075_v44  ;;  %8416 = vst [vmem:[#allocation30_spill] sm:$0xff] %v6077_v41  ;;  %v8425_v41 = vld [vmem:[#allocation54_spill] sm:$0xff] }
 0x194   : > { %1373 = vrot.lane.b32.xlu1 %v8417_v43, %s5027_s13  ;;  %1379 = vrot.lane.b32.xlu0 %v8418_v10, %s5027_s13  ;;  %v8426_v43 = vld [vmem:[#allocation56_spill] sm:$0xff] }
 0x196   : > { %v6083_v12 = vpop.permute.xlu1 %1133  ;;  %v6085_v8 = vpop.permute.xlu0 %1139 }
 0x197   : > { %8419 = vst [vmem:[#allocation32_spill] sm:$0xff] %v6083_v12  ;;  %8420 = vst [vmem:[#allocation34_spill] sm:$0xff] %v6085_v8  ;;  %v8429_v8 = vld [vmem:[#allocation58_spill] sm:$0xff] }
 0x198   : > { %1377 = vrot.lane.b32.xlu1 %v8421_v40, %s5027_s13  ;;  %1383 = vrot.lane.b32.xlu0 %v8422_v11, %s5027_s13  ;;  %v1962_v40 = vld [vmem:[%s8229_s1] sm:$0xff]  ;;  %v1963_v11 = vld [vmem:[%s8229_s1 + $0x8] sm:$0xff] }
 0x19a   : > { %v6091_v13 = vpop.permute.xlu1 %1137  ;;  %v6093_v44 = vpop.permute.xlu0 %1143 }
 0x19b   : > { %8423 = vst [vmem:[#allocation36_spill] sm:$0xff] %v6091_v13  ;;  %8424 = vst [vmem:[#allocation38_spill] sm:$0xff] %v6093_v44  ;;  %v4930_v44 = vpack.c.bf16 %v1963_v11, %v1962_v40  ;;  %v1965_v40 = vld [vmem:[%s8229_s1 + $0x18] sm:$0xff] }
 0x19c   : > { %1381 = vrot.lane.b32.xlu1 %v8425_v41, %s5027_s13  ;;  %1387 = vrot.lane.b32.xlu0 %v8426_v43, %s5027_s13  ;;  %v8430_v41 = vld [vmem:[#allocation60_spill] sm:$0xff] }
 0x19d   : > { %4931 = vmatprep.subr.bf16.mxu0 %v4930_v44 }
 0x19e   : > { %v6099_v10 = vpop.permute.xlu1 %1141  ;;  %v6101_v12 = vpop.permute.xlu0 %1147  ;;  %4933 = vmatpush3.bf16.msra.mxu0 %v4930_v44  ;;  %v1966_v44 = vld [vmem:[%s8229_s1 + $0x20] sm:$0xff] }
 0x19f   : > { %8427 = vst [vmem:[#allocation40_spill] sm:$0xff] %v6099_v10  ;;  %8428 = vst [vmem:[#allocation42_spill] sm:$0xff] %v6101_v12  ;;  %v8433_v12 = vld [vmem:[#allocation62_spill] sm:$0xff] }
 0x1a0   : > { %1385 = vrot.lane.b32.xlu1 %v8429_v8, %s5027_s13  ;;  %1391 = vrot.lane.b32.xlu0 %v8430_v41, %s5027_s13  ;;  %v1964_v8 = vld [vmem:[%s8229_s1 + $0x10] sm:$0xff]  ;;  %v8434_v41 = vld [vmem:[#allocation64_spill] sm:$0xff] }
 0x1a1   : > { %v4934_v11 = vpack.c.bf16 %v1965_v40, %v1964_v8  ;;  %v1967_v8 = vld [vmem:[%s8229_s1 + $0x28] sm:$0xff] }
 0x1a2   : > { %v6113_v43 = vpop.permute.xlu1 %1145  ;;  %v6115_v10 = vpop.permute.xlu0 %1151  ;;  %v4938_v40 = vpack.c.bf16 %v1967_v8, %v1966_v44  ;;  %v1969_v44 = vld [vmem:[%s8229_s1 + $0x38] sm:$0xff] }
 0x1a3   : > { %8431 = vst [vmem:[#allocation44_spill] sm:$0xff] %v6113_v43  ;;  %8432 = vst [vmem:[#allocation46_spill] sm:$0xff] %v6115_v10  ;;  %4935 = vmatprep.subr.bf16.mxu0 %v4934_v11 }
 0x1a4   : > { %1389 = vrot.lane.b32.xlu1 %v8433_v12, %s5027_s13  ;;  %1395 = vrot.lane.b32.xlu0 %v8434_v41, %s5027_s13  ;;  %v8436_v12 = vld [vmem:[#allocation66_spill] sm:$0xff] }
 0x1a5   : > { %4937 = vmatpush3.bf16.msra.mxu0 %v4934_v11  ;;  %v1968_v11 = vld [vmem:[%s8229_s1 + $0x30] sm:$0xff] }
 0x1a6   : > { %v6127_v43 = vpop.permute.xlu1 %1149  ;;  %v6129_v10 = vpop.permute.xlu0 %1219  ;;  %4939 = vmatprep.subr.bf16.mxu0 %v4938_v40  ;;  %v4942_v8 = vpack.c.bf16 %v1969_v44, %v1968_v11  ;;  %v611_v11 = vld [vmem:[#allocation2 + $0x31] sm:$0xff]  ;;  %v610_v44 = vld [vmem:[#allocation2 + $0x1a0] sm:$0xff] }
 0x1a7   : > { %8435 = vst [vmem:[#allocation48_spill] sm:$0xff] %v6127_v43 }
 0x1a8   : > { %1393 = vrot.lane.b32.xlu1 %v8436_v12, %s5027_s13  ;;  %1399 = vrot.lane.b32.xlu0 %v5727_v39, %s5027_s13  ;;  %v8438_v12 = vld [vmem:[#allocation69_spill] sm:$0xff] }
 0x1a9   : > { %4941 = vmatpush3.bf16.msra.mxu0 %v4938_v40 }
 0x1aa   : > { %v6141_v41 = vpop.permute.xlu1 %1153  ;;  %v6143_v43 = vpop.permute.xlu0 %1223  ;;  %4943 = vmatprep.subr.bf16.mxu0 %v4942_v8 }
 0x1ab   : > { %8437 = vst [vmem:[#allocation50_spill] sm:$0xff] %v6141_v41  ;;  %v609_v41 = vld [vmem:[#allocation2 + $0x198] sm:$0xff] }
 0x1ac   : > { %1397 = vrot.lane.b32.xlu1 %v8438_v12, %s5027_s13  ;;  %1403 = vrot.lane.b32.xlu0 %v5735_v36, %s5027_s13  ;;  %v1970_v12 = vld [vmem:[%s8229_s1 + $0x40] sm:$0xff] }
 0x1ad   : > { %4945 = vmatpush3.bf16.msra.mxu0 %v4942_v8 }
 0x1ae   : > { %v6155_v39 = vpop.permute.xlu1 %1221  ;;  %v6157_v13 = vpop.permute.xlu0 %1227  ;;  %4814 = vmatprep.subr.mxu0 %v1970_v12 }
 0x1b0   : > { %1401 = vrot.lane.b32.xlu1 %v5745_v0, %s5027_s13  ;;  %1407 = vrot.lane.b32.xlu0 %v609_v41, %s5027_s13  ;;  %v613_v41 = vld [vmem:[#allocation2 + $0x49] sm:$0xff] }
 0x1b1   : > { %4815 = vmatpush3.msra.mxu0 %v1970_v12 }
 0x1b2   : > { %v6162_v40 = vpop.permute.xlu1 %1225  ;;  %v6167_v36 = vpop.permute.xlu0 %1231 }
 0x1b4   : > { %1405 = vrot.lane.b32.xlu1 %v5751_v37, %s5027_s13  ;;  %1475 = vrot.lane.b32.xlu0 %v611_v11, %s5028_s19  ;;  %v643_v37 = vld [vmem:[#allocation2 + $0x32] sm:$0xff]  ;;  %v645_v11 = vld [vmem:[#allocation2 + $0x4a] sm:$0xff] }
 0x1b6   : > { %v6172_v0 = vpop.permute.xlu1 %1229  ;;  %v6174_v8 = vpop.permute.xlu0 %1235 }
 0x1b8   : > { %1409 = vrot.lane.b32.xlu1 %v610_v44, %s5027_s13  ;;  %1479 = vrot.lane.b32.xlu0 %v613_v41, %s5028_s19  ;;  %v614_v44 = vld [vmem:[#allocation2 + $0x51] sm:$0xff] }
 0x1ba   : > { %v6178_v32 = vpop.permute.xlu1 %1233  ;;  %v6180_v38 = vpop.permute.xlu0 %1239 }
 0x1bc   : > { %1477 = vrot.lane.b32.xlu1 %v612_v20, %s5028_s19  ;;  %1605 = vrot.lane.b32.xlu0 %v644_v9, %s5029_s20  ;;  %v646_v20 = vld [vmem:[#allocation2 + $0x52] sm:$0xff] }
 0x1be   : > { %v6184_v12 = vpop.permute.xlu1 %1237  ;;  %v6186_v42 = vpop.permute.xlu0 %1243 }
 0x1bf   : > { %8439 = vst [vmem:[#allocation52_spill] sm:$0xff] %v6186_v42  ;;  %v661_v42 = vld [vmem:[#allocation2 + $0x10a] sm:$0xff] }
 0x1c0   : > { %1603 = vrot.lane.b32.xlu1 %v643_v37, %s5029_s20  ;;  %1607 = vrot.lane.b32.xlu0 %v645_v11, %s5029_s20  ;;  %v616_v37 = vld [vmem:[#allocation2 + $0x69] sm:$0xff] }
 0x1c2   : > { %v6190_v41 = vpop.permute.xlu1 %1241  ;;  %v6192_v15 = vpop.permute.xlu0 %1247 }
 0x1c3   : > { %8440 = vst [vmem:[#allocation54_spill] sm:$0xff] %v6190_v41  ;;  %8441 = vst [vmem:[#allocation56_spill] sm:$0xff] %v6192_v15  ;;  %v649_v15 = vld [vmem:[#allocation2 + $0x7a] sm:$0xff] }
 0x1c4   : > { %1481 = vrot.lane.b32.xlu1 %v614_v44, %s5028_s19  ;;  %1483 = vrot.lane.b32.xlu0 %v615_v6, %s5028_s19  ;;  %v648_v44 = vld [vmem:[#allocation2 + $0x6a] sm:$0xff]  ;;  %v631_v41 = vld [vmem:[#allocation2 + $0x121] sm:$0xff] }
 0x1c6   : > { %v6196_v9 = vpop.permute.xlu1 %1245  ;;  %v6198_v7 = vpop.permute.xlu0 %1251 }
 0x1c7   : > { %8442 = vst [vmem:[#allocation58_spill] sm:$0xff] %v6196_v9  ;;  %8443 = vst [vmem:[#allocation60_spill] sm:$0xff] %v6198_v7  ;;  %v619_v7 = vld [vmem:[#allocation2 + $0x91] sm:$0xff] }
 0x1c8   : > { %1609 = vrot.lane.b32.xlu1 %v646_v20, %s5029_s20  ;;  %1611 = vrot.lane.b32.xlu0 %v647_v30, %s5029_s20  ;;  %v618_v20 = vld [vmem:[#allocation2 + $0x81] sm:$0xff] }
 0x1ca   : > { %v6202_v11 = vpop.permute.xlu1 %1249  ;;  %v6204_v45 = vpop.permute.xlu0 %1255 }
 0x1cb   : > { %8444 = vst [vmem:[#allocation62_spill] sm:$0xff] %v6202_v11  ;;  %8445 = vst [vmem:[#allocation64_spill] sm:$0xff] %v6204_v45  ;;  %v651_v45 = vld [vmem:[#allocation2 + $0x92] sm:$0xff] }
 0x1cc   : > { %1485 = vrot.lane.b32.xlu1 %v616_v37, %s5028_s19  ;;  %1487 = vrot.lane.b32.xlu0 %v617_v31, %s5028_s19  ;;  %v650_v37 = vld [vmem:[#allocation2 + $0x82] sm:$0xff] }
 0x1ce   : > { %v6208_v6 = vpop.permute.xlu1 %1253  ;;  %v6210_v9 = vpop.permute.xlu0 %1259 }
 0x1cf   : > { %8446 = vst [vmem:[#allocation66_spill] sm:$0xff] %v6208_v6  ;;  %8447 = vst [vmem:[#allocation69_spill] sm:$0xff] %v6210_v9  ;;  %v621_v9 = vld [vmem:[#allocation2 + $0xa9] sm:$0xff] }
 0x1d0   : > { %1613 = vrot.lane.b32.xlu1 %v648_v44, %s5029_s20  ;;  %1615 = vrot.lane.b32.xlu0 %v649_v15, %s5029_s20  ;;  %v620_v44 = vld [vmem:[#allocation2 + $0x99] sm:$0xff] }
 0x1d2   : > { %v6214_v30 = vpop.permute.xlu1 %1257  ;;  %v6216_v11 = vpop.permute.xlu0 %1263 }
 0x1d3   : > { %8448 = vst [vmem:[#allocation117_spill] sm:$0xff] %v6214_v30  ;;  %8449 = vst [vmem:[#allocation118_spill] sm:$0xff] %v6216_v11  ;;  %v653_v11 = vld [vmem:[#allocation2 + $0xaa] sm:$0xff] }
 0x1d4   : > { %1489 = vrot.lane.b32.xlu1 %v618_v20, %s5028_s19  ;;  %1491 = vrot.lane.b32.xlu0 %v619_v7, %s5028_s19  ;;  %v652_v20 = vld [vmem:[#allocation2 + $0x9a] sm:$0xff] }
 0x1d6   : > { %v6220_v31 = vpop.permute.xlu1 %1261  ;;  %v6222_v6 = vpop.permute.xlu0 %1267 }
 0x1d7   : > { %8450 = vst [vmem:[#allocation119_spill] sm:$0xff] %v6220_v31  ;;  %8451 = vst [vmem:[#allocation120_spill] sm:$0xff] %v6222_v6  ;;  %v623_v6 = vld [vmem:[#allocation2 + $0xc1] sm:$0xff] }
 0x1d8   : > { %1617 = vrot.lane.b32.xlu1 %v650_v37, %s5029_s20  ;;  %1619 = vrot.lane.b32.xlu0 %v651_v45, %s5029_s20  ;;  %v622_v37 = vld [vmem:[#allocation2 + $0xb1] sm:$0xff] }
 0x1da   : > { %v6226_v15 = vpop.permute.xlu1 %1265  ;;  %v6228_v30 = vpop.permute.xlu0 %1271 }
 0x1db   : > { %8452 = vst [vmem:[#allocation121_spill] sm:$0xff] %v6226_v15  ;;  %8453 = vst [vmem:[#allocation122_spill] sm:$0xff] %v6228_v30  ;;  %v655_v30 = vld [vmem:[#allocation2 + $0xc2] sm:$0xff] }
 0x1dc   : > { %1493 = vrot.lane.b32.xlu1 %v620_v44, %s5028_s19  ;;  %1495 = vrot.lane.b32.xlu0 %v621_v9, %s5028_s19  ;;  %v654_v44 = vld [vmem:[#allocation2 + $0xb2] sm:$0xff] }
 0x1de   : > { %v6232_v7 = vpop.permute.xlu1 %1269  ;;  %v6234_v31 = vpop.permute.xlu0 %1275 }
 0x1df   : > { %8454 = vst [vmem:[#allocation123_spill] sm:$0xff] %v6232_v7  ;;  %8455 = vst [vmem:[#allocation124_spill] sm:$0xff] %v6234_v31  ;;  %v625_v31 = vld [vmem:[#allocation2 + $0xd9] sm:$0xff] }
 0x1e0   : > { %1621 = vrot.lane.b32.xlu1 %v652_v20, %s5029_s20  ;;  %1623 = vrot.lane.b32.xlu0 %v653_v11, %s5029_s20  ;;  %v624_v20 = vld [vmem:[#allocation2 + $0xc9] sm:$0xff] }
 0x1e2   : > { %v6238_v45 = vpop.permute.xlu1 %1273  ;;  %v6240_v15 = vpop.permute.xlu0 %1279 }
 0x1e3   : > { %8456 = vst [vmem:[#allocation125_spill] sm:$0xff] %v6238_v45  ;;  %8457 = vst [vmem:[#allocation126_spill] sm:$0xff] %v6240_v15  ;;  %v657_v15 = vld [vmem:[#allocation2 + $0xda] sm:$0xff] }
 0x1e4   : > { %1497 = vrot.lane.b32.xlu1 %v622_v37, %s5028_s19  ;;  %1499 = vrot.lane.b32.xlu0 %v623_v6, %s5028_s19  ;;  %v656_v37 = vld [vmem:[#allocation2 + $0xca] sm:$0xff] }
 0x1e6   : > { %v6244_v9 = vpop.permute.xlu1 %1277  ;;  %v6246_v7 = vpop.permute.xlu0 %1347 }
 0x1e7   : > { %8458 = vst [vmem:[#allocation127_spill] sm:$0xff] %v6244_v9 }
 0x1e8   : > { %1625 = vrot.lane.b32.xlu1 %v654_v44, %s5029_s20  ;;  %1627 = vrot.lane.b32.xlu0 %v655_v30, %s5029_s20  ;;  %v626_v44 = vld [vmem:[#allocation2 + $0xe1] sm:$0xff] }
 0x1ea   : > { %v6250_v11 = vpop.permute.xlu1 %1281  ;;  %v6252_v45 = vpop.permute.xlu0 %1351 }
 0x1eb   : > { %8459 = vst [vmem:[#allocation128_spill] sm:$0xff] %v6250_v11  ;;  %v627_v11 = vld [vmem:[#allocation2 + $0xf1] sm:$0xff] }
 0x1ec   : > { %1501 = vrot.lane.b32.xlu1 %v624_v20, %s5028_s19  ;;  %1503 = vrot.lane.b32.xlu0 %v625_v31, %s5028_s19  ;;  %v658_v20 = vld [vmem:[#allocation2 + $0xe2] sm:$0xff] }
 0x1ee   : > { %v6256_v6 = vpop.permute.xlu1 %1349  ;;  %v6258_v9 = vpop.permute.xlu0 %1355 }
 0x1f0   : > { %1629 = vrot.lane.b32.xlu1 %v656_v37, %s5029_s20  ;;  %1631 = vrot.lane.b32.xlu0 %v657_v15, %s5029_s20  ;;  %v628_v37 = vld [vmem:[#allocation2 + $0xf9] sm:$0xff] }
 0x1f2   : > { %v6262_v30 = vpop.permute.xlu1 %1353  ;;  %v6264_v48 = vpop.permute.xlu0 %1359 }
 0x1f4   : > { %1505 = vrot.lane.b32.xlu1 %v626_v44, %s5028_s19  ;;  %1507 = vrot.lane.b32.xlu0 %v627_v11, %s5028_s19  ;;  %v660_v44 = vld [vmem:[#allocation2 + $0xfa] sm:$0xff] }
 0x1f6   : > { %v6268_v31 = vpop.permute.xlu1 %1357  ;;  %v6270_v62 = vpop.permute.xlu0 %1363 }
 0x1f8   : > { %1633 = vrot.lane.b32.xlu1 %v658_v20, %s5029_s20  ;;  %1635 = vrot.lane.b32.xlu0 %v659_v47, %s5029_s20  ;;  %v630_v20 = vld [vmem:[#allocation2 + $0x111] sm:$0xff] }
 0x1fa   : > { %v6274_v15 = vpop.permute.xlu1 %1361  ;;  %v6276_v27 = vpop.permute.xlu0 %1367 }
 0x1fc   : > { %1509 = vrot.lane.b32.xlu1 %v628_v37, %s5028_s19  ;;  %1511 = vrot.lane.b32.xlu0 %v629_v5, %s5028_s19  ;;  %v662_v37 = vld [vmem:[#allocation2 + $0x112] sm:$0xff] }
 0x1fe   : > { %v6280_v11 = vpop.permute.xlu1 %1365  ;;  %v6282_v14 = vpop.permute.xlu0 %1371 }
 0x1ff   : > { %8460 = vst [vmem:[#allocation129_spill] sm:$0xff] %v6282_v14  ;;  %v633_v14 = vld [vmem:[#allocation2 + $0x139] sm:$0xff] }
 0x200   : > { %1637 = vrot.lane.b32.xlu1 %v660_v44, %s5029_s20  ;;  %1639 = vrot.lane.b32.xlu0 %v661_v42, %s5029_s20  ;;  %v632_v44 = vld [vmem:[#allocation2 + $0x129] sm:$0xff] }
 0x202   : > { %v6286_v47 = vpop.permute.xlu1 %1369  ;;  %v6288_v2 = vpop.permute.xlu0 %1375 }
 0x203   : > { %8461 = vst [vmem:[#allocation130_spill] sm:$0xff] %v6286_v47  ;;  %8462 = vst [vmem:[#allocation131_spill] sm:$0xff] %v6288_v2  ;;  %v665_v2 = vld [vmem:[#allocation2 + $0x13a] sm:$0xff] }
 0x204   : > { %1513 = vrot.lane.b32.xlu1 %v630_v20, %s5028_s19  ;;  %1515 = vrot.lane.b32.xlu0 %v631_v41, %s5028_s19  ;;  %v664_v20 = vld [vmem:[#allocation2 + $0x12a] sm:$0xff] }
 0x206   : > { %v6292_v5 = vpop.permute.xlu1 %1373  ;;  %v6294_v3 = vpop.permute.xlu0 %1379 }
 0x207   : > { %8463 = vst [vmem:[#allocation132_spill] sm:$0xff] %v6292_v5  ;;  %8464 = vst [vmem:[#allocation133_spill] sm:$0xff] %v6294_v3  ;;  %v635_v3 = vld [vmem:[#allocation2 + $0x151] sm:$0xff] }
 0x208   : > { %1641 = vrot.lane.b32.xlu1 %v662_v37, %s5029_s20  ;;  %1643 = vrot.lane.b32.xlu0 %v663_v34, %s5029_s20  ;;  %v634_v37 = vld [vmem:[#allocation2 + $0x141] sm:$0xff] }
 0x20a   : > { %v6298_v42 = vpop.permute.xlu1 %1377  ;;  %v6300_v47 = vpop.permute.xlu0 %1383 }
 0x20b   : > { %8465 = vst [vmem:[#allocation134_spill] sm:$0xff] %v6298_v42  ;;  %8466 = vst [vmem:[#allocation135_spill] sm:$0xff] %v6300_v47  ;;  %v667_v47 = vld [vmem:[#allocation2 + $0x152] sm:$0xff] }
 0x20c   : > { %1517 = vrot.lane.b32.xlu1 %v632_v44, %s5028_s19  ;;  %1519 = vrot.lane.b32.xlu0 %v633_v14, %s5028_s19  ;;  %v666_v44 = vld [vmem:[#allocation2 + $0x142] sm:$0xff] }
 0x20e   : > { %v6304_v41 = vpop.permute.xlu1 %1381  ;;  %v6306_v5 = vpop.permute.xlu0 %1387 }
 0x20f   : > { %8467 = vst [vmem:[#allocation136_spill] sm:$0xff] %v6304_v41  ;;  %8468 = vst [vmem:[#allocation137_spill] sm:$0xff] %v6306_v5  ;;  %v637_v5 = vld [vmem:[#allocation2 + $0x169] sm:$0xff] }
 0x210   : > { %1645 = vrot.lane.b32.xlu1 %v664_v20, %s5029_s20  ;;  %1647 = vrot.lane.b32.xlu0 %v665_v2, %s5029_s20  ;;  %v636_v20 = vld [vmem:[#allocation2 + $0x159] sm:$0xff] }
 0x212   : > { %v6310_v34 = vpop.permute.xlu1 %1385  ;;  %v6312_v42 = vpop.permute.xlu0 %1391 }
 0x213   : > { %8469 = vst [vmem:[#allocation138_spill] sm:$0xff] %v6310_v34  ;;  %8470 = vst [vmem:[#allocation139_spill] sm:$0xff] %v6312_v42  ;;  %v669_v42 = vld [vmem:[#allocation2 + $0x16a] sm:$0xff] }
 0x214   : > { %1521 = vrot.lane.b32.xlu1 %v634_v37, %s5028_s19  ;;  %1523 = vrot.lane.b32.xlu0 %v635_v3, %s5028_s19  ;;  %v668_v37 = vld [vmem:[#allocation2 + $0x15a] sm:$0xff] }
 0x216   : > { %v6316_v14 = vpop.permute.xlu1 %1389  ;;  %v6318_v41 = vpop.permute.xlu0 %1395 }
 0x217   : > { %8471 = vst [vmem:[#allocation140_spill] sm:$0xff] %v6316_v14  ;;  %8472 = vst [vmem:[#allocation141_spill] sm:$0xff] %v6318_v41 }
 0x218   : > { %1649 = vrot.lane.b32.xlu1 %v666_v44, %s5029_s20  ;;  %1651 = vrot.lane.b32.xlu0 %v667_v47, %s5029_s20  ;;  %v638_v44 = vld [vmem:[#allocation2 + $0x171] sm:$0xff] }
 0x21a   : > { %v6322_v2 = vpop.permute.xlu1 %1393  ;;  %v6324_v34 = vpop.permute.xlu0 %1399 }
 0x21b   : > { %8473 = vst [vmem:[#allocation142_spill] sm:$0xff] %v6322_v2  ;;  %8474 = vst [vmem:[#allocation143_spill] sm:$0xff] %v6324_v34  ;;  %v387_v34 = vld [vmem:[#allocation2 + $0x8] sm:$0xff] }
 0x21c   : > { %1525 = vrot.lane.b32.xlu1 %v636_v20, %s5028_s19  ;;  %1527 = vrot.lane.b32.xlu0 %v637_v5, %s5028_s19  ;;  %v670_v20 = vld [vmem:[#allocation2 + $0x172] sm:$0xff] }
 0x21e   : > { %v6328_v3 = vpop.permute.xlu1 %1397  ;;  %v6330_v14 = vpop.permute.xlu0 %1403 }
 0x21f   : > { %8475 = vst [vmem:[#allocation144_spill] sm:$0xff] %v6328_v3  ;;  %8476 = vst [vmem:[#allocation145_spill] sm:$0xff] %v6330_v14  ;;  %v641_v14 = vld [vmem:[#allocation2 + $0x199] sm:$0xff] }
 0x220   : > { %1653 = vrot.lane.b32.xlu1 %v668_v37, %s5029_s20  ;;  %1655 = vrot.lane.b32.xlu0 %v669_v42, %s5029_s20  ;;  %v386_v37 = vld [vmem:[#allocation2] sm:$0xff] }
 0x222   : > { %v6334_v47 = vpop.permute.xlu1 %1401  ;;  %v6336_v41 = vpop.permute.xlu0 %1407 }
 0x223   : > { %8477 = vst [vmem:[#allocation146_spill] sm:$0xff] %v6334_v47  ;;  %8478 = vst [vmem:[#allocation147_spill] sm:$0xff] %v6336_v41  ;;  %v8481_v41 = vld [vmem:[#allocation5_spill] sm:$0xff]  ;;  %v8482_v47 = vld [vmem:[#allocation4_spill] sm:$0xff] }
 0x224   : > { %1529 = vrot.lane.b32.xlu1 %v638_v44, %s5028_s19  ;;  %1531 = vrot.lane.b32.xlu0 %v5869_v56, %s5028_s19  ;;  %v1700_v44 = vsel %vm279_vm0, %v387_v34, %v8481_v41  ;;  %v1699_v56 = vsel %vm279_vm0, %v386_v37, %v8482_v47  ;;  %v8487_v47 = vld [vmem:[#allocation67_spill] sm:$0xff] }
 0x225   : > { %v1732_v41 = vsel %vm1731_vm3, %v1699_v56, %v8486_v26 }
 0x226   : > { %v6341_v5 = vpop.permute.xlu1 %1405  ;;  %v1476_v3 = vpop.permute.xlu0 %1475 }
 0x227   : > { %8479 = vst [vmem:[#allocation148_spill] sm:$0xff] %v6341_v5  ;;  %v8483_v5 = vld [vmem:[#allocation68_spill] sm:$0xff] }
 0x228   : > { %1657 = vrot.lane.b32.xlu1 %v670_v20, %s5029_s20  ;;  %1659 = vrot.lane.b32.xlu0 %v6001_v21, %s5029_s20  ;;  %v1733_v2 = vsel %vm1731_vm3, %v1700_v44, %v8483_v5  ;;  %v8485_v21 = vld [vmem:[#allocation13_spill] sm:$0xff]  ;;  %v1765_v5 = vsel %vm1764_vm4, %v1732_v41, %v5853_v52 }
 0x229   : > { %v1766_v34 = vsel %vm1764_vm4, %v1733_v2, %v5867_v55  ;;  %v1798_v55 = vsel %vm1797_vm5, %v1765_v5, %v5985_v22  ;;  %v674_v5 = vld [vmem:[#allocation2 + $0x1a2] sm:$0xff] }
 0x22a   : > { %v6346_v42 = vpop.permute.xlu1 %1409  ;;  %v1480_v20 = vpop.permute.xlu0 %1479 }
 0x22b   : > { %8480 = vst [vmem:[#allocation149_spill] sm:$0xff] %v6346_v42  ;;  %v1701_v42 = vsel %vm279_vm0, %v8485_v21, %v8484_v4  ;;  %v4979_v21 = vld [vmem:[#allocation2 + $0x20] sm:$0xff] }
 0x22c   : > { %1533 = vrot.lane.b32.xlu1 %v5883_v60, %s5028_s19  ;;  %v1734_v37 = vsel %vm1731_vm3, %v1701_v42, %v8487_v47  ;;  %v1799_v60 = vsel %vm1797_vm5, %v1766_v34, %v5999_v29  ;;  %1535 = vrot.lane.b32.xlu0 %v641_v14, %s5028_s19  ;;  %v673_v42 = vld [vmem:[#allocation2 + $0x19a] sm:$0xff]  ;;  %v1831_v29 = vsel %vm1830_vm6, %v1798_v55, %v6129_v10 }
 0x22d   : > { %v1767_v26 = vsel %vm1764_vm4, %v1734_v37, %v5861_v54  ;;  %v1832_v2 = vsel %vm1830_vm6, %v1799_v60, %v6155_v39  ;;  %v1864_v54 = vsel %vm1863_vm7, %v1831_v29, %v6246_v7  ;;  %v642_v39 = vld [vmem:[#allocation2 + $0x1a1] sm:$0xff]  ;;  %v8488_v7 = vld [vmem:[#allocation11_spill] sm:$0xff]  ;;  %v4980_v60 = vld [vmem:[#allocation2 + $0x30] sm:$0xff] }
 0x22e   : > { %v1478_v4 = vpop.permute.xlu1 %1477  ;;  %v1800_v52 = vsel %vm1797_vm5, %v1767_v26, %v5993_v24  ;;  %v1865_v14 = vsel %vm1863_vm7, %v1832_v2, %v6256_v6  ;;  %v1606_v44 = vpop.permute.xlu0 %1605  ;;  %v1897_v10 = vsel %vm1896_vm8, %v1864_v54, %v1476_v3  ;;  %v1702_v41 = vsel %vm279_vm0, %v4979_v21, %v8488_v7  ;;  %v8491_v2 = vld [vmem:[#allocation70_spill] sm:$0xff]  ;;  %v4982_v21 = vld [vmem:[#allocation2 + $0x48] sm:$0xff]  ;;  %v8494_v7 = vld [vmem:[#allocation12_spill] sm:$0xff] }
 0x22f   : > { %v1898_v22 = vsel %vm1896_vm8, %v1865_v14, %v1478_v4  ;;  %v1833_v24 = vsel %vm1830_vm6, %v1800_v52, %v6143_v43  ;;  %v8489_v43 = vld [vmem:[#allocation71_spill] sm:$0xff]  ;;  %v8490_v4 = vld [vmem:[#allocation9_spill] sm:$0xff] }
 0x230   : > { %1661 = vrot.lane.b32.xlu1 %v6015_v28, %s5029_s20  ;;  %1663 = vrot.lane.b32.xlu0 %v673_v42, %s5029_s20  ;;  %v1866_v56 = vsel %vm1863_vm7, %v1833_v24, %v6252_v45  ;;  %v1931_v47 = vsel %vm1929_vm9, %v1898_v22, %v1606_v44  ;;  %v1735_v3 = vsel %vm1731_vm3, %v1702_v41, %v8489_v43  ;;  %v4981_v24 = vld [vmem:[#allocation2 + $0x38] sm:$0xff] }
 0x231   : > { %v1899_v34 = vsel %vm1896_vm8, %v1866_v56, %v1480_v20  ;;  %v1703_v26 = vsel %vm279_vm0, %v4980_v60, %v8490_v4  ;;  %v1768_v20 = vsel %vm1764_vm4, %v1735_v3, %v5877_v57 }
 0x232   : > { %v1604_v6 = vpop.permute.xlu1 %1603  ;;  %v1608_v37 = vpop.permute.xlu0 %1607  ;;  %v1736_v42 = vsel %vm1731_vm3, %v1703_v26, %v8491_v2  ;;  %v1801_v52 = vsel %vm1797_vm5, %v1768_v20, %v6009_v35 }
 0x233   : > { %v1930_v28 = vsel %vm1929_vm9, %v1897_v10, %v1604_v6  ;;  %v1932_v45 = vsel %vm1929_vm9, %v1899_v34, %v1608_v37  ;;  %v1769_v29 = vsel %vm1764_vm4, %v1736_v42, %v5871_v50  ;;  %v1834_v14 = vsel %vm1830_vm6, %v1801_v52, %v6162_v40  ;;  %v8492_v10 = vld [vmem:[#allocation15_spill] sm:$0xff]  ;;  %v4984_v52 = vld [vmem:[#allocation2 + $0x60] sm:$0xff] }
 0x234   : > { %1537 = vrot.lane.b32.xlu1 %v642_v39, %s5028_s19  ;;  %4816 = vmatprep.mubr.msk.f32.mxu0 %vm1971_vm10, %v1930_v28  ;;  %v1802_v57 = vsel %vm1797_vm5, %v1769_v29, %v6003_v18  ;;  %v1867_v54 = vsel %vm1863_vm7, %v1834_v14, %v6262_v30  ;;  %v1704_v6 = vsel %vm279_vm0, %v4981_v24, %v8492_v10  ;;  %v8493_v30 = vld [vmem:[#allocation73_spill] sm:$0xff]  ;;  %v8497_v29 = vld [vmem:[#allocation16_spill] sm:$0xff] }
 0x235   : > { %4817 = vmatmul.mubr.msk.f32.vlgmr.msra.gmra.mrb[0].mxu0 %vm1971_vm10, %v1931_v47  ;;  %v1835_v22 = vsel %vm1830_vm6, %v1802_v57, %v6157_v13  ;;  %v1737_v13 = vsel %vm1731_vm3, %v1704_v6, %v8493_v30  ;;  %v8495_v47 = vld [vmem:[#allocation72_spill] sm:$0xff]  ;;  %v8498_v57 = vld [vmem:[#allocation74_spill] sm:$0xff]  ;;  %v4985_v6 = vld [vmem:[#allocation2 + $0x68] sm:$0xff] }
 0x236   : > { %v1482_v55 = vpop.permute.xlu1 %1481  ;;  %4819 = vmatprep.mubr.msk.f32.mxu0 %vm1971_vm10, %v1932_v45  ;;  %v1484_v44 = vpop.permute.xlu0 %1483  ;;  %v1868_v50 = vsel %vm1863_vm7, %v1835_v22, %v6258_v9  ;;  %v1705_v9 = vsel %vm279_vm0, %v4982_v21, %v8494_v7  ;;  %v1770_v41 = vsel %vm1764_vm4, %v1737_v13, %v5887_v61  ;;  %v4986_v30 = vld [vmem:[#allocation2 + $0x78] sm:$0xff] }
 0x237   : > { %v1900_v35 = vsel %vm1896_vm8, %v1867_v54, %v1482_v55  ;;  %v1901_v18 = vsel %vm1896_vm8, %v1868_v50, %v1484_v44  ;;  %v1738_v37 = vsel %vm1731_vm3, %v1705_v9, %v8495_v47  ;;  %v1803_v43 = vsel %vm1797_vm5, %v1770_v41, %v6019_v49  ;;  %v4983_v55 = vld [vmem:[#allocation2 + $0x50] sm:$0xff]  ;;  %v8500_v13 = vld [vmem:[#allocation19_spill] sm:$0xff] }
 0x238   : > { %1665 = vrot.lane.b32.xlu1 %v674_v5, %s5029_s20  ;;  %v1771_v3 = vsel %vm1764_vm4, %v1738_v37, %v5879_v59  ;;  %v1836_v45 = vsel %vm1830_vm6, %v1803_v43, %v6172_v0  ;;  %v8496_v0 = vld [vmem:[#allocation18_spill] sm:$0xff] }
 0x239   : > { %v1804_v60 = vsel %vm1797_vm5, %v1771_v3, %v6011_v23  ;;  %v1869_v61 = vsel %vm1863_vm7, %v1836_v45, %v6268_v31  ;;  %v1706_v2 = vsel %vm279_vm0, %v4983_v55, %v8496_v0  ;;  %v4987_v3 = vld [vmem:[#allocation2 + $0x80] sm:$0xff] }
 0x23a   : > { %v1610_v39 = vpop.permute.xlu1 %1609  ;;  %v1612_v56 = vpop.permute.xlu0 %1611  ;;  %v1837_v4 = vsel %vm1830_vm6, %v1804_v60, %v6167_v36  ;;  %v1739_v36 = vsel %vm1731_vm3, %v1706_v2, %v5763_v58  ;;  %v8506_v0 = vld [vmem:[#allocation8_spill] sm:$0xff] }
 0x23b   : > { %v1933_v40 = vsel %vm1929_vm9, %v1900_v35, %v1610_v39  ;;  %v1934_v28 = vsel %vm1929_vm9, %v1901_v18, %v1612_v56  ;;  %v1870_v49 = vsel %vm1863_vm7, %v1837_v4, %v6264_v48  ;;  %v1707_v48 = vsel %vm279_vm0, %v4984_v52, %v8497_v29  ;;  %v8503_v4 = vld [vmem:[#allocation23_spill] sm:$0xff]  ;;  %v8509_v29 = vld [vmem:[#allocation6_spill] sm:$0xff] }
 0x23c   : > { %4820 = vmatmul.mubr.msk.f32.gmra.mrb[2].mxu0 %vm1971_vm10, %v1933_v40  ;;  %v1772_v14 = vsel %vm1764_vm4, %v1739_v36, %v5895_v63  ;;  %v1740_v54 = vsel %vm1731_vm3, %v1707_v48, %v8498_v57  ;;  %v8508_v36 = vld [vmem:[#allocation54_spill] sm:$0xff]  ;;  %v8511_v57 = vld [vmem:[#allocation52_spill] sm:$0xff] }
 0x23d   : > { %4822 = vmatprep.mubr.msk.f32.mxu0 %vm1971_vm10, %v1934_v28  ;;  %v1805_v22 = vsel %vm1797_vm5, %v1772_v14, %v6027_v46  ;;  %v1773_v58 = vsel %vm1764_vm4, %v1740_v54, %v5889_v53  ;;  %v8510_v14 = vld [vmem:[#allocation130_spill] sm:$0xff] }
 0x23e   : > { %v1486_v34 = vpop.permute.xlu1 %1485  ;;  %v1488_v5 = vpop.permute.xlu0 %1487  ;;  %v1838_v35 = vsel %vm1830_vm6, %v1805_v22, %v6178_v32  ;;  %v1806_v50 = vsel %vm1797_vm5, %v1773_v58, %v6021_v16  ;;  %v8499_v32 = vld [vmem:[#allocation21_spill] sm:$0xff] }
 0x23f   : > { %v1902_v26 = vsel %vm1896_vm8, %v1869_v61, %v1486_v34  ;;  %v1903_v23 = vsel %vm1896_vm8, %v1870_v49, %v1488_v5  ;;  %v1871_v63 = vsel %vm1863_vm7, %v1838_v35, %v6274_v15  ;;  %v1839_v40 = vsel %vm1830_vm6, %v1806_v50, %v6174_v8  ;;  %v4988_v61 = vld [vmem:[#allocation2 + $0x90] sm:$0xff]  ;;  %v8512_v35 = vld [vmem:[#allocation129_spill] sm:$0xff] }
 0x240   : > { %v1872_v46 = vsel %vm1863_vm7, %v1839_v40, %v6270_v62  ;;  %v1708_v18 = vsel %vm279_vm0, %v4985_v6, %v8499_v32  ;;  %v1709_v62 = vsel %vm279_vm0, %v4986_v30, %v8500_v13  ;;  %v8513_v40 = vld [vmem:[#allocation29_spill] sm:$0xff] }
 0x241   : > { %v1741_v8 = vsel %vm1731_vm3, %v1708_v18, %v5771_v25  ;;  %v1742_v7 = vsel %vm1731_vm3, %v1709_v62, %v5765_v33  ;;  %v4990_v18 = vld [vmem:[#allocation2 + $0xa8] sm:$0xff] }
 0x242   : > { %v1614_v20 = vpop.permute.xlu1 %1613  ;;  %v1616_v42 = vpop.permute.xlu0 %1615  ;;  %v1774_v28 = vsel %vm1764_vm4, %v1741_v8, %v5903_v1  ;;  %v1775_v25 = vsel %vm1764_vm4, %v1742_v7, %v5897_v51  ;;  %v8516_v8 = vld [vmem:[#allocation99_spill] sm:$0xff]  ;;  %v8517_v13 = vld [vmem:[#allocation77_spill] sm:$0xff]  ;;  %v8519_v7 = vld [vmem:[#allocation98_spill] sm:$0xff] }
 0x243   : > { %v1935_v59 = vsel %vm1929_vm9, %v1902_v26, %v1614_v20  ;;  %v1936_v31 = vsel %vm1929_vm9, %v1903_v23, %v1616_v42  ;;  %v1807_v9 = vsel %vm1797_vm5, %v1774_v28, %v6035_v19  ;;  %v1808_v47 = vsel %vm1797_vm5, %v1775_v25, %v6029_v17  ;;  %v8504_v26 = vld [vmem:[#allocation97_spill] sm:$0xff]  ;;  %v8507_v23 = vld [vmem:[#allocation96_spill] sm:$0xff]  ;;  %v8518_v28 = vld [vmem:[#allocation14_spill] sm:$0xff] }
 0x244   : > { %4823 = vmatmul.mubr.msk.f32.gmra.mrb[4].mxu0 %vm1971_vm10, %v1935_v59  ;;  %v1840_v41 = vsel %vm1830_vm6, %v1807_v9, %v6184_v12  ;;  %v1841_v37 = vsel %vm1830_vm6, %v1808_v47, %v6180_v38  ;;  %v8501_v12 = vld [vmem:[#allocation25_spill] sm:$0xff]  ;;  %v8505_v59 = vld [vmem:[#allocation75_spill] sm:$0xff]  ;;  %v8520_v25 = vld [vmem:[#allocation58_spill] sm:$0xff] }
 0x245   : > { %4825 = vmatprep.mubr.msk.f32.mxu0 %vm1971_vm10, %v1936_v31  ;;  %v1873_v1 = vsel %vm1863_vm7, %v1840_v41, %v6280_v11  ;;  %v1874_v19 = vsel %vm1863_vm7, %v1841_v37, %v6276_v27  ;;  %v1710_v45 = vsel %vm279_vm0, %v4987_v3, %v8501_v12  ;;  %v8502_v11 = vld [vmem:[#allocation76_spill] sm:$0xff]  ;;  %v1711_v27 = vsel %vm279_vm0, %v4988_v61, %v8503_v4  ;;  %v8521_v47 = vld [vmem:[#allocation10_spill] sm:$0xff]  ;;  %v8524_v12 = vld [vmem:[#allocation131_spill] sm:$0xff] }
 0x246   : > { %v1490_v44 = vpop.permute.xlu1 %1489  ;;  %v1492_v39 = vpop.permute.xlu0 %1491  ;;  %v1743_v38 = vsel %vm1731_vm3, %v1710_v45, %v8502_v11  ;;  %v1744_v55 = vsel %vm1731_vm3, %v1711_v27, %v8505_v59  ;;  %v8522_v37 = vld [vmem:[#allocation132_spill] sm:$0xff]  ;;  %v8525_v11 = vld [vmem:[#allocation33_spill] sm:$0xff] }
 0x247   : > { %v1904_v24 = vsel %vm1896_vm8, %v1871_v63, %v1490_v44  ;;  %v1905_v16 = vsel %vm1896_vm8, %v1872_v46, %v1492_v39  ;;  %v1776_v20 = vsel %vm1764_vm4, %v1743_v38, %v8504_v26  ;;  %v1777_v42 = vsel %vm1764_vm4, %v1744_v55, %v8507_v23  ;;  %v4989_v63 = vld [vmem:[#allocation2 + $0x98] sm:$0xff]  ;;  %v8526_v4 = vld [vmem:[#allocation80_spill] sm:$0xff]  ;;  %v8528_v55 = vld [vmem:[#allocation101_spill] sm:$0xff] }
 0x248   : > { %v1809_v2 = vsel %vm1797_vm5, %v1776_v20, %v8506_v0  ;;  %v1810_v48 = vsel %vm1797_vm5, %v1777_v42, %v8509_v29  ;;  %v4992_v20 = vld [vmem:[#allocation2 + $0xc0] sm:$0xff]  ;;  %v8529_v23 = vld [vmem:[#allocation79_spill] sm:$0xff] }
 0x249   : > { %v1842_v31 = vsel %vm1830_vm6, %v1809_v2, %v8508_v36  ;;  %v1843_v54 = vsel %vm1830_vm6, %v1810_v48, %v8511_v57  ;;  %v8530_v36 = vld [vmem:[#allocation20_spill] sm:$0xff]  ;;  %v8532_v48 = vld [vmem:[#allocation62_spill] sm:$0xff]  ;;  %v8533_v57 = vld [vmem:[#allocation17_spill] sm:$0xff] }
 0x24a   : > { %v1618_v10 = vpop.permute.xlu1 %1617  ;;  %v1620_v56 = vpop.permute.xlu0 %1619  ;;  %v1875_v44 = vsel %vm1863_vm7, %v1842_v31, %v8510_v14  ;;  %v1876_v39 = vsel %vm1863_vm7, %v1843_v54, %v8512_v35  ;;  %v8535_v35 = vld [vmem:[#allocation60_spill] sm:$0xff] }
 0x24b   : > { %v1937_v53 = vsel %vm1929_vm9, %v1904_v24, %v1618_v10  ;;  %v1938_v15 = vsel %vm1929_vm9, %v1905_v16, %v1620_v56  ;;  %v1712_v24 = vsel %vm279_vm0, %v4989_v63, %v8513_v40  ;;  %v8515_v16 = vld [vmem:[#allocation27_spill] sm:$0xff]  ;;  %v8536_v40 = vld [vmem:[#allocation133_spill] sm:$0xff] }
 0x24c   : > { %4826 = vmatmul.mubr.msk.f32.gmra.mrb[6].mxu0 %vm1971_vm10, %v1937_v53  ;;  %v8514_v53 = vld [vmem:[#allocation78_spill] sm:$0xff]  ;;  %v1713_v56 = vsel %vm279_vm0, %v4990_v18, %v8515_v16 }
 0x24d   : > { %4828 = vmatprep.mubr.msk.f32.mxu0 %vm1971_vm10, %v1938_v15  ;;  %v1745_v6 = vsel %vm1731_vm3, %v1712_v24, %v8514_v53  ;;  %v1746_v62 = vsel %vm1731_vm3, %v1713_v56, %v8517_v13  ;;  %v8537_v53 = vld [vmem:[#allocation37_spill] sm:$0xff]  ;;  %v8538_v16 = vld [vmem:[#allocation82_spill] sm:$0xff] }
 0x24e   : > { %v1494_v21 = vpop.permute.xlu1 %1493  ;;  %v1496_v34 = vpop.permute.xlu0 %1495  ;;  %v1778_v15 = vsel %vm1764_vm4, %v1745_v6, %v8516_v8  ;;  %v1779_v9 = vsel %vm1764_vm4, %v1746_v62, %v8519_v7  ;;  %v8540_v62 = vld [vmem:[#allocation103_spill] sm:$0xff]  ;;  %v8541_v7 = vld [vmem:[#allocation81_spill] sm:$0xff] }
 0x24f   : > { %v1906_v33 = vsel %vm1896_vm8, %v1873_v1, %v1494_v21  ;;  %v1907_v17 = vsel %vm1896_vm8, %v1874_v19, %v1496_v34  ;;  %v1811_v21 = vsel %vm1797_vm5, %v1778_v15, %v8518_v28  ;;  %v1812_v1 = vsel %vm1797_vm5, %v1779_v9, %v8521_v47  ;;  %v4994_v15 = vld [vmem:[#allocation2 + $0xd8] sm:$0xff] }
 0x250   : > { %v1844_v41 = vsel %vm1830_vm6, %v1811_v21, %v8520_v25  ;;  %v8542_v25 = vld [vmem:[#allocation24_spill] sm:$0xff] }
 0x252   : > { %v1622_v43 = vpop.permute.xlu1 %1621  ;;  %v1624_v5 = vpop.permute.xlu0 %1623 }
 0x253   : > { %v1939_v51 = vsel %vm1929_vm9, %v1906_v33, %v1622_v43  ;;  %v1940_v60 = vsel %vm1929_vm9, %v1907_v17, %v1624_v5  ;;  %v1877_v33 = vsel %vm1863_vm7, %v1844_v41, %v8522_v37  ;;  %v8523_v43 = vld [vmem:[#allocation56_spill] sm:$0xff]  ;;  %v4991_v5 = vld [vmem:[#allocation2 + $0xb0] sm:$0xff] }
 0x254   : > { %4829 = vmatmul.mubr.msk.f32.gmra.mrb[8].mxu0 %vm1971_vm10, %v1939_v51  ;;  %v1845_v19 = vsel %vm1830_vm6, %v1812_v1, %v8523_v43  ;;  %v1714_v38 = vsel %vm279_vm0, %v4991_v5, %v8525_v11  ;;  %v8544_v1 = vld [vmem:[#allocation66_spill] sm:$0xff]  ;;  %v8548_v11 = vld [vmem:[#allocation135_spill] sm:$0xff] }
 0x255   : > { %4831 = vmatprep.mubr.msk.f32.mxu0 %vm1971_vm10, %v1940_v60  ;;  %v1878_v45 = vsel %vm1863_vm7, %v1845_v19, %v8524_v12  ;;  %v1747_v27 = vsel %vm1731_vm3, %v1714_v38, %v8526_v4  ;;  %v8545_v43 = vld [vmem:[#allocation22_spill] sm:$0xff]  ;;  %v8547_v12 = vld [vmem:[#allocation64_spill] sm:$0xff]  ;;  %v8549_v4 = vld [vmem:[#allocation41_spill] sm:$0xff] }
 0x256   : > { %v1498_v49 = vpop.permute.xlu1 %1497  ;;  %v1500_v52 = vpop.permute.xlu0 %1499  ;;  %v1780_v0 = vsel %vm1764_vm4, %v1747_v27, %v8528_v55 }
 0x257   : > { %v1908_v22 = vsel %vm1896_vm8, %v1875_v44, %v1498_v49  ;;  %v1909_v10 = vsel %vm1896_vm8, %v1876_v39, %v1500_v52  ;;  %v8527_v49 = vld [vmem:[#allocation31_spill] sm:$0xff]  ;;  %v1813_v31 = vsel %vm1797_vm5, %v1780_v0, %v8530_v36  ;;  %v8531_v52 = vld [vmem:[#allocation100_spill] sm:$0xff]  ;;  %v4996_v0 = vld [vmem:[#allocation2 + $0xf0] sm:$0xff] }
 0x258   : > { %v1715_v59 = vsel %vm279_vm0, %v4992_v20, %v8527_v49  ;;  %v1846_v14 = vsel %vm1830_vm6, %v1813_v31, %v8532_v48  ;;  %v8550_v49 = vld [vmem:[#allocation84_spill] sm:$0xff] }
 0x259   : > { %v1748_v42 = vsel %vm1731_vm3, %v1715_v59, %v8529_v23  ;;  %v8554_v48 = vld [vmem:[#allocation28_spill] sm:$0xff] }
 0x25a   : > { %v1626_v58 = vpop.permute.xlu1 %1625  ;;  %v1628_v46 = vpop.permute.xlu0 %1627  ;;  %v1781_v29 = vsel %vm1764_vm4, %v1748_v42, %v8531_v52  ;;  %v8552_v42 = vld [vmem:[#allocation105_spill] sm:$0xff]  ;;  %v8553_v52 = vld [vmem:[#allocation83_spill] sm:$0xff] }
 0x25b   : > { %v1941_v50 = vsel %vm1929_vm9, %v1908_v22, %v1626_v58  ;;  %v1942_v32 = vsel %vm1929_vm9, %v1909_v10, %v1628_v46  ;;  %v1814_v54 = vsel %vm1797_vm5, %v1781_v29, %v8533_v57  ;;  %v8534_v22 = vld [vmem:[#allocation134_spill] sm:$0xff]  ;;  %v4993_v46 = vld [vmem:[#allocation2 + $0xc8] sm:$0xff] }
 0x25c   : > { %4832 = vmatmul.mubr.msk.f32.gmra.mrb[10].mxu0 %vm1971_vm10, %v1941_v50  ;;  %v1879_v58 = vsel %vm1863_vm7, %v1846_v14, %v8534_v22  ;;  %v1847_v39 = vsel %vm1830_vm6, %v1814_v54, %v8535_v35  ;;  %v1716_v6 = vsel %vm279_vm0, %v4993_v46, %v8537_v53  ;;  %v8556_v54 = vld [vmem:[#allocation117_spill] sm:$0xff]  ;;  %v8557_v35 = vld [vmem:[#allocation26_spill] sm:$0xff] }
 0x25d   : > { %4834 = vmatprep.mubr.msk.f32.mxu0 %vm1971_vm10, %v1942_v32  ;;  %v1880_v24 = vsel %vm1863_vm7, %v1847_v39, %v8536_v40  ;;  %v1749_v56 = vsel %vm1731_vm3, %v1716_v6, %v8538_v16  ;;  %v8559_v40 = vld [vmem:[#allocation69_spill] sm:$0xff] }
 0x25e   : > { %v1502_v30 = vpop.permute.xlu1 %1501  ;;  %v1504_v34 = vpop.permute.xlu0 %1503  ;;  %v1782_v28 = vsel %vm1764_vm4, %v1749_v56, %v8540_v62  ;;  %v8560_v53 = vld [vmem:[#allocation137_spill] sm:$0xff] }
 0x25f   : > { %v1910_v51 = vsel %vm1896_vm8, %v1877_v33, %v1502_v30  ;;  %v1911_v60 = vsel %vm1896_vm8, %v1878_v45, %v1504_v34  ;;  %v8539_v30 = vld [vmem:[#allocation35_spill] sm:$0xff]  ;;  %v1815_v41 = vsel %vm1797_vm5, %v1782_v28, %v8542_v25  ;;  %v8543_v34 = vld [vmem:[#allocation102_spill] sm:$0xff]  ;;  %v8561_v16 = vld [vmem:[#allocation45_spill] sm:$0xff] }
 0x260   : > { %v1717_v13 = vsel %vm279_vm0, %v4994_v15, %v8539_v30  ;;  %v1848_v37 = vsel %vm1830_vm6, %v1815_v41, %v8544_v1  ;;  %v8562_v30 = vld [vmem:[#allocation86_spill] sm:$0xff]  ;;  %v4998_v28 = vld [vmem:[#allocation2 + $0x108] sm:$0xff]  ;;  %v8566_v1 = vld [vmem:[#allocation32_spill] sm:$0xff] }
 0x261   : > { %v1750_v9 = vsel %vm1731_vm3, %v1717_v13, %v8541_v7 }
 0x262   : > { %v1630_v3 = vpop.permute.xlu1 %1629  ;;  %v1632_v61 = vpop.permute.xlu0 %1631  ;;  %v1783_v47 = vsel %vm1764_vm4, %v1750_v9, %v8543_v34  ;;  %v8564_v9 = vld [vmem:[#allocation107_spill] sm:$0xff]  ;;  %v8565_v34 = vld [vmem:[#allocation85_spill] sm:$0xff] }
 0x263   : > { %v1943_v17 = vsel %vm1929_vm9, %v1910_v51, %v1630_v3  ;;  %v1944_v26 = vsel %vm1929_vm9, %v1911_v60, %v1632_v61  ;;  %v1816_v19 = vsel %vm1797_vm5, %v1783_v47, %v8545_v43  ;;  %v8546_v51 = vld [vmem:[#allocation136_spill] sm:$0xff] }
 0x264   : > { %4835 = vmatmul.mubr.msk.f32.gmra.mrb[12].mxu0 %vm1971_vm10, %v1943_v17  ;;  %v1881_v3 = vsel %vm1863_vm7, %v1848_v37, %v8546_v51  ;;  %v1849_v45 = vsel %vm1830_vm6, %v1816_v19, %v8547_v12  ;;  %v4995_v61 = vld [vmem:[#allocation2 + $0xe0] sm:$0xff]  ;;  %v8568_v19 = vld [vmem:[#allocation119_spill] sm:$0xff]  ;;  %v8569_v12 = vld [vmem:[#allocation30_spill] sm:$0xff] }
 0x265   : > { %4837 = vmatprep.mubr.msk.f32.mxu0 %vm1971_vm10, %v1944_v26  ;;  %v1882_v38 = vsel %vm1863_vm7, %v1849_v45, %v8548_v11  ;;  %v1718_v27 = vsel %vm279_vm0, %v4995_v61, %v8549_v4  ;;  %v8571_v11 = vld [vmem:[#allocation118_spill] sm:$0xff]  ;;  %v8572_v4 = vld [vmem:[#allocation139_spill] sm:$0xff] }
 0x266   : > { %v1506_v2 = vpop.permute.xlu1 %1505  ;;  %v1508_v44 = vpop.permute.xlu0 %1507  ;;  %v1751_v59 = vsel %vm1731_vm3, %v1718_v27, %v8550_v49  ;;  %v8573_v49 = vld [vmem:[#allocation49_spill] sm:$0xff] }
 0x267   : > { %v1912_v50 = vsel %vm1896_vm8, %v1879_v58, %v1506_v2  ;;  %v1913_v32 = vsel %vm1896_vm8, %v1880_v24, %v1508_v44  ;;  %v8551_v2 = vld [vmem:[#allocation39_spill] sm:$0xff]  ;;  %v1784_v36 = vsel %vm1764_vm4, %v1751_v59, %v8552_v42  ;;  %v8555_v44 = vld [vmem:[#allocation104_spill] sm:$0xff] }
 0x268   : > { %v1719_v23 = vsel %vm279_vm0, %v4996_v0, %v8551_v2  ;;  %v1817_v14 = vsel %vm1797_vm5, %v1784_v36, %v8554_v48  ;;  %v8574_v2 = vld [vmem:[#allocation88_spill] sm:$0xff] }
 0x269   : > { %v1752_v29 = vsel %vm1731_vm3, %v1719_v23, %v8553_v52  ;;  %v1850_v22 = vsel %vm1830_vm6, %v1817_v14, %v8556_v54  ;;  %v5000_v36 = vld [vmem:[#allocation2 + $0x120] sm:$0xff] }
 0x26a   : > { %v1634_v63 = vpop.permute.xlu1 %1633  ;;  %v1636_v18 = vpop.permute.xlu0 %1635  ;;  %v1785_v57 = vsel %vm1764_vm4, %v1752_v29, %v8555_v44  ;;  %v8576_v29 = vld [vmem:[#allocation109_spill] sm:$0xff]  ;;  %v8577_v44 = vld [vmem:[#allocation87_spill] sm:$0xff]  ;;  %v8578_v54 = vld [vmem:[#allocation36_spill] sm:$0xff] }
 0x26b   : > { %v1945_v10 = vsel %vm1929_vm9, %v1912_v50, %v1634_v63  ;;  %v1946_v8 = vsel %vm1929_vm9, %v1913_v32, %v1636_v18  ;;  %v1818_v39 = vsel %vm1797_vm5, %v1785_v57, %v8557_v35  ;;  %v8558_v50 = vld [vmem:[#allocation138_spill] sm:$0xff]  ;;  %v4997_v18 = vld [vmem:[#allocation2 + $0xf8] sm:$0xff] }
 0x26c   : > { %4838 = vmatmul.mubr.msk.f32.gmra.mrb[14].mxu0 %vm1971_vm10, %v1945_v10  ;;  %v1883_v63 = vsel %vm1863_vm7, %v1850_v22, %v8558_v50  ;;  %v1851_v24 = vsel %vm1830_vm6, %v1818_v39, %v8559_v40  ;;  %v1720_v56 = vsel %vm279_vm0, %v4997_v18, %v8561_v16  ;;  %v8580_v39 = vld [vmem:[#allocation121_spill] sm:$0xff]  ;;  %v8581_v40 = vld [vmem:[#allocation34_spill] sm:$0xff] }
 0x26d   : > { %4840 = vmatprep.mubr.msk.f32.mxu0 %vm1971_vm10, %v1946_v8  ;;  %v1884_v6 = vsel %vm1863_vm7, %v1851_v24, %v8560_v53  ;;  %v1753_v13 = vsel %vm1731_vm3, %v1720_v56, %v8562_v30  ;;  %v8583_v53 = vld [vmem:[#allocation120_spill] sm:$0xff]  ;;  %v8584_v16 = vld [vmem:[#allocation141_spill] sm:$0xff] }
 0x26e   : > { %v1510_v21 = vpop.permute.xlu1 %1509  ;;  %v1512_v33 = vpop.permute.xlu0 %1511  ;;  %v1786_v25 = vsel %vm1764_vm4, %v1753_v13, %v8564_v9  ;;  %v8585_v30 = vld [vmem:[#allocation53_spill] sm:$0xff] }
 0x26f   : > { %v1914_v17 = vsel %vm1896_vm8, %v1881_v3, %v1510_v21  ;;  %v1915_v26 = vsel %vm1896_vm8, %v1882_v38, %v1512_v33  ;;  %v8563_v21 = vld [vmem:[#allocation43_spill] sm:$0xff]  ;;  %v1819_v37 = vsel %vm1797_vm5, %v1786_v25, %v8566_v1  ;;  %v8567_v33 = vld [vmem:[#allocation106_spill] sm:$0xff] }
 0x270   : > { %v1721_v7 = vsel %vm279_vm0, %v4998_v28, %v8563_v21  ;;  %v1852_v51 = vsel %vm1830_vm6, %v1819_v37, %v8568_v19  ;;  %v8586_v21 = vld [vmem:[#allocation90_spill] sm:$0xff]  ;;  %v5002_v25 = vld [vmem:[#allocation2 + $0x138] sm:$0xff]  ;;  %v8590_v19 = vld [vmem:[#allocation40_spill] sm:$0xff] }
 0x271   : > { %v1754_v47 = vsel %vm1731_vm3, %v1721_v7, %v8565_v34 }
 0x272   : > { %v1638_v5 = vpop.permute.xlu1 %1637  ;;  %v1640_v20 = vpop.permute.xlu0 %1639  ;;  %v1787_v43 = vsel %vm1764_vm4, %v1754_v47, %v8567_v33  ;;  %v8588_v47 = vld [vmem:[#allocation111_spill] sm:$0xff]  ;;  %v8589_v33 = vld [vmem:[#allocation89_spill] sm:$0xff] }
 0x273   : > { %v1947_v60 = vsel %vm1929_vm9, %v1914_v17, %v1638_v5  ;;  %v1948_v55 = vsel %vm1929_vm9, %v1915_v26, %v1640_v20  ;;  %v1820_v45 = vsel %vm1797_vm5, %v1787_v43, %v8569_v12  ;;  %v8570_v17 = vld [vmem:[#allocation140_spill] sm:$0xff]  ;;  %v4999_v20 = vld [vmem:[#allocation2 + $0x110] sm:$0xff] }
 0x274   : > { %4841 = vmatmul.mubr.msk.f32.gmra.mrb[16].mxu0 %vm1971_vm10, %v1947_v60  ;;  %v1885_v5 = vsel %vm1863_vm7, %v1852_v51, %v8570_v17  ;;  %v1853_v38 = vsel %vm1830_vm6, %v1820_v45, %v8571_v11  ;;  %v1722_v59 = vsel %vm279_vm0, %v4999_v20, %v8573_v49  ;;  %v8592_v45 = vld [vmem:[#allocation123_spill] sm:$0xff]  ;;  %v8593_v11 = vld [vmem:[#allocation38_spill] sm:$0xff] }
 0x275   : > { %4843 = vmatprep.mubr.msk.f32.mxu0 %vm1971_vm10, %v1948_v55  ;;  %v1886_v27 = vsel %vm1863_vm7, %v1853_v38, %v8572_v4  ;;  %v1755_v23 = vsel %vm1731_vm3, %v1722_v59, %v8574_v2  ;;  %v8595_v4 = vld [vmem:[#allocation122_spill] sm:$0xff]  ;;  %v2540_v49 = vld [vmem:[#allocation3 + $0x9] sm:$0xff] }
 0x276   : > { %v1514_v31 = vpop.permute.xlu1 %1513  ;;  %v1516_v58 = vpop.permute.xlu0 %1515  ;;  %v1788_v48 = vsel %vm1764_vm4, %v1755_v23, %v8576_v29  ;;  %v8596_v59 = vld [vmem:[#allocation143_spill] sm:$0xff]  ;;  %2830 = vrot.lane.b32.xlu1 %v2540_v49, %s5022_s8  ;;  %v5003_v23 = vld [vmem:[#allocation2 + $0x140] sm:$0xff] }
 0x277   : > { %v1916_v10 = vsel %vm1896_vm8, %v1883_v63, %v1514_v31  ;;  %v1917_v8 = vsel %vm1896_vm8, %v1884_v6, %v1516_v58  ;;  %v8575_v31 = vld [vmem:[#allocation47_spill] sm:$0xff]  ;;  %v1821_v22 = vsel %vm1797_vm5, %v1788_v48, %v8578_v54  ;;  %v8579_v58 = vld [vmem:[#allocation108_spill] sm:$0xff] }
 0x278   : > { %v1723_v52 = vsel %vm279_vm0, %v5000_v36, %v8575_v31  ;;  %v1854_v50 = vsel %vm1830_vm6, %v1821_v22, %v8580_v39  ;;  %v2539_v2 = vld [vmem:[#allocation3 + $0x1] sm:$0xff]  ;;  %v8598_v29 = vld [vmem:[#allocation92_spill] sm:$0xff]  ;;  %v8600_v22 = vld [vmem:[#allocation113_spill] sm:$0xff] }
 0x279   : > { %v1756_v57 = vsel %vm1731_vm3, %v1723_v52, %v8577_v44  ;;  %2828 = vrot.lane.b32.xlu0 %v2539_v2, %s5022_s8  ;;  %v5004_v44 = vld [vmem:[#allocation2 + $0x150] sm:$0xff]  ;;  %v8601_v39 = vld [vmem:[#allocation91_spill] sm:$0xff]  ;;  %v8618_v49 = vld [vmem:[#allocation148_spill] sm:$0xff] }
 0x27a   : > { %v1642_v46 = vpop.permute.xlu1 %1641  ;;  %v1644_v15 = vpop.permute.xlu0 %1643  ;;  %v1789_v35 = vsel %vm1764_vm4, %v1756_v57, %v8579_v58  ;;  %v8599_v57 = vld [vmem:[#allocation55_spill] sm:$0xff] }
 0x27b   : > { %v1949_v32 = vsel %vm1929_vm9, %v1916_v10, %v1642_v46  ;;  %v1950_v62 = vsel %vm1929_vm9, %v1917_v8, %v1644_v15  ;;  %v1822_v24 = vsel %vm1797_vm5, %v1789_v35, %v8581_v40  ;;  %v8582_v10 = vld [vmem:[#allocation142_spill] sm:$0xff]  ;;  %v5001_v15 = vld [vmem:[#allocation2 + $0x128] sm:$0xff]  ;;  %v1727_v54 = vsel %vm279_vm0, %v5004_v44, %v8599_v57  ;;  %v8622_v57 = vld [vmem:[#allocation95_spill] sm:$0xff] }
 0x27c   : > { %4844 = vmatmul.mubr.msk.f32.gmra.mrb[18].mxu0 %vm1971_vm10, %v1949_v32  ;;  %v1887_v46 = vsel %vm1863_vm7, %v1854_v50, %v8582_v10  ;;  %v1855_v6 = vsel %vm1830_vm6, %v1822_v24, %v8583_v53  ;;  %v1724_v13 = vsel %vm279_vm0, %v5001_v15, %v8585_v30  ;;  %v1760_v50 = vsel %vm1731_vm3, %v1727_v54, %v8601_v39  ;;  %v8603_v24 = vld [vmem:[#allocation112_spill] sm:$0xff] }
 0x27d   : > { %4846 = vmatprep.mubr.msk.f32.mxu0 %vm1971_vm10, %v1950_v62  ;;  %v1888_v56 = vsel %vm1863_vm7, %v1855_v6, %v8584_v16  ;;  %v1757_v7 = vsel %vm1731_vm3, %v1724_v13, %v8586_v21  ;;  %v1793_v10 = vsel %vm1764_vm4, %v1760_v50, %v8603_v24  ;;  %v8606_v16 = vld [vmem:[#allocation146_spill] sm:$0xff] }
 0x27e   : > { %v1518_v41 = vpop.permute.xlu1 %1517  ;;  %v1520_v3 = vpop.permute.xlu0 %1519  ;;  %v1790_v1 = vsel %vm1764_vm4, %v1757_v7, %v8588_v47  ;;  %v5005_v7 = vld [vmem:[#allocation2 + $0x158] sm:$0xff]  ;;  %v8610_v47 = vld [vmem:[#allocation94_spill] sm:$0xff] }
 0x27f   : > { %v1918_v60 = vsel %vm1896_vm8, %v1885_v5, %v1518_v41  ;;  %v1919_v55 = vsel %vm1896_vm8, %v1886_v27, %v1520_v3  ;;  %v8587_v41 = vld [vmem:[#allocation51_spill] sm:$0xff]  ;;  %v1823_v51 = vsel %vm1797_vm5, %v1790_v1, %v8590_v19  ;;  %v8591_v3 = vld [vmem:[#allocation110_spill] sm:$0xff] }
 0x280   : > { %v1725_v34 = vsel %vm279_vm0, %v5002_v25, %v8587_v41  ;;  %v1856_v17 = vsel %vm1830_vm6, %v1823_v51, %v8592_v45  ;;  %v8612_v51 = vld [vmem:[#allocation115_spill] sm:$0xff]  ;;  %v8613_v45 = vld [vmem:[#allocation93_spill] sm:$0xff]  ;;  %v8624_v50 = vld [vmem:[#allocation50_spill] sm:$0xff] }
 0x281   : > { %v1758_v43 = vsel %vm1731_vm3, %v1725_v34, %v8589_v33  ;;  %v5006_v33 = vld [vmem:[#allocation2 + $0x168] sm:$0xff] }
 0x282   : > { %v1646_v61 = vpop.permute.xlu1 %1645  ;;  %v1648_v0 = vpop.permute.xlu0 %1647  ;;  %v1791_v12 = vsel %vm1764_vm4, %v1758_v43, %v8591_v3  ;;  %v8611_v43 = vld [vmem:[#allocation59_spill] sm:$0xff] }
 0x283   : > { %v1951_v26 = vsel %vm1929_vm9, %v1918_v60, %v1646_v61  ;;  %v1952_v42 = vsel %vm1929_vm9, %v1919_v55, %v1648_v0  ;;  %v1824_v38 = vsel %vm1797_vm5, %v1791_v12, %v8593_v11  ;;  %v8594_v60 = vld [vmem:[#allocation144_spill] sm:$0xff]  ;;  %v1729_v19 = vsel %vm279_vm0, %v5006_v33, %v8611_v43 }
 0x284   : > { %4847 = vmatmul.mubr.msk.f32.gmra.mrb[20].mxu0 %vm1971_vm10, %v1951_v26  ;;  %v1889_v61 = vsel %vm1863_vm7, %v1856_v17, %v8594_v60  ;;  %v1857_v27 = vsel %vm1830_vm6, %v1824_v38, %v8595_v4  ;;  %v1762_v17 = vsel %vm1731_vm3, %v1729_v19, %v8613_v45  ;;  %v8615_v38 = vld [vmem:[#allocation114_spill] sm:$0xff] }
 0x285   : > { %4849 = vmatprep.mubr.msk.f32.mxu0 %vm1971_vm10, %v1952_v42  ;;  %v1890_v55 = vsel %vm1863_vm7, %v1857_v27, %v8596_v59  ;;  %v8597_v42 = vld [vmem:[#allocation57_spill] sm:$0xff]  ;;  %v1795_v60 = vsel %vm1764_vm4, %v1762_v17, %v8615_v38 }
 0x286   : > { %v1522_v14 = vpop.permute.xlu1 %1521  ;;  %v1524_v63 = vpop.permute.xlu0 %1523  ;;  %v1726_v36 = vsel %vm279_vm0, %v5003_v23, %v8597_v42  ;;  %v8620_v42 = vld [vmem:[#allocation147_spill] sm:$0xff] }
 0x287   : > { %v1920_v32 = vsel %vm1896_vm8, %v1887_v46, %v1522_v14  ;;  %v1921_v62 = vsel %vm1896_vm8, %v1888_v56, %v1524_v63  ;;  %v1759_v48 = vsel %vm1731_vm3, %v1726_v36, %v8598_v29  ;;  %v8602_v63 = vld [vmem:[#allocation44_spill] sm:$0xff]  ;;  %v8604_v46 = vld [vmem:[#allocation125_spill] sm:$0xff] }
 0x288   : > { %v1792_v58 = vsel %vm1764_vm4, %v1759_v48, %v8600_v22  ;;  %v8621_v29 = vld [vmem:[#allocation65_spill] sm:$0xff] }
 0x289   : > { %v1825_v40 = vsel %vm1797_vm5, %v1792_v58, %v8602_v63  ;;  %v8623_v58 = vld [vmem:[#allocation116_spill] sm:$0xff] }
 0x28a   : > { %v1650_v18 = vpop.permute.xlu1 %1649  ;;  %v1652_v28 = vpop.permute.xlu0 %1651  ;;  %v1858_v53 = vsel %vm1830_vm6, %v1825_v40, %v8604_v46  ;;  %v8625_v40 = vld [vmem:[#allocation128_spill] sm:$0xff] }
 0x28b   : > { %v1953_v8 = vsel %vm1929_vm9, %v1920_v32, %v1650_v18  ;;  %v1954_v9 = vsel %vm1929_vm9, %v1921_v62, %v1652_v28  ;;  %v8605_v32 = vld [vmem:[#allocation42_spill] sm:$0xff]  ;;  %v1891_v56 = vsel %vm1863_vm7, %v1858_v53, %v8606_v16  ;;  %v8608_v62 = vld [vmem:[#allocation145_spill] sm:$0xff] }
 0x28c   : > { %4850 = vmatmul.mubr.msk.f32.gmra.mrb[22].mxu0 %vm1971_vm10, %v1953_v8  ;;  %v1826_v18 = vsel %vm1797_vm5, %v1793_v10, %v8605_v32  ;;  %v8607_v8 = vld [vmem:[#allocation124_spill] sm:$0xff]  ;;  %v8626_v10 = vld [vmem:[#allocation149_spill] sm:$0xff] }
 0x28d   : > { %4852 = vmatprep.mubr.msk.f32.mxu0 %vm1971_vm10, %v1954_v9  ;;  %v1859_v15 = vsel %vm1830_vm6, %v1826_v18, %v8607_v8  ;;  %v8609_v9 = vld [vmem:[#allocation61_spill] sm:$0xff]  ;;  %v6842_v18 = vld [vmem:[%s8230_s2] ss:$0 sm:$0xff] }
 0x28e   : > { %v1526_v37 = vpop.permute.xlu1 %1525  ;;  %v1528_v5 = vpop.permute.xlu0 %1527  ;;  %v1892_v28 = vsel %vm1863_vm7, %v1859_v15, %v8608_v62  ;;  %v1728_v25 = vsel %vm279_vm0, %v5005_v7, %v8609_v9 }
 0x28f   : > { %v1922_v26 = vsel %vm1896_vm8, %v1889_v61, %v1526_v37  ;;  %v1923_v31 = vsel %vm1896_vm8, %v1890_v55, %v1528_v5  ;;  %v1761_v1 = vsel %vm1731_vm3, %v1728_v25, %v8610_v47  ;;  %v8614_v5 = vld [vmem:[#allocation48_spill] sm:$0xff]  ;;  %v8616_v61 = vld [vmem:[#allocation127_spill] sm:$0xff]  ;;  %v8619_v55 = vld [vmem:[#allocation126_spill] sm:$0xff] }
 0x290   : > { %v1794_v3 = vsel %vm1764_vm4, %v1761_v1, %v8612_v51 }
 0x291   : > { %v1827_v11 = vsel %vm1797_vm5, %v1794_v3, %v8614_v5 }
 0x292   : > { %v1654_v20 = vpop.permute.xlu1 %1653  ;;  %v1656_v52 = vpop.permute.xlu0 %1655  ;;  %v1860_v4 = vsel %vm1830_vm6, %v1827_v11, %v8616_v61 }
 0x293   : > { %v1955_v0 = vsel %vm1929_vm9, %v1922_v26, %v1654_v20  ;;  %v1956_v14 = vsel %vm1929_vm9, %v1923_v31, %v1656_v52  ;;  %v8617_v26 = vld [vmem:[#allocation46_spill] sm:$0xff]  ;;  %v1893_v59 = vsel %vm1863_vm7, %v1860_v4, %v8618_v49 }
 0x294   : > { %4853 = vmatmul.mubr.msk.f32.gmra.mrb[24].mxu0 %vm1971_vm10, %v1955_v0  ;;  %v1828_v20 = vsel %vm1797_vm5, %v1795_v60, %v8617_v26  ;;  %v5007_v52 = vld [vmem:[#allocation2 + $0x170] sm:$0xff] }
 0x295   : > { %4855 = vmatprep.mubr.msk.f32.mxu0 %vm1971_vm10, %v1956_v14  ;;  %v1861_v0 = vsel %vm1830_vm6, %v1828_v20, %v8619_v55  ;;  %v1730_v48 = vsel %vm279_vm0, %v5007_v52, %v8621_v29 }
 0x296   : > { %v1530_v35 = vpop.permute.xlu1 %1529  ;;  %v1532_v6 = vpop.permute.xlu0 %1531  ;;  %v1894_v36 = vsel %vm1863_vm7, %v1861_v0, %v8620_v42  ;;  %v1763_v54 = vsel %vm1731_vm3, %v1730_v48, %v8622_v57 }
 0x297   : > { %v1924_v30 = vsel %vm1896_vm8, %v1891_v56, %v1530_v35  ;;  %v1925_v41 = vsel %vm1896_vm8, %v1892_v28, %v1532_v6  ;;  %v1796_v35 = vsel %vm1764_vm4, %v1763_v54, %v8623_v58  ;;  %v6847_v56 = vld [vmem:[%s8231_s3] ss:$0 sm:$0xff] }
 0x298   : > { %v1829_v63 = vsel %vm1797_vm5, %v1796_v35, %v8624_v50 }
 0x299   : > { %v1862_v24 = vsel %vm1830_vm6, %v1829_v63, %v8625_v40 }
 0x29a   : > { %v1658_v13 = vpop.permute.xlu1 %1657  ;;  %v1660_v34 = vpop.permute.xlu0 %1659  ;;  %v1895_v46 = vsel %vm1863_vm7, %v1862_v24, %v8626_v10 }
 0x29b   : > { %v1957_v21 = vsel %vm1929_vm9, %v1924_v30, %v1658_v13  ;;  %v1958_v37 = vsel %vm1929_vm9, %v1925_v41, %v1660_v34 }
 0x29c   : > { %4856 = vmatmul.mubr.msk.f32.gmra.mrb[26].mxu0 %vm1971_vm10, %v1957_v21 }
 0x29d   : > { %4858 = vmatprep.mubr.msk.f32.mxu0 %vm1971_vm10, %v1958_v37 }
 0x29e   : > { %v1534_v12 = vpop.permute.xlu1 %1533  ;;  %v1536_v27 = vpop.permute.xlu0 %1535 }
 0x29f   : > { %v1926_v2 = vsel %vm1896_vm8, %v1893_v59, %v1534_v12  ;;  %v1927_v14 = vsel %vm1896_vm8, %v1894_v36, %v1536_v27 }
 0x2a2   : > { %v1662_v23 = vpop.permute.xlu1 %1661  ;;  %v1664_v44 = vpop.permute.xlu0 %1663 }
 0x2a3   : > { %v1959_v31 = vsel %vm1929_vm9, %v1926_v2, %v1662_v23  ;;  %v1960_v22 = vsel %vm1929_vm9, %v1927_v14, %v1664_v44 }
 0x2a4   : > { %4859 = vmatmul.mubr.msk.f32.gmra.mrb[28].mxu0 %vm1971_vm10, %v1959_v31 }
 0x2a5   : > { %4861 = vmatprep.mubr.msk.f32.mxu0 %vm1971_vm10, %v1960_v22 }
 0x2a6   : > { %v1538_v39 = vpop.permute.xlu1 %1537 }
 0x2a7   : > { %v1928_v53 = vsel %vm1896_vm8, %v1895_v46, %v1538_v39 }
 0x2aa   : > { %v1666_v6 = vpop.permute.xlu1 %1665 }
 0x2ab   : > { %v1961_v32 = vsel %vm1929_vm9, %v1928_v53, %v1666_v6 }
 0x2ac   : > { %4862 = vmatmul.mubr.msk.f32.gmra.mrb[30].mxu0 %vm1971_vm10, %v1961_v32 }
 0x308   : > { %v4818_v16 = vpop.f32.mrb[0].mxu0 }
 0x309   : > { %v2301_v8 = vmul.f32 %v4818_v16, %v6842_v18  ;;  %v2134_v15 = vpop.f32.mrb[1].mxu0 }
 0x30a   : > { %v2300_v30 = vmul.f32 %v6842_v18, %v2134_v15 }
 0x30b   : > { %v2340_v13 = vadd.f32 %v6847_v56, %v2301_v8 }
 0x30c   : > { %v2339_v62 = vadd.f32 %v6847_v56, %v2300_v30 }
 0x30d   : > { %v2372_v28 = vmax.f32 %v2340_v13, 0.0 }
 0x30e   : > { %v2371_v21 = vmax.f32 %v2339_v62, 0.0 }
 0x30f   : > { %2476 = vst.msk [vmem:[#allocation3 + $0x21] sm:$0xff] %vm279_vm0, %v2372_v28  ;;  %v4821_v7 = vpop.f32.mrb[2].mxu0 }
 0x310   : > { %2475 = vst.msk [vmem:[#allocation3 + $0x19] sm:$0xff] %vm279_vm0, %v2371_v21  ;;  %v2303_v9 = vmul.f32 %v4821_v7, %v6842_v18  ;;  %v2144_v25 = vpop.f32.mrb[3].mxu0 }
 0x311   : > { %v2302_v41 = vmul.f32 %v6842_v18, %v2144_v25 }
 0x312   : > { %v2342_v34 = vadd.f32 %v6847_v56, %v2303_v9 }
 0x313   : > { %v2341_v47 = vadd.f32 %v6847_v56, %v2302_v41 }
 0x314   : > { %v2374_v1 = vmax.f32 %v2342_v34, 0.0 }
 0x315   : > { %v2373_v37 = vmax.f32 %v2341_v47, 0.0 }
 0x316   : > { %2478 = vst.msk [vmem:[#allocation3 + $0x39] sm:$0xff] %vm279_vm0, %v2374_v1  ;;  %v6860_v33 = vld [vmem:[#allocation3 + $0x21] sm:$0xff] }
 0x317   : > { %2477 = vst.msk [vmem:[#allocation3 + $0x31] sm:$0xff] %vm279_vm0, %v2373_v37  ;;  %2834 = vrot.lane.b32.xlu1 %v6860_v33, %s5022_s8  ;;  %v4824_v43 = vpop.f32.mrb[4].mxu0  ;;  %v6865_v19 = vld [vmem:[#allocation3 + $0x19] sm:$0xff] }
 0x318   : > { %v2305_v51 = vmul.f32 %v4824_v43, %v6842_v18  ;;  %2832 = vrot.lane.b32.xlu0 %v6865_v19, %s5022_s8  ;;  %v2154_v3 = vpop.f32.mrb[5].mxu0 }
 0x319   : > { %v2304_v12 = vmul.f32 %v6842_v18, %v2154_v3 }
 0x31a   : > { %v2344_v45 = vadd.f32 %v6847_v56, %v2305_v51 }
 0x31b   : > { %v2343_v17 = vadd.f32 %v6847_v56, %v2304_v12 }
 0x31c   : > { %v2376_v5 = vmax.f32 %v2344_v45, 0.0 }
 0x31d   : > { %v2375_v11 = vmax.f32 %v2343_v17, 0.0  ;;  %v6873_v38 = vld [vmem:[#allocation3 + $0x39] sm:$0xff] }
 0x31e   : > { %2480 = vst.msk [vmem:[#allocation3 + $0x51] sm:$0xff] %vm279_vm0, %v2376_v5  ;;  %2838 = vrot.lane.b32.xlu1 %v6873_v38, %s5022_s8  ;;  %v6878_v60 = vld [vmem:[#allocation3 + $0x31] sm:$0xff] }
 0x31f   : > { %2479 = vst.msk [vmem:[#allocation3 + $0x49] sm:$0xff] %vm279_vm0, %v2375_v11  ;;  %2836 = vrot.lane.b32.xlu0 %v6878_v60, %s5022_s8  ;;  %v4827_v61 = vpop.f32.mrb[6].mxu0 }
 0x320   : > { %v2307_v4 = vmul.f32 %v4827_v61, %v6842_v18  ;;  %v2164_v27 = vpop.f32.mrb[7].mxu0 }
 0x321   : > { %v2306_v26 = vmul.f32 %v6842_v18, %v2164_v27 }
 0x322   : > { %v2346_v20 = vadd.f32 %v6847_v56, %v2307_v4 }
 0x323   : > { %v2345_v49 = vadd.f32 %v6847_v56, %v2306_v26 }
 0x324   : > { %v2378_v59 = vmax.f32 %v2346_v20, 0.0 }
 0x325   : > { %v2377_v55 = vmax.f32 %v2345_v49, 0.0  ;;  %v6887_v0 = vld [vmem:[#allocation3 + $0x51] sm:$0xff] }
 0x326   : > { %2482 = vst.msk [vmem:[#allocation3 + $0x69] sm:$0xff] %vm279_vm0, %v2378_v59  ;;  %2842 = vrot.lane.b32.xlu1 %v6887_v0, %s5022_s8  ;;  %v6892_v2 = vld [vmem:[#allocation3 + $0x49] sm:$0xff] }
 0x327   : > { %2481 = vst.msk [vmem:[#allocation3 + $0x61] sm:$0xff] %vm279_vm0, %v2377_v55  ;;  %2840 = vrot.lane.b32.xlu0 %v6892_v2, %s5022_s8  ;;  %v4830_v23 = vpop.f32.mrb[8].mxu0 }
 0x328   : > { %v2309_v42 = vmul.f32 %v4830_v23, %v6842_v18  ;;  %v2174_v36 = vpop.f32.mrb[9].mxu0 }
 0x329   : > { %v2308_v31 = vmul.f32 %v6842_v18, %v2174_v36 }
 0x32a   : > { %v2348_v52 = vadd.f32 %v6847_v56, %v2309_v42 }
 0x32b   : > { %v2347_v29 = vadd.f32 %v6847_v56, %v2308_v31 }
 0x32c   : > { %v2380_v48 = vmax.f32 %v2348_v52, 0.0 }
 0x32d   : > { %v2379_v14 = vmax.f32 %v2347_v29, 0.0  ;;  %v6901_v44 = vld [vmem:[#allocation3 + $0x69] sm:$0xff] }
 0x32e   : > { %2484 = vst.msk [vmem:[#allocation3 + $0x81] sm:$0xff] %vm279_vm0, %v2380_v48  ;;  %2846 = vrot.lane.b32.xlu1 %v6901_v44, %s5022_s8  ;;  %v6906_v57 = vld [vmem:[#allocation3 + $0x61] sm:$0xff] }
 0x32f   : > { %2483 = vst.msk [vmem:[#allocation3 + $0x79] sm:$0xff] %vm279_vm0, %v2379_v14  ;;  %2844 = vrot.lane.b32.xlu0 %v6906_v57, %s5022_s8  ;;  %v4833_v54 = vpop.f32.mrb[10].mxu0 }
 0x330   : > { %v2311_v22 = vmul.f32 %v4833_v54, %v6842_v18  ;;  %v2184_v58 = vpop.f32.mrb[11].mxu0 }
 0x331   : > { %v2310_v35 = vmul.f32 %v6842_v18, %v2184_v58 }
 0x332   : > { %v2350_v39 = vadd.f32 %v6847_v56, %v2311_v22 }
 0x333   : > { %v2349_v50 = vadd.f32 %v6847_v56, %v2310_v35 }
 0x334   : > { %v2382_v63 = vmax.f32 %v2350_v39, 0.0 }
 0x335   : > { %v2381_v40 = vmax.f32 %v2349_v50, 0.0  ;;  %v6915_v24 = vld [vmem:[#allocation3 + $0x81] sm:$0xff] }
 0x336   : > { %2486 = vst.msk [vmem:[#allocation3 + $0x99] sm:$0xff] %vm279_vm0, %v2382_v63  ;;  %2850 = vrot.lane.b32.xlu1 %v6915_v24, %s5022_s8  ;;  %v6920_v10 = vld [vmem:[#allocation3 + $0x79] sm:$0xff] }
 0x337   : > { %2485 = vst.msk [vmem:[#allocation3 + $0x91] sm:$0xff] %vm279_vm0, %v2381_v40  ;;  %2848 = vrot.lane.b32.xlu0 %v6920_v10, %s5022_s8  ;;  %v4836_v46 = vpop.f32.mrb[12].mxu0 }
 0x338   : > { %v2313_v53 = vmul.f32 %v4836_v46, %v6842_v18  ;;  %v2194_v6 = vpop.f32.mrb[13].mxu0 }
 0x339   : > { %v2312_v32 = vmul.f32 %v6842_v18, %v2194_v6 }
 0x33a   : > { %v2352_v16 = vadd.f32 %v6847_v56, %v2313_v53 }
 0x33b   : > { %v2351_v8 = vadd.f32 %v6847_v56, %v2312_v32 }
 0x33c   : > { %v2384_v15 = vmax.f32 %v2352_v16, 0.0 }
 0x33d   : > { %v2383_v30 = vmax.f32 %v2351_v8, 0.0  ;;  %v2552_v13 = vld [vmem:[#allocation3 + $0x99] sm:$0xff] }
 0x33e   : > { %2488 = vst.msk [vmem:[#allocation3 + $0xb1] sm:$0xff] %vm279_vm0, %v2384_v15  ;;  %2854 = vrot.lane.b32.xlu1 %v2552_v13, %s5022_s8  ;;  %v6931_v62 = vld [vmem:[#allocation3 + $0x91] sm:$0xff] }
 0x33f   : > { %2487 = vst.msk [vmem:[#allocation3 + $0xa9] sm:$0xff] %vm279_vm0, %v2383_v30  ;;  %2852 = vrot.lane.b32.xlu0 %v6931_v62, %s5022_s8  ;;  %v4839_v28 = vpop.f32.mrb[14].mxu0 }
 0x340   : > { %v2315_v21 = vmul.f32 %v4839_v28, %v6842_v18  ;;  %v2204_v7 = vpop.f32.mrb[15].mxu0 }
 0x341   : > { %v2314_v9 = vmul.f32 %v6842_v18, %v2204_v7 }
 0x342   : > { %v2354_v25 = vadd.f32 %v6847_v56, %v2315_v21 }
 0x343   : > { %v2353_v41 = vadd.f32 %v6847_v56, %v2314_v9 }
 0x344   : > { %v2386_v34 = vmax.f32 %v2354_v25, 0.0 }
 0x345   : > { %v2385_v47 = vmax.f32 %v2353_v41, 0.0  ;;  %v2554_v1 = vld [vmem:[#allocation3 + $0xb1] sm:$0xff] }
 0x346   : > { %2490 = vst.msk [vmem:[#allocation3 + $0xc9] sm:$0xff] %vm279_vm0, %v2386_v34  ;;  %2858 = vrot.lane.b32.xlu1 %v2554_v1, %s5022_s8  ;;  %v2553_v37 = vld [vmem:[#allocation3 + $0xa9] sm:$0xff] }
 0x347   : > { %2489 = vst.msk [vmem:[#allocation3 + $0xc1] sm:$0xff] %vm279_vm0, %v2385_v47  ;;  %2856 = vrot.lane.b32.xlu0 %v2553_v37, %s5022_s8  ;;  %v4842_v43 = vpop.f32.mrb[16].mxu0 }
 0x348   : > { %v2317_v51 = vmul.f32 %v4842_v43, %v6842_v18  ;;  %v2214_v3 = vpop.f32.mrb[17].mxu0 }
 0x349   : > { %v2316_v12 = vmul.f32 %v6842_v18, %v2214_v3 }
 0x34a   : > { %v2356_v45 = vadd.f32 %v6847_v56, %v2317_v51 }
 0x34b   : > { %v2355_v17 = vadd.f32 %v6847_v56, %v2316_v12 }
 0x34c   : > { %v2388_v5 = vmax.f32 %v2356_v45, 0.0 }
 0x34d   : > { %v2387_v11 = vmax.f32 %v2355_v17, 0.0  ;;  %v2556_v61 = vld [vmem:[#allocation3 + $0xc9] sm:$0xff] }
 0x34e   : > { %2492 = vst.msk [vmem:[#allocation3 + $0xe1] sm:$0xff] %vm279_vm0, %v2388_v5  ;;  %2862 = vrot.lane.b32.xlu1 %v2556_v61, %s5022_s8  ;;  %v2555_v4 = vld [vmem:[#allocation3 + $0xc1] sm:$0xff] }
 0x34f   : > { %2491 = vst.msk [vmem:[#allocation3 + $0xd9] sm:$0xff] %vm279_vm0, %v2387_v11  ;;  %2860 = vrot.lane.b32.xlu0 %v2555_v4, %s5022_s8  ;;  %v4845_v27 = vpop.f32.mrb[18].mxu0 }
 0x350   : > { %v2319_v26 = vmul.f32 %v4845_v27, %v6842_v18  ;;  %v2224_v20 = vpop.f32.mrb[19].mxu0 }
 0x351   : > { %v2318_v49 = vmul.f32 %v6842_v18, %v2224_v20 }
 0x352   : > { %v2358_v59 = vadd.f32 %v6847_v56, %v2319_v26 }
 0x353   : > { %v2357_v55 = vadd.f32 %v6847_v56, %v2318_v49 }
 0x354   : > { %v2390_v23 = vmax.f32 %v2358_v59, 0.0 }
 0x355   : > { %v2389_v42 = vmax.f32 %v2357_v55, 0.0  ;;  %v2558_v36 = vld [vmem:[#allocation3 + $0xe1] sm:$0xff] }
 0x356   : > { %2494 = vst.msk [vmem:[#allocation3 + $0xf9] sm:$0xff] %vm279_vm0, %v2390_v23  ;;  %2866 = vrot.lane.b32.xlu1 %v2558_v36, %s5022_s8  ;;  %v2557_v31 = vld [vmem:[#allocation3 + $0xd9] sm:$0xff] }
 0x357   : > { %2493 = vst.msk [vmem:[#allocation3 + $0xf1] sm:$0xff] %vm279_vm0, %v2389_v42  ;;  %2864 = vrot.lane.b32.xlu0 %v2557_v31, %s5022_s8  ;;  %v4848_v52 = vpop.f32.mrb[20].mxu0 }
 0x358   : > { %v2321_v29 = vmul.f32 %v4848_v52, %v6842_v18  ;;  %v2234_v48 = vpop.f32.mrb[21].mxu0 }
 0x359   : > { %v2320_v14 = vmul.f32 %v6842_v18, %v2234_v48 }
 0x35a   : > { %v2360_v54 = vadd.f32 %v6847_v56, %v2321_v29 }
 0x35b   : > { %v2359_v22 = vadd.f32 %v6847_v56, %v2320_v14 }
 0x35c   : > { %v2392_v58 = vmax.f32 %v2360_v54, 0.0 }
 0x35d   : > { %v2391_v35 = vmax.f32 %v2359_v22, 0.0  ;;  %v2560_v39 = vld [vmem:[#allocation3 + $0xf9] sm:$0xff] }
 0x35e   : > { %2496 = vst.msk [vmem:[#allocation3 + $0x111] sm:$0xff] %vm279_vm0, %v2392_v58  ;;  %2870 = vrot.lane.b32.xlu1 %v2560_v39, %s5022_s8  ;;  %v2559_v50 = vld [vmem:[#allocation3 + $0xf1] sm:$0xff] }
 0x35f   : > { %2495 = vst.msk [vmem:[#allocation3 + $0x109] sm:$0xff] %vm279_vm0, %v2391_v35  ;;  %2868 = vrot.lane.b32.xlu0 %v2559_v50, %s5022_s8  ;;  %v4851_v63 = vpop.f32.mrb[22].mxu0  ;;  %v2572_v50 = vld [vmem:[#allocation3 + $0xa] sm:$0xff] }
 0x360   : > { %v2323_v40 = vmul.f32 %v4851_v63, %v6842_v18  ;;  %v2244_v46 = vpop.f32.mrb[23].mxu0  ;;  %v2571_v63 = vld [vmem:[#allocation3 + $0x2] sm:$0xff] }
 0x361   : > { %v2322_v53 = vmul.f32 %v6842_v18, %v2244_v46  ;;  %v7022_v46 = vld [vmem:[#allocation3 + $0x32] sm:$0xff] }
 0x362   : > { %v2362_v6 = vadd.f32 %v6847_v56, %v2323_v40  ;;  %v7018_v40 = vld [vmem:[#allocation3 + $0x3a] sm:$0xff] }
 0x363   : > { %v2361_v32 = vadd.f32 %v6847_v56, %v2322_v53  ;;  %v7026_v53 = vld [vmem:[#allocation3 + $0x52] sm:$0xff] }
 0x364   : > { %v2394_v16 = vmax.f32 %v2362_v6, 0.0  ;;  %v7030_v6 = vld [vmem:[#allocation3 + $0x4a] sm:$0xff] }
 0x365   : > { %v2393_v8 = vmax.f32 %v2361_v32, 0.0  ;;  %v2562_v15 = vld [vmem:[#allocation3 + $0x111] sm:$0xff] }
 0x366   : > { %2498 = vst.msk [vmem:[#allocation3 + $0x129] sm:$0xff] %vm279_vm0, %v2394_v16  ;;  %2874 = vrot.lane.b32.xlu1 %v2562_v15, %s5022_s8  ;;  %v2561_v30 = vld [vmem:[#allocation3 + $0x109] sm:$0xff]  ;;  %v7046_v15 = vld [vmem:[#allocation3 + $0x7a] sm:$0xff] }
 0x367   : > { %2497 = vst.msk [vmem:[#allocation3 + $0x121] sm:$0xff] %vm279_vm0, %v2393_v8  ;;  %2872 = vrot.lane.b32.xlu0 %v2561_v30, %s5022_s8  ;;  %v4854_v13 = vpop.f32.mrb[24].mxu0  ;;  %v7034_v32 = vld [vmem:[#allocation3 + $0x6a] sm:$0xff]  ;;  %v7038_v16 = vld [vmem:[#allocation3 + $0x62] sm:$0xff]  ;;  %v7050_v30 = vld [vmem:[#allocation3 + $0x9a] sm:$0xff] }
 0x368   : > { %v2325_v28 = vmul.f32 %v4854_v13, %v6842_v18  ;;  %v2254_v21 = vpop.f32.mrb[25].mxu0  ;;  %v7042_v8 = vld [vmem:[#allocation3 + $0x82] sm:$0xff]  ;;  %v7054_v13 = vld [vmem:[#allocation3 + $0x92] sm:$0xff] }
 0x369   : > { %v2324_v7 = vmul.f32 %v6842_v18, %v2254_v21  ;;  %v7062_v21 = vld [vmem:[#allocation3 + $0xaa] sm:$0xff] }
 0x36a   : > { %v2364_v9 = vadd.f32 %v6847_v56, %v2325_v28  ;;  %v7058_v28 = vld [vmem:[#allocation3 + $0xb2] sm:$0xff] }
 0x36b   : > { %v2363_v25 = vadd.f32 %v6847_v56, %v2324_v7  ;;  %v7066_v7 = vld [vmem:[#allocation3 + $0xca] sm:$0xff] }
 0x36c   : > { %v2396_v41 = vmax.f32 %v2364_v9, 0.0  ;;  %v7070_v9 = vld [vmem:[#allocation3 + $0xc2] sm:$0xff] }
 0x36d   : > { %v2395_v34 = vmax.f32 %v2363_v25, 0.0  ;;  %v2564_v47 = vld [vmem:[#allocation3 + $0x129] sm:$0xff] }
 0x36e   : > { %2500 = vst.msk [vmem:[#allocation3 + $0x141] sm:$0xff] %vm279_vm0, %v2396_v41  ;;  %2878 = vrot.lane.b32.xlu1 %v2564_v47, %s5022_s8  ;;  %v2563_v1 = vld [vmem:[#allocation3 + $0x121] sm:$0xff]  ;;  %v7086_v47 = vld [vmem:[#allocation3 + $0xf2] sm:$0xff] }
 0x36f   : > { %2499 = vst.msk [vmem:[#allocation3 + $0x139] sm:$0xff] %vm279_vm0, %v2395_v34  ;;  %2876 = vrot.lane.b32.xlu0 %v2563_v1, %s5022_s8  ;;  %v4857_v37 = vpop.f32.mrb[26].mxu0  ;;  %v7074_v25 = vld [vmem:[#allocation3 + $0xe2] sm:$0xff]  ;;  %v7078_v41 = vld [vmem:[#allocation3 + $0xda] sm:$0xff]  ;;  %v2594_v1 = vld [vmem:[#allocation3 + $0x112] sm:$0xff] }
 0x370   : > { %v2327_v43 = vmul.f32 %v4857_v37, %v6842_v18  ;;  %v2264_v51 = vpop.f32.mrb[27].mxu0  ;;  %v7082_v34 = vld [vmem:[#allocation3 + $0xfa] sm:$0xff]  ;;  %v2593_v37 = vld [vmem:[#allocation3 + $0x10a] sm:$0xff] }
 0x371   : > { %v2326_v3 = vmul.f32 %v6842_v18, %v2264_v51  ;;  %8627 = vst [vmem:[#allocation5_spill] sm:$0xff] %v7082_v34  ;;  %v7092_v51 = vpop.permute.xlu1 %2830 }
 0x372   : > { %v2366_v12 = vadd.f32 %v6847_v56, %v2327_v43  ;;  %v2596_v43 = vld [vmem:[#allocation3 + $0x12a] sm:$0xff] }
 0x373   : > { %v2365_v45 = vadd.f32 %v6847_v56, %v2326_v3  ;;  %v2595_v3 = vld [vmem:[#allocation3 + $0x122] sm:$0xff] }
 0x374   : > { %v2398_v17 = vmax.f32 %v2366_v12, 0.0  ;;  %v7095_v12 = vpop.permute.xlu0 %2828 }
 0x375   : > { %v2397_v5 = vmax.f32 %v2365_v45, 0.0  ;;  %v2566_v11 = vld [vmem:[#allocation3 + $0x141] sm:$0xff] }
 0x376   : > { %2502 = vst.msk [vmem:[#allocation3 + $0x159] sm:$0xff] %vm279_vm0, %v2398_v17  ;;  %2882 = vrot.lane.b32.xlu1 %v2566_v11, %s5022_s8  ;;  %v2565_v61 = vld [vmem:[#allocation3 + $0x139] sm:$0xff]  ;;  %v2598_v45 = vld [vmem:[#allocation3 + $0x142] sm:$0xff] }
 0x377   : > { %2501 = vst.msk [vmem:[#allocation3 + $0x151] sm:$0xff] %vm279_vm0, %v2397_v5  ;;  %2880 = vrot.lane.b32.xlu0 %v2565_v61, %s5022_s8  ;;  %v4860_v4 = vpop.f32.mrb[28].mxu0  ;;  %v2597_v17 = vld [vmem:[#allocation3 + $0x13a] sm:$0xff] }
 0x378   : > { %v2329_v27 = vmul.f32 %v4860_v4, %v6842_v18  ;;  %v2274_v26 = vpop.f32.mrb[29].mxu0 }
 0x379   : > { %v2328_v20 = vmul.f32 %v6842_v18, %v2274_v26 }
 0x37a   : > { %v2368_v49 = vadd.f32 %v6847_v56, %v2329_v27 }
 0x37b   : > { %v2367_v59 = vadd.f32 %v6847_v56, %v2328_v20 }
 0x37c   : > { %v2400_v55 = vmax.f32 %v2368_v49, 0.0 }
 0x37d   : > { %v2399_v23 = vmax.f32 %v2367_v59, 0.0  ;;  %v2568_v42 = vld [vmem:[#allocation3 + $0x159] sm:$0xff] }
 0x37e   : > { %2504 = vst.msk [vmem:[#allocation3 + $0x171] sm:$0xff] %vm279_vm0, %v2400_v55  ;;  %2886 = vrot.lane.b32.xlu1 %v2568_v42, %s5022_s8  ;;  %v2567_v36 = vld [vmem:[#allocation3 + $0x151] sm:$0xff]  ;;  %v2600_v61 = vld [vmem:[#allocation3 + $0x15a] sm:$0xff] }
 0x37f   : > { %2503 = vst.msk [vmem:[#allocation3 + $0x169] sm:$0xff] %vm279_vm0, %v2399_v23  ;;  %2884 = vrot.lane.b32.xlu0 %v2567_v36, %s5022_s8  ;;  %v4863_v31 = vpop.f32.mrb[30].mxu0  ;;  %v2599_v4 = vld [vmem:[#allocation3 + $0x152] sm:$0xff]  ;;  %v7114_v55 = vld [vmem:[#allocation3 + $0x20] sm:$0xff] }
 0x380   : > { %v2331_v52 = vmul.f32 %v4863_v31, %v6842_v18  ;;  %v2284_v29 = vpop.f32.mrb[31].mxu0  ;;  %v7118_v42 = vld [vmem:[#allocation3 + $0x18] sm:$0xff] }
 0x381   : > { %v2330_v48 = vmul.f32 %v6842_v18, %v2284_v29  ;;  %v7010_v18 = vld [vmem:[#allocation3 + $0x22] sm:$0xff]  ;;  %v7126_v31 = vld [vmem:[#allocation3 + $0x38] sm:$0xff]  ;;  %v7130_v29 = vld [vmem:[#allocation3 + $0x30] sm:$0xff] }
 0x382   : > { %v2370_v14 = vadd.f32 %v6847_v56, %v2331_v52 }
 0x383   : > { %v2369_v54 = vadd.f32 %v6847_v56, %v2330_v48  ;;  %v7014_v56 = vld [vmem:[#allocation3 + $0x1a] sm:$0xff] }
 0x384   : > { %v2402_v22 = vmax.f32 %v2370_v14, 0.0  ;;  %v7138_v14 = vld [vmem:[#allocation3 + $0x50] sm:$0xff] }
 0x385   : > { %v2401_v58 = vmax.f32 %v2369_v54, 0.0  ;;  %v2570_v35 = vld [vmem:[#allocation3 + $0x171] sm:$0xff] }
 0x386   : > { %2506 = vst.msk [vmem:[#allocation3 + $0x189] sm:$0xff] %vm279_vm0, %v2402_v22  ;;  %2890 = vrot.lane.b32.xlu1 %v2570_v35, %s5022_s8  ;;  %v2569_v39 = vld [vmem:[#allocation3 + $0x169] sm:$0xff]  ;;  %v2602_v20 = vld [vmem:[#allocation3 + $0x172] sm:$0xff] }
 0x387   : > { %2505 = vst.msk [vmem:[#allocation3 + $0x181] sm:$0xff] %vm279_vm0, %v2401_v58  ;;  %2888 = vrot.lane.b32.xlu0 %v2569_v39, %s5022_s8  ;;  %v2601_v49 = vld [vmem:[#allocation3 + $0x16a] sm:$0xff] }
 0x388   : > { %v7142_v22 = vld [vmem:[#allocation3 + $0x48] sm:$0xff] }
 0x389   : > { %v7100_v5 = vpop.permute.xlu1 %2834  ;;  %v7150_v35 = vld [vmem:[#allocation3 + $0x68] sm:$0xff] }
 0x38a   : > { %2958 = vrot.lane.b32.xlu1 %v2572_v50, %s5023_s9  ;;  %v7102_v11 = vpop.permute.xlu0 %2832  ;;  %v7154_v50 = vld [vmem:[#allocation3 + $0x60] sm:$0xff] }
 0x38b   : > { %2956 = vrot.lane.b32.xlu0 %v2571_v63, %s5023_s9 }
 0x38e   : > { %2962 = vrot.lane.b32.xlu1 %v7010_v18, %s5023_s9 }
 0x38f   : > { %2960 = vrot.lane.b32.xlu0 %v7014_v56, %s5023_s9 }
 0x390   : > { %v7106_v27 = vpop.permute.xlu1 %2838 }
 0x391   : > { %v7108_v26 = vpop.permute.xlu0 %2836 }
 0x392   : > { %2966 = vrot.lane.b32.xlu1 %v7018_v40, %s5023_s9 }
 0x393   : > { %2964 = vrot.lane.b32.xlu0 %v7022_v46, %s5023_s9 }
 0x396   : > { %2970 = vrot.lane.b32.xlu1 %v7026_v53, %s5023_s9 }
 0x397   : > { %2968 = vrot.lane.b32.xlu0 %v7030_v6, %s5023_s9 }
 0x398   : > { %v7112_v59 = vpop.permute.xlu1 %2842 }
 0x399   : > { %8628 = vst [vmem:[#allocation4_spill] sm:$0xff] %v7112_v59  ;;  %v7116_v23 = vpop.permute.xlu0 %2840  ;;  %v4078_v59 = vld [vmem:[%s8232_s4 + $0x10] sm:$0xff] }
 0x39a   : > { %2974 = vrot.lane.b32.xlu1 %v7034_v32, %s5023_s9 }
 0x39b   : > { %2972 = vrot.lane.b32.xlu0 %v7038_v16, %s5023_s9 }
 0x39e   : > { %2978 = vrot.lane.b32.xlu1 %v7042_v8, %s5023_s9 }
 0x39f   : > { %2976 = vrot.lane.b32.xlu0 %v7046_v15, %s5023_s9 }
 0x3a0   : > { %v7124_v36 = vpop.permute.xlu1 %2846 }
 0x3a1   : > { %8629 = vst [vmem:[#allocation68_spill] sm:$0xff] %v7124_v36  ;;  %v7128_v52 = vpop.permute.xlu0 %2844 }
 0x3a2   : > { %2982 = vrot.lane.b32.xlu1 %v7050_v30, %s5023_s9  ;;  %8630 = vst [vmem:[#allocation7_spill] sm:$0xff] %v7128_v52  ;;  %v7232_v52 = vld [vmem:[#allocation3 + $0xf0] sm:$0xff] }
 0x3a3   : > { %2980 = vrot.lane.b32.xlu0 %v7054_v13, %s5023_s9 }
 0x3a6   : > { %2986 = vrot.lane.b32.xlu1 %v7058_v28, %s5023_s9 }
 0x3a7   : > { %2984 = vrot.lane.b32.xlu0 %v7062_v21, %s5023_s9 }
 0x3a8   : > { %v7136_v48 = vpop.permute.xlu1 %2850 }
 0x3a9   : > { %8631 = vst [vmem:[#allocation13_spill] sm:$0xff] %v7136_v48  ;;  %v7140_v54 = vpop.permute.xlu0 %2848  ;;  %v7214_v48 = vld [vmem:[#allocation3 + $0xd8] sm:$0xff] }
 0x3aa   : > { %2990 = vrot.lane.b32.xlu1 %v7066_v7, %s5023_s9  ;;  %8632 = vst [vmem:[#allocation63_spill] sm:$0xff] %v7140_v54 }
 0x3ab   : > { %2988 = vrot.lane.b32.xlu0 %v7070_v9, %s5023_s9 }
 0x3ae   : > { %2994 = vrot.lane.b32.xlu1 %v7074_v25, %s5023_s9 }
 0x3af   : > { %2992 = vrot.lane.b32.xlu0 %v7078_v41, %s5023_s9 }
 0x3b0   : > { %v7148_v58 = vpop.permute.xlu1 %2854 }
 0x3b1   : > { %8633 = vst [vmem:[#allocation67_spill] sm:$0xff] %v7148_v58  ;;  %v7152_v39 = vpop.permute.xlu0 %2852  ;;  %v7202_v58 = vld [vmem:[#allocation3 + $0xc0] sm:$0xff] }
 0x3b2   : > { %2998 = vrot.lane.b32.xlu1 %v7082_v34, %s5023_s9  ;;  %8634 = vst [vmem:[#allocation11_spill] sm:$0xff] %v7152_v39  ;;  %v4081_v34 = vld [vmem:[%s8232_s4 + $0x28] sm:$0xff] }
 0x3b3   : > { %2996 = vrot.lane.b32.xlu0 %v7086_v47, %s5023_s9 }
 0x3b6   : > { %3002 = vrot.lane.b32.xlu1 %v2594_v1, %s5023_s9  ;;  %v7162_v1 = vld [vmem:[#allocation3 + $0x80] sm:$0xff] }
 0x3b7   : > { %3000 = vrot.lane.b32.xlu0 %v2593_v37, %s5023_s9  ;;  %8636 = vst [vmem:[#allocation9_spill] sm:$0xff] %v7162_v1 }
 0x3b8   : > { %v7160_v63 = vpop.permute.xlu1 %2858 }
 0x3b9   : > { %8635 = vst [vmem:[#allocation71_spill] sm:$0xff] %v7160_v63  ;;  %v7164_v37 = vpop.permute.xlu0 %2856  ;;  %v7190_v63 = vld [vmem:[#allocation3 + $0xa8] sm:$0xff] }
 0x3ba   : > { %3006 = vrot.lane.b32.xlu1 %v2596_v43, %s5023_s9  ;;  %8637 = vst [vmem:[#allocation70_spill] sm:$0xff] %v7164_v37  ;;  %v7166_v43 = vld [vmem:[#allocation3 + $0x78] sm:$0xff]  ;;  %8645 = vst [vmem:[#allocation21_spill] sm:$0xff] %v7190_v63 }
 0x3bb   : > { %3004 = vrot.lane.b32.xlu0 %v2595_v3, %s5023_s9 }
 0x3be   : > { %3010 = vrot.lane.b32.xlu1 %v2598_v45, %s5023_s9  ;;  %v7174_v45 = vld [vmem:[#allocation3 + $0x98] sm:$0xff] }
 0x3bf   : > { %3008 = vrot.lane.b32.xlu0 %v2597_v17, %s5023_s9  ;;  %8639 = vst [vmem:[#allocation73_spill] sm:$0xff] %v7174_v45 }
 0x3c0   : > { %v7172_v3 = vpop.permute.xlu1 %2862 }
 0x3c1   : > { %8638 = vst [vmem:[#allocation15_spill] sm:$0xff] %v7172_v3  ;;  %v7176_v17 = vpop.permute.xlu0 %2860 }
 0x3c2   : > { %3014 = vrot.lane.b32.xlu1 %v2600_v61, %s5023_s9  ;;  %8640 = vst [vmem:[#allocation12_spill] sm:$0xff] %v7176_v17  ;;  %v7178_v61 = vld [vmem:[#allocation3 + $0x90] sm:$0xff]  ;;  %v7198_v17 = vld [vmem:[#allocation3 + $0xc8] sm:$0xff] }
 0x3c3   : > { %3012 = vrot.lane.b32.xlu0 %v2599_v4, %s5023_s9  ;;  %8641 = vst [vmem:[#allocation72_spill] sm:$0xff] %v7178_v61 }
 0x3c6   : > { %3018 = vrot.lane.b32.xlu1 %v2602_v20, %s5023_s9  ;;  %v7186_v20 = vld [vmem:[#allocation3 + $0xb0] sm:$0xff] }
 0x3c7   : > { %3016 = vrot.lane.b32.xlu0 %v2601_v49, %s5023_s9  ;;  %8643 = vst [vmem:[#allocation16_spill] sm:$0xff] %v7186_v20 }
 0x3c8   : > { %v7184_v4 = vpop.permute.xlu1 %2866 }
 0x3c9   : > { %8642 = vst [vmem:[#allocation18_spill] sm:$0xff] %v7184_v4  ;;  %v7188_v49 = vpop.permute.xlu0 %2864 }
 0x3ca   : > { %3086 = vrot.lane.b32.xlu1 %v7114_v55, %s5024_s10  ;;  %8644 = vst [vmem:[#allocation74_spill] sm:$0xff] %v7188_v49  ;;  %v7210_v49 = vld [vmem:[#allocation3 + $0xe0] sm:$0xff] }
 0x3cb   : > { %3084 = vrot.lane.b32.xlu0 %v7118_v42, %s5024_s10 }
 0x3ce   : > { %3090 = vrot.lane.b32.xlu1 %v7126_v31, %s5024_s10 }
 0x3cf   : > { %3088 = vrot.lane.b32.xlu0 %v7130_v29, %s5024_s10 }
 0x3d0   : > { %v7196_v3 = vpop.permute.xlu1 %2870 }
 0x3d1   : > { %8646 = vst [vmem:[#allocation19_spill] sm:$0xff] %v7196_v3  ;;  %v7200_v37 = vpop.permute.xlu0 %2868  ;;  %v4076_v3 = vld [vmem:[%s8232_s4] sm:$0xff] }
 0x3d2   : > { %3094 = vrot.lane.b32.xlu1 %v7138_v14, %s5024_s10  ;;  %8647 = vst [vmem:[#allocation25_spill] sm:$0xff] %v7200_v37 }
 0x3d3   : > { %3092 = vrot.lane.b32.xlu0 %v7142_v22, %s5024_s10 }
 0x3d6   : > { %3098 = vrot.lane.b32.xlu1 %v7150_v35, %s5024_s10 }
 0x3d7   : > { %3096 = vrot.lane.b32.xlu0 %v7154_v50, %s5024_s10 }
 0x3d8   : > { %v7208_v4 = vpop.permute.xlu1 %2874 }
 0x3d9   : > { %8648 = vst [vmem:[#allocation76_spill] sm:$0xff] %v7208_v4  ;;  %v7212_v39 = vpop.permute.xlu0 %2872  ;;  %v4077_v4 = vld [vmem:[%s8232_s4 + $0x8] sm:$0xff] }
 0x3da   : > { %3102 = vrot.lane.b32.xlu1 %v7162_v1, %s5024_s10  ;;  %8649 = vst [vmem:[#allocation23_spill] sm:$0xff] %v7212_v39  ;;  %v4946_v54 = vpack.c.bf16 %v4077_v4, %v4076_v3  ;;  %v7228_v39 = vld [vmem:[#allocation3 + $0xf8] sm:$0xff]  ;;  %v4079_v3 = vld [vmem:[%s8232_s4 + $0x18] sm:$0xff] }
 0x3db   : > { %3100 = vrot.lane.b32.xlu0 %v7166_v43, %s5024_s10 }
 0x3dc   : > { %4947 = vmatprep.subr.bf16.mxu1 %v4946_v54 }
 0x3dd   : > { %4949 = vmatpush3.bf16.msra.mxu1 %v4946_v54  ;;  %v4080_v54 = vld [vmem:[%s8232_s4 + $0x20] sm:$0xff] }
 0x3de   : > { %3106 = vrot.lane.b32.xlu1 %v7174_v45, %s5024_s10 }
 0x3df   : > { %3104 = vrot.lane.b32.xlu0 %v7178_v61, %s5024_s10 }
 0x3e0   : > { %v7226_v37 = vpop.permute.xlu1 %2878 }
 0x3e1   : > { %8650 = vst [vmem:[#allocation97_spill] sm:$0xff] %v7226_v37  ;;  %v7230_v36 = vpop.permute.xlu0 %2876  ;;  %v4950_v37 = vpack.c.bf16 %v4079_v3, %v4078_v59  ;;  %v4954_v59 = vpack.c.bf16 %v4081_v34, %v4080_v54 }
 0x3e2   : > { %3110 = vrot.lane.b32.xlu1 %v7186_v20, %s5024_s10  ;;  %8651 = vst [vmem:[#allocation75_spill] sm:$0xff] %v7230_v36 }
 0x3e3   : > { %3108 = vrot.lane.b32.xlu0 %v7190_v63, %s5024_s10  ;;  %4951 = vmatprep.subr.bf16.mxu1 %v4950_v37 }
 0x3e4   : > { %4953 = vmatpush3.bf16.msra.mxu1 %v4950_v37 }
 0x3e5   : > { %4955 = vmatprep.subr.bf16.mxu1 %v4954_v59 }
 0x3e6   : > { %3114 = vrot.lane.b32.xlu1 %v7198_v17, %s5024_s10 }
 0x3e7   : > { %3112 = vrot.lane.b32.xlu0 %v7202_v58, %s5024_s10 }
 0x3e8   : > { %v7244_v4 = vpop.permute.xlu1 %2882  ;;  %4957 = vmatpush3.bf16.msra.mxu1 %v4954_v59  ;;  %v4084_v59 = vld [vmem:[%s8232_s4 + $0x40] sm:$0xff] }
 0x3e9   : > { %8652 = vst [vmem:[#allocation8_spill] sm:$0xff] %v7244_v4  ;;  %v7246_v36 = vpop.permute.xlu0 %2880 }
 0x3ea   : > { %3118 = vrot.lane.b32.xlu1 %v7210_v49, %s5024_s10  ;;  %8653 = vst [vmem:[#allocation96_spill] sm:$0xff] %v7246_v36 }
 0x3eb   : > { %3116 = vrot.lane.b32.xlu0 %v7214_v48, %s5024_s10 }
 0x3ee   : > { %3122 = vrot.lane.b32.xlu1 %v7228_v39, %s5024_s10 }
 0x3ef   : > { %3120 = vrot.lane.b32.xlu0 %v7232_v52, %s5024_s10 }
 0x3f0   : > { %v7258_v4 = vpop.permute.xlu1 %2886 }
 0x3f1   : > { %8654 = vst [vmem:[#allocation54_spill] sm:$0xff] %v7258_v4  ;;  %v7260_v3 = vpop.permute.xlu0 %2884 }
 0x3f2   : > { %3214 = vrot.lane.b32.xlu1 %v6860_v33, %s5025_s11  ;;  %8655 = vst [vmem:[#allocation6_spill] sm:$0xff] %v7260_v3  ;;  %v4082_v33 = vld [vmem:[%s8232_s4 + $0x30] sm:$0xff] }
 0x3f3   : > { %3212 = vrot.lane.b32.xlu0 %v6865_v19, %s5025_s11  ;;  %v4083_v19 = vld [vmem:[%s8232_s4 + $0x38] sm:$0xff] }
 0x3f4   : > { %v4958_v34 = vpack.c.bf16 %v4083_v19, %v4082_v33 }
 0x3f6   : > { %3342 = vrot.lane.b32.xlu1 %v7010_v18, %s5026_s12  ;;  %4959 = vmatprep.subr.bf16.mxu1 %v4958_v34 }
 0x3f7   : > { %3340 = vrot.lane.b32.xlu0 %v7014_v56, %s5026_s12  ;;  %4961 = vmatpush3.bf16.msra.mxu1 %v4958_v34 }
 0x3f8   : > { %v7272_v37 = vpop.permute.xlu1 %2890  ;;  %4880 = vmatprep.subr.mxu1 %v4084_v59 }
 0x3f9   : > { %8656 = vst [vmem:[#allocation130_spill] sm:$0xff] %v7272_v37  ;;  %v7274_v54 = vpop.permute.xlu0 %2888 }
 0x3fa   : > { %8657 = vst [vmem:[#allocation52_spill] sm:$0xff] %v7274_v54  ;;  %3470 = vrot.lane.b32.xlu1 %v7126_v31, %s5027_s13 }
 0x3fb   : > { %3468 = vrot.lane.b32.xlu0 %v7130_v29, %s5027_s13  ;;  %4881 = vmatpush3.msra.mxu1 %v4084_v59 }
 0x3fc   : > { %v7280_v18 = vpop.permute.xlu1 %2958 }
 0x3fd   : > { %v7282_v56 = vpop.permute.xlu0 %2956 }
 0x3fe   : > { %3216 = vrot.lane.b32.xlu1 %v6878_v60, %s5025_s11 }
 0x3ff   : > { %3596 = vrot.lane.b32.xlu0 %v6878_v60, %s5028_s19 }
 0x400   : > { %v7291_v33 = vpop.permute.xlu1 %2962 }
 0x401   : > { %v7293_v19 = vpop.permute.xlu0 %2960 }
 0x402   : > { %3724 = vrot.lane.b32.xlu1 %v7022_v46, %s5029_s20 }
 0x403   : > { %3598 = vrot.lane.b32.xlu0 %v6873_v38, %s5028_s19 }
 0x404   : > { %v7299_v34 = vpop.permute.xlu1 %2966 }
 0x405   : > { %v7301_v37 = vpop.permute.xlu0 %2964 }
 0x406   : > { %3344 = vrot.lane.b32.xlu1 %v7022_v46, %s5026_s12 }
 0x407   : > { %3218 = vrot.lane.b32.xlu0 %v6873_v38, %s5025_s11 }
 0x408   : > { %v7307_v60 = vpop.permute.xlu1 %2970 }
 0x409   : > { %v7309_v59 = vpop.permute.xlu0 %2968 }
 0x40a   : > { %3346 = vrot.lane.b32.xlu1 %v7018_v40, %s5026_s12 }
 0x40b   : > { %3726 = vrot.lane.b32.xlu0 %v7018_v40, %s5029_s20 }
 0x40c   : > { %v7315_v54 = vpop.permute.xlu1 %2974 }
 0x40d   : > { %v7317_v4 = vpop.permute.xlu0 %2972 }
 0x40e   : > { %3474 = vrot.lane.b32.xlu1 %v7138_v14, %s5027_s13 }
 0x40f   : > { %3472 = vrot.lane.b32.xlu0 %v7142_v22, %s5027_s13 }
 0x410   : > { %v7323_v38 = vpop.permute.xlu1 %2978 }
 0x411   : > { %8658 = vst [vmem:[#allocation129_spill] sm:$0xff] %v7323_v38  ;;  %v7325_v46 = vpop.permute.xlu0 %2976 }
 0x412   : > { %3220 = vrot.lane.b32.xlu1 %v6892_v2, %s5025_s11 }
 0x413   : > { %3600 = vrot.lane.b32.xlu0 %v6892_v2, %s5028_s19 }
 0x414   : > { %v7331_v40 = vpop.permute.xlu1 %2982 }
 0x415   : > { %8659 = vst [vmem:[#allocation29_spill] sm:$0xff] %v7331_v40  ;;  %v7333_v3 = vpop.permute.xlu0 %2980 }
 0x416   : > { %8660 = vst [vmem:[#allocation78_spill] sm:$0xff] %v7333_v3  ;;  %3728 = vrot.lane.b32.xlu1 %v7030_v6, %s5029_s20 }
 0x417   : > { %3602 = vrot.lane.b32.xlu0 %v6887_v0, %s5028_s19 }
 0x418   : > { %v7339_v36 = vpop.permute.xlu1 %2986 }
 0x419   : > { %8661 = vst [vmem:[#allocation27_spill] sm:$0xff] %v7339_v36  ;;  %v7341_v38 = vpop.permute.xlu0 %2984 }
 0x41a   : > { %8662 = vst [vmem:[#allocation99_spill] sm:$0xff] %v7341_v38  ;;  %3348 = vrot.lane.b32.xlu1 %v7030_v6, %s5026_s12 }
 0x41b   : > { %3222 = vrot.lane.b32.xlu0 %v6887_v0, %s5025_s11 }
 0x41c   : > { %v7347_v2 = vpop.permute.xlu1 %2990 }
 0x41d   : > { %8663 = vst [vmem:[#allocation77_spill] sm:$0xff] %v7347_v2  ;;  %v7349_v40 = vpop.permute.xlu0 %2988 }
 0x41e   : > { %8664 = vst [vmem:[#allocation14_spill] sm:$0xff] %v7349_v40  ;;  %3350 = vrot.lane.b32.xlu1 %v7026_v53, %s5026_s12 }
 0x41f   : > { %3730 = vrot.lane.b32.xlu0 %v7026_v53, %s5029_s20 }
 0x420   : > { %v7355_v3 = vpop.permute.xlu1 %2994 }
 0x421   : > { %8665 = vst [vmem:[#allocation98_spill] sm:$0xff] %v7355_v3  ;;  %v7357_v36 = vpop.permute.xlu0 %2992 }
 0x422   : > { %8666 = vst [vmem:[#allocation58_spill] sm:$0xff] %v7357_v36  ;;  %3478 = vrot.lane.b32.xlu1 %v7150_v35, %s5027_s13 }
 0x423   : > { %3476 = vrot.lane.b32.xlu0 %v7154_v50, %s5027_s13 }
 0x424   : > { %v7363_v0 = vpop.permute.xlu1 %2998 }
 0x425   : > { %8667 = vst [vmem:[#allocation10_spill] sm:$0xff] %v7363_v0  ;;  %v7365_v6 = vpop.permute.xlu0 %2996 }
 0x426   : > { %8668 = vst [vmem:[#allocation132_spill] sm:$0xff] %v7365_v6  ;;  %3224 = vrot.lane.b32.xlu1 %v6906_v57, %s5025_s11  ;;  %v2741_v6 = vld [vmem:[#allocation3 + $0x99] sm:$0xff] }
 0x427   : > { %3604 = vrot.lane.b32.xlu0 %v6906_v57, %s5028_s19 }
 0x428   : > { %v7371_v53 = vpop.permute.xlu1 %3002 }
 0x429   : > { %8669 = vst [vmem:[#allocation56_spill] sm:$0xff] %v7371_v53  ;;  %v7373_v3 = vpop.permute.xlu0 %3000 }
 0x42a   : > { %8670 = vst [vmem:[#allocation131_spill] sm:$0xff] %v7373_v3  ;;  %3732 = vrot.lane.b32.xlu1 %v7038_v16, %s5029_s20 }
 0x42b   : > { %3606 = vrot.lane.b32.xlu0 %v6901_v44, %s5028_s19 }
 0x42c   : > { %v7379_v36 = vpop.permute.xlu1 %3006 }
 0x42d   : > { %8671 = vst [vmem:[#allocation33_spill] sm:$0xff] %v7379_v36  ;;  %v7381_v0 = vpop.permute.xlu0 %3004 }
 0x42e   : > { %8672 = vst [vmem:[#allocation80_spill] sm:$0xff] %v7381_v0  ;;  %3352 = vrot.lane.b32.xlu1 %v7038_v16, %s5026_s12 }
 0x42f   : > { %3226 = vrot.lane.b32.xlu0 %v6901_v44, %s5025_s11 }
 0x430   : > { %v7387_v57 = vpop.permute.xlu1 %3010 }
 0x431   : > { %8673 = vst [vmem:[#allocation31_spill] sm:$0xff] %v7387_v57  ;;  %v7389_v53 = vpop.permute.xlu0 %3008 }
 0x432   : > { %8674 = vst [vmem:[#allocation101_spill] sm:$0xff] %v7389_v53  ;;  %3354 = vrot.lane.b32.xlu1 %v7034_v32, %s5026_s12 }
 0x433   : > { %3734 = vrot.lane.b32.xlu0 %v7034_v32, %s5029_s20 }
 0x434   : > { %v7395_v3 = vpop.permute.xlu1 %3014 }
 0x435   : > { %8675 = vst [vmem:[#allocation79_spill] sm:$0xff] %v7395_v3  ;;  %v7397_v36 = vpop.permute.xlu0 %3012 }
 0x436   : > { %8676 = vst [vmem:[#allocation20_spill] sm:$0xff] %v7397_v36  ;;  %3482 = vrot.lane.b32.xlu1 %v7162_v1, %s5027_s13 }
 0x437   : > { %3480 = vrot.lane.b32.xlu0 %v7166_v43, %s5027_s13 }
 0x438   : > { %v7403_v44 = vpop.permute.xlu1 %3018 }
 0x439   : > { %8677 = vst [vmem:[#allocation100_spill] sm:$0xff] %v7403_v44  ;;  %v7405_v16 = vpop.permute.xlu0 %3016 }
 0x43a   : > { %8678 = vst [vmem:[#allocation62_spill] sm:$0xff] %v7405_v16  ;;  %3228 = vrot.lane.b32.xlu1 %v6920_v10, %s5025_s11 }
 0x43b   : > { %3608 = vrot.lane.b32.xlu0 %v6920_v10, %s5028_s19 }
 0x43c   : > { %v7411_v32 = vpop.permute.xlu1 %3086 }
 0x43d   : > { %v3085_v3 = vpop.permute.xlu0 %3084 }
 0x43e   : > { %3736 = vrot.lane.b32.xlu1 %v7046_v15, %s5029_s20 }
 0x43f   : > { %3610 = vrot.lane.b32.xlu0 %v6915_v24, %s5028_s19 }
 0x440   : > { %v7417_v36 = vpop.permute.xlu1 %3090 }
 0x441   : > { %v7419_v44 = vpop.permute.xlu0 %3088 }
 0x442   : > { %3356 = vrot.lane.b32.xlu1 %v7046_v15, %s5026_s12 }
 0x443   : > { %3230 = vrot.lane.b32.xlu0 %v6915_v24, %s5025_s11 }
 0x444   : > { %v7425_v10 = vpop.permute.xlu1 %3094 }
 0x445   : > { %v7427_v16 = vpop.permute.xlu0 %3092 }
 0x446   : > { %3358 = vrot.lane.b32.xlu1 %v7042_v8, %s5026_s12 }
 0x447   : > { %3738 = vrot.lane.b32.xlu0 %v7042_v8, %s5029_s20 }
 0x448   : > { %v7433_v57 = vpop.permute.xlu1 %3098 }
 0x449   : > { %v7435_v53 = vpop.permute.xlu0 %3096 }
 0x44a   : > { %3486 = vrot.lane.b32.xlu1 %v7174_v45, %s5027_s13 }
 0x44b   : > { %3484 = vrot.lane.b32.xlu0 %v7178_v61, %s5027_s13 }
 0x44c   : > { %v7441_v24 = vpop.permute.xlu1 %3102 }
 0x44d   : > { %v7443_v15 = vpop.permute.xlu0 %3100 }
 0x44e   : > { %3232 = vrot.lane.b32.xlu1 %v6931_v62, %s5025_s11 }
 0x44f   : > { %3612 = vrot.lane.b32.xlu0 %v6931_v62, %s5028_s19 }
 0x450   : > { %v7449_v8 = vpop.permute.xlu1 %3106 }
 0x451   : > { %8679 = vst [vmem:[#allocation17_spill] sm:$0xff] %v7449_v8  ;;  %v7451_v0 = vpop.permute.xlu0 %3104 }
 0x452   : > { %3740 = vrot.lane.b32.xlu1 %v7054_v13, %s5029_s20 }
 0x453   : > { %3614 = vrot.lane.b32.xlu0 %v2741_v6, %s5028_s19 }
 0x454   : > { %v7456_v2 = vpop.permute.xlu1 %3110 }
 0x455   : > { %8680 = vst [vmem:[#allocation134_spill] sm:$0xff] %v7456_v2  ;;  %v7458_v40 = vpop.permute.xlu0 %3108 }
 0x456   : > { %8681 = vst [vmem:[#allocation60_spill] sm:$0xff] %v7458_v40  ;;  %3360 = vrot.lane.b32.xlu1 %v7054_v13, %s5026_s12 }
 0x457   : > { %3234 = vrot.lane.b32.xlu0 %v2741_v6, %s5025_s11 }
 0x458   : > { %v7463_v62 = vpop.permute.xlu1 %3114 }
 0x459   : > { %8682 = vst [vmem:[#allocation133_spill] sm:$0xff] %v7463_v62  ;;  %v7465_v38 = vpop.permute.xlu0 %3112  ;;  %v2647_v62 = vld [vmem:[#allocation3 + $0xa9] sm:$0xff] }
 0x45a   : > { %8683 = vst [vmem:[#allocation37_spill] sm:$0xff] %v7465_v38  ;;  %3362 = vrot.lane.b32.xlu1 %v7050_v30, %s5026_s12 }
 0x45b   : > { %3742 = vrot.lane.b32.xlu0 %v7050_v30, %s5029_s20 }
 0x45c   : > { %v7471_v45 = vpop.permute.xlu1 %3118 }
 0x45d   : > { %8684 = vst [vmem:[#allocation82_spill] sm:$0xff] %v7471_v45  ;;  %v7473_v2 = vpop.permute.xlu0 %3116  ;;  %v2743_v45 = vld [vmem:[#allocation3 + $0xb1] sm:$0xff] }
 0x45e   : > { %8685 = vst [vmem:[#allocation35_spill] sm:$0xff] %v7473_v2  ;;  %3490 = vrot.lane.b32.xlu1 %v7186_v20, %s5027_s13 }
 0x45f   : > { %3488 = vrot.lane.b32.xlu0 %v7190_v63, %s5027_s13 }
 0x460   : > { %v7479_v13 = vpop.permute.xlu1 %3122 }
 0x461   : > { %8686 = vst [vmem:[#allocation103_spill] sm:$0xff] %v7479_v13  ;;  %v7481_v6 = vpop.permute.xlu0 %3120  ;;  %v2507_v13 = vld [vmem:[#allocation3] sm:$0xff] }
 0x462   : > { %8687 = vst [vmem:[#allocation81_spill] sm:$0xff] %v7481_v6  ;;  %3236 = vrot.lane.b32.xlu1 %v2647_v62, %s5025_s11 }
 0x463   : > { %3616 = vrot.lane.b32.xlu0 %v2647_v62, %s5028_s19  ;;  %v3820_v62 = vsel %vm279_vm0, %v2507_v13, %v7095_v12 }
 0x464   : > { %v3215_v30 = vpop.permute.xlu1 %3214  ;;  %v3852_v40 = vsel %vm1731_vm3, %v3820_v62, %v7282_v56  ;;  %v2508_v56 = vld [vmem:[#allocation3 + $0x8] sm:$0xff] }
 0x465   : > { %v3213_v38 = vpop.permute.xlu0 %3212  ;;  %v3884_v61 = vsel %vm1764_vm4, %v3852_v40, %v3085_v3  ;;  %v2649_v3 = vld [vmem:[#allocation3 + $0xc1] sm:$0xff] }
 0x466   : > { %3744 = vrot.lane.b32.xlu1 %v7062_v21, %s5029_s20  ;;  %v3916_v8 = vsel %vm1797_vm5, %v3884_v61, %v3213_v38 }
 0x467   : > { %3618 = vrot.lane.b32.xlu0 %v2743_v45, %s5028_s19 }
 0x468   : > { %v3343_v2 = vpop.permute.xlu1 %3342 }
 0x469   : > { %v3341_v20 = vpop.permute.xlu0 %3340 }
 0x46a   : > { %3364 = vrot.lane.b32.xlu1 %v7062_v21, %s5026_s12  ;;  %v3948_v1 = vsel %vm1830_vm6, %v3916_v8, %v3341_v20  ;;  %v2745_v8 = vld [vmem:[#allocation3 + $0xc9] sm:$0xff] }
 0x46b   : > { %3238 = vrot.lane.b32.xlu0 %v2743_v45, %s5025_s11 }
 0x46c   : > { %v3471_v6 = vpop.permute.xlu1 %3470 }
 0x46d   : > { %v3469_v63 = vpop.permute.xlu0 %3468 }
 0x46e   : > { %3366 = vrot.lane.b32.xlu1 %v7058_v28, %s5026_s12  ;;  %v3980_v12 = vsel %vm1863_vm7, %v3948_v1, %v3469_v63 }
 0x46f   : > { %3746 = vrot.lane.b32.xlu0 %v7058_v28, %s5029_s20 }
 0x470   : > { %v3217_v21 = vpop.permute.xlu1 %3216 }
 0x471   : > { %v3597_v45 = vpop.permute.xlu0 %3596 }
 0x472   : > { %3494 = vrot.lane.b32.xlu1 %v7198_v17, %s5027_s13  ;;  %v4012_v13 = vsel %vm1896_vm8, %v3980_v12, %v3597_v45  ;;  %v3821_v17 = vsel %vm279_vm0, %v2508_v56, %v7092_v51 }
 0x473   : > { %3492 = vrot.lane.b32.xlu0 %v7202_v58, %s5027_s13  ;;  %v3853_v63 = vsel %vm1731_vm3, %v3821_v17, %v7280_v18  ;;  %v2651_v17 = vld [vmem:[#allocation3 + $0xd9] sm:$0xff] }
 0x474   : > { %v3725_v28 = vpop.permute.xlu1 %3724  ;;  %v3885_v61 = vsel %vm1764_vm4, %v3853_v63, %v7411_v32 }
 0x475   : > { %v3599_v62 = vpop.permute.xlu0 %3598  ;;  %v4044_v40 = vsel %vm1929_vm9, %v4012_v13, %v3725_v28  ;;  %v3917_v38 = vsel %vm1797_vm5, %v3885_v61, %v3215_v30 }
 0x476   : > { %3240 = vrot.lane.b32.xlu1 %v2649_v3, %s5025_s11  ;;  %4882 = vmatprep.mubr.msk.f32.mxu1 %vm1971_vm10, %v4044_v40  ;;  %v3949_v45 = vsel %vm1830_vm6, %v3917_v38, %v3343_v2  ;;  %v3822_v2 = vsel %vm279_vm0, %v7118_v42, %v7102_v11  ;;  %v2747_v38 = vld [vmem:[#allocation3 + $0xe1] sm:$0xff] }
 0x477   : > { %3620 = vrot.lane.b32.xlu0 %v2649_v3, %s5028_s19  ;;  %v3981_v51 = vsel %vm1863_vm7, %v3949_v45, %v3471_v6  ;;  %v3854_v6 = vsel %vm1731_vm3, %v3822_v2, %v7293_v19  ;;  %v2653_v2 = vld [vmem:[#allocation3 + $0xf1] sm:$0xff] }
 0x478   : > { %v3345_v1 = vpop.permute.xlu1 %3344  ;;  %v4013_v18 = vsel %vm1896_vm8, %v3981_v51, %v3599_v62 }
 0x479   : > { %v3219_v20 = vpop.permute.xlu0 %3218 }
 0x47a   : > { %3748 = vrot.lane.b32.xlu1 %v7070_v9, %s5029_s20 }
 0x47b   : > { %3622 = vrot.lane.b32.xlu0 %v2745_v8, %s5028_s19 }
 0x47c   : > { %v3347_v12 = vpop.permute.xlu1 %3346 }
 0x47d   : > { %v3727_v56 = vpop.permute.xlu0 %3726 }
 0x47e   : > { %v4045_v13 = vsel %vm1929_vm9, %v4013_v18, %v3727_v56  ;;  %3368 = vrot.lane.b32.xlu1 %v7070_v9, %s5026_s12  ;;  %v3886_v9 = vsel %vm1764_vm4, %v3854_v6, %v7419_v44 }
 0x47f   : > { %3242 = vrot.lane.b32.xlu0 %v2745_v8, %s5025_s11  ;;  %4883 = vmatmul.mubr.msk.f32.vlgmr.msra.gmra.mrb[0].mxu1 %vm1971_vm10, %v4045_v13  ;;  %v3918_v62 = vsel %vm1797_vm5, %v3886_v9, %v3217_v21 }
 0x480   : > { %v3475_v32 = vpop.permute.xlu1 %3474  ;;  %v3950_v40 = vsel %vm1830_vm6, %v3918_v62, %v3345_v1 }
 0x481   : > { %v3473_v30 = vpop.permute.xlu0 %3472 }
 0x482   : > { %3370 = vrot.lane.b32.xlu1 %v7066_v7, %s5026_s12  ;;  %v3982_v11 = vsel %vm1863_vm7, %v3950_v40, %v3473_v30 }
 0x483   : > { %3750 = vrot.lane.b32.xlu0 %v7066_v7, %s5029_s20 }
 0x484   : > { %v3221_v28 = vpop.permute.xlu1 %3220 }
 0x485   : > { %v3601_v3 = vpop.permute.xlu0 %3600 }
 0x486   : > { %3498 = vrot.lane.b32.xlu1 %v7210_v49, %s5027_s13  ;;  %v4014_v42 = vsel %vm1896_vm8, %v3982_v11, %v3601_v3  ;;  %v3823_v49 = vsel %vm279_vm0, %v7114_v55, %v7100_v5  ;;  %v2749_v3 = vld [vmem:[#allocation3 + $0xf9] sm:$0xff] }
 0x487   : > { %3496 = vrot.lane.b32.xlu0 %v7214_v48, %s5027_s13  ;;  %v3855_v48 = vsel %vm1731_vm3, %v3823_v49, %v7291_v33 }
 0x488   : > { %v3729_v7 = vpop.permute.xlu1 %3728  ;;  %v3887_v63 = vsel %vm1764_vm4, %v3855_v48, %v7417_v36  ;;  %v7625_v48 = vld [vmem:[#allocation3 + $0x108] sm:$0xff] }
 0x489   : > { %v4046_v19 = vsel %vm1929_vm9, %v4014_v42, %v3729_v7  ;;  %v3603_v44 = vpop.permute.xlu0 %3602  ;;  %v3919_v61 = vsel %vm1797_vm5, %v3887_v63, %v3219_v20 }
 0x48a   : > { %3244 = vrot.lane.b32.xlu1 %v2651_v17, %s5025_s11  ;;  %4885 = vmatprep.mubr.msk.f32.mxu1 %vm1971_vm10, %v4046_v19  ;;  %v3951_v8 = vsel %vm1830_vm6, %v3919_v61, %v3347_v12  ;;  %v3824_v12 = vsel %vm279_vm0, %v7130_v29, %v7108_v26  ;;  %v3826_v19 = vsel %vm279_vm0, %v7142_v22, %v7116_v23 }
 0x48b   : > { %3624 = vrot.lane.b32.xlu0 %v2651_v17, %s5028_s19  ;;  %v3983_v5 = vsel %vm1863_vm7, %v3951_v8, %v3475_v32  ;;  %v3856_v18 = vsel %vm1731_vm3, %v3824_v12, %v7301_v37  ;;  %v3858_v17 = vsel %vm1731_vm3, %v3826_v19, %v7309_v59  ;;  %v7636_v8 = vld [vmem:[#allocation3 + $0x110] sm:$0xff] }
 0x48c   : > { %v3349_v21 = vpop.permute.xlu1 %3348  ;;  %v4015_v33 = vsel %vm1896_vm8, %v3983_v5, %v3603_v44  ;;  %v8688_v44 = vld [vmem:[#allocation5_spill] sm:$0xff]  ;;  %v8689_v5 = vld [vmem:[#allocation4_spill] sm:$0xff] }
 0x48d   : > { %v3223_v1 = vpop.permute.xlu0 %3222 }
 0x48e   : > { %3752 = vrot.lane.b32.xlu1 %v7078_v41, %s5029_s20 }
 0x48f   : > { %3626 = vrot.lane.b32.xlu0 %v2747_v38, %s5028_s19 }
 0x490   : > { %v3351_v55 = vpop.permute.xlu1 %3350 }
 0x491   : > { %v3731_v45 = vpop.permute.xlu0 %3730 }
 0x492   : > { %v4047_v51 = vsel %vm1929_vm9, %v4015_v33, %v3731_v45  ;;  %3372 = vrot.lane.b32.xlu1 %v7078_v41, %s5026_s12  ;;  %v3888_v41 = vsel %vm1764_vm4, %v3856_v18, %v7427_v16 }
 0x493   : > { %3246 = vrot.lane.b32.xlu0 %v2747_v38, %s5025_s11  ;;  %4886 = vmatmul.mubr.msk.f32.gmra.mrb[2].mxu1 %vm1971_vm10, %v4047_v51  ;;  %v3920_v13 = vsel %vm1797_vm5, %v3888_v41, %v3221_v28  ;;  %v2750_v38 = vld [vmem:[#allocation3 + $0x109] sm:$0xff] }
 0x494   : > { %v3479_v36 = vpop.permute.xlu1 %3478  ;;  %v3952_v30 = vsel %vm1830_vm6, %v3920_v13, %v3349_v21 }
 0x495   : > { %v3477_v20 = vpop.permute.xlu0 %3476 }
 0x496   : > { %3374 = vrot.lane.b32.xlu1 %v7074_v25, %s5026_s12  ;;  %v3984_v26 = vsel %vm1863_vm7, %v3952_v30, %v3477_v20 }
 0x497   : > { %3754 = vrot.lane.b32.xlu0 %v7074_v25, %s5029_s20 }
 0x498   : > { %v3225_v56 = vpop.permute.xlu1 %3224 }
 0x499   : > { %v3605_v32 = vpop.permute.xlu0 %3604 }
 0x49a   : > { %3502 = vrot.lane.b32.xlu1 %v7228_v39, %s5027_s13  ;;  %v4016_v29 = vsel %vm1896_vm8, %v3984_v26, %v3605_v32  ;;  %v3825_v39 = vsel %vm279_vm0, %v7126_v31, %v7106_v27  ;;  %v8690_v26 = vld [vmem:[#allocation7_spill] sm:$0xff] }
 0x49b   : > { %3500 = vrot.lane.b32.xlu0 %v7232_v52, %s5027_s13  ;;  %v3857_v52 = vsel %vm1731_vm3, %v3825_v39, %v7299_v34 }
 0x49c   : > { %v3733_v25 = vpop.permute.xlu1 %3732  ;;  %v3889_v9 = vsel %vm1764_vm4, %v3857_v52, %v7425_v10  ;;  %v2688_v52 = vld [vmem:[#allocation3 + $0x112] sm:$0xff] }
 0x49d   : > { %v4048_v37 = vsel %vm1929_vm9, %v4016_v29, %v3733_v25  ;;  %v3607_v16 = vpop.permute.xlu0 %3606  ;;  %v3921_v62 = vsel %vm1797_vm5, %v3889_v9, %v3223_v1  ;;  %v3828_v29 = vsel %vm279_vm0, %v7154_v50, %v8690_v26 }
 0x49e   : > { %3248 = vrot.lane.b32.xlu1 %v2653_v2, %s5025_s11  ;;  %4888 = vmatprep.mubr.msk.f32.mxu1 %vm1971_vm10, %v4048_v37  ;;  %v3953_v40 = vsel %vm1830_vm6, %v3921_v62, %v3351_v55  ;;  %v3827_v55 = vsel %vm279_vm0, %v7138_v14, %v8689_v5  ;;  %v3860_v25 = vsel %vm1731_vm3, %v3828_v29, %v7317_v4 }
 0x49f   : > { %3628 = vrot.lane.b32.xlu0 %v2653_v2, %s5028_s19  ;;  %v3985_v27 = vsel %vm1863_vm7, %v3953_v40, %v3479_v36  ;;  %v3859_v33 = vsel %vm1731_vm3, %v3827_v55, %v7307_v60  ;;  %v3892_v37 = vsel %vm1764_vm4, %v3860_v25, %v7443_v15 }
 0x4a0   : > { %v3353_v6 = vpop.permute.xlu1 %3352  ;;  %v4017_v34 = vsel %vm1896_vm8, %v3985_v27, %v3607_v16  ;;  %v3891_v51 = vsel %vm1764_vm4, %v3859_v33, %v7433_v57  ;;  %v2751_v57 = vld [vmem:[#allocation3 + $0x111] sm:$0xff] }
 0x4a1   : > { %v3227_v28 = vpop.permute.xlu0 %3226 }
 0x4a2   : > { %3756 = vrot.lane.b32.xlu1 %v7086_v47, %s5029_s20  ;;  %v3923_v20 = vsel %vm1797_vm5, %v3891_v51, %v3227_v28  ;;  %v7675_v28 = vld [vmem:[#allocation3 + $0x120] sm:$0xff]  ;;  %v2690_v51 = vld [vmem:[#allocation3 + $0x12a] sm:$0xff] }
 0x4a3   : > { %3630 = vrot.lane.b32.xlu0 %v2749_v3, %s5028_s19 }
 0x4a4   : > { %v3355_v31 = vpop.permute.xlu1 %3354 }
 0x4a5   : > { %v3735_v11 = vpop.permute.xlu0 %3734  ;;  %v3955_v12 = vsel %vm1830_vm6, %v3923_v20, %v3355_v31 }
 0x4a6   : > { %v4049_v42 = vsel %vm1929_vm9, %v4017_v34, %v3735_v11  ;;  %3376 = vrot.lane.b32.xlu1 %v7086_v47, %s5026_s12  ;;  %v3890_v47 = vsel %vm1764_vm4, %v3858_v17, %v7435_v53 }
 0x4a7   : > { %3250 = vrot.lane.b32.xlu0 %v2749_v3, %s5025_s11  ;;  %4889 = vmatmul.mubr.msk.f32.gmra.mrb[4].mxu1 %vm1971_vm10, %v4049_v42  ;;  %v3922_v21 = vsel %vm1797_vm5, %v3890_v47, %v3225_v56  ;;  %v2782_v56 = vld [vmem:[#allocation3 + $0x10a] sm:$0xff]  ;;  %v2752_v42 = vld [vmem:[#allocation3 + $0x121] sm:$0xff] }
 0x4a8   : > { %v3483_v10 = vpop.permute.xlu1 %3482  ;;  %v3954_v23 = vsel %vm1830_vm6, %v3922_v21, %v3353_v6  ;;  %v8691_v3 = vld [vmem:[#allocation68_spill] sm:$0xff]  ;;  %v2784_v21 = vld [vmem:[#allocation3 + $0x122] sm:$0xff] }
 0x4a9   : > { %v3481_v7 = vpop.permute.xlu0 %3480  ;;  %v3987_v14 = vsel %vm1863_vm7, %v3955_v12, %v3483_v10  ;;  %v3829_v40 = vsel %vm279_vm0, %v7150_v35, %v8691_v3  ;;  %v7690_v10 = vld [vmem:[#allocation3 + $0x128] sm:$0xff]  ;;  %v8695_v12 = vld [vmem:[#allocation129_spill] sm:$0xff] }
 0x4aa   : > { %3378 = vrot.lane.b32.xlu1 %v8688_v44, %s5026_s12  ;;  %v3986_v22 = vsel %vm1863_vm7, %v3954_v23, %v3481_v7  ;;  %v3861_v27 = vsel %vm1731_vm3, %v3829_v40, %v7315_v54 }
 0x4ab   : > { %3758 = vrot.lane.b32.xlu0 %v8688_v44, %s5029_s20  ;;  %v3893_v34 = vsel %vm1764_vm4, %v3861_v27, %v7441_v24 }
 0x4ac   : > { %v3229_v49 = vpop.permute.xlu1 %3228 }
 0x4ad   : > { %v3609_v63 = vpop.permute.xlu0 %3608  ;;  %v3924_v2 = vsel %vm1797_vm5, %v3892_v37, %v3229_v49  ;;  %v2754_v37 = vld [vmem:[#allocation3 + $0x139] sm:$0xff] }
 0x4ae   : > { %3124 = vrot.lane.b32.xlu1 %v7625_v48, %s5024_s10  ;;  %v4018_v59 = vsel %vm1896_vm8, %v3986_v22, %v3609_v63  ;;  %v8692_v63 = vld [vmem:[#allocation63_spill] sm:$0xff] }
 0x4af   : > { %3504 = vrot.lane.b32.xlu0 %v7625_v48, %s5027_s13  ;;  %v3830_v23 = vsel %vm279_vm0, %v7166_v43, %v8692_v63  ;;  %v2753_v22 = vld [vmem:[#allocation3 + $0x129] sm:$0xff] }
 0x4b0   : > { %v3737_v1 = vpop.permute.xlu1 %3736 }
 0x4b1   : > { %v4050_v53 = vsel %vm1929_vm9, %v4018_v59, %v3737_v1  ;;  %v3611_v61 = vpop.permute.xlu0 %3610  ;;  %v3862_v59 = vsel %vm1731_vm3, %v3830_v23, %v7325_v46  ;;  %v8704_v23 = vld [vmem:[#allocation134_spill] sm:$0xff] }
 0x4b2   : > { %3632 = vrot.lane.b32.xlu1 %v2750_v38, %s5028_s19  ;;  %4891 = vmatprep.mubr.msk.f32.mxu1 %vm1971_vm10, %v4050_v53  ;;  %v4019_v41 = vsel %vm1896_vm8, %v3987_v14, %v3611_v61  ;;  %v3894_v1 = vsel %vm1764_vm4, %v3862_v59, %v7451_v0  ;;  %v8693_v0 = vld [vmem:[#allocation13_spill] sm:$0xff] }
 0x4b3   : > { %3506 = vrot.lane.b32.xlu0 %v7636_v8, %s5027_s13 }
 0x4b4   : > { %v3357_v45 = vpop.permute.xlu1 %3356 }
 0x4b5   : > { %v3231_v36 = vpop.permute.xlu0 %3230  ;;  %v3956_v6 = vsel %vm1830_vm6, %v3924_v2, %v3357_v45  ;;  %v2723_v2 = vld [vmem:[#allocation3 + $0x140] sm:$0xff] }
 0x4b6   : > { %3252 = vrot.lane.b32.xlu1 %v2750_v38, %s5025_s11  ;;  %v3925_v7 = vsel %vm1797_vm5, %v3893_v34, %v3231_v36  ;;  %v8694_v36 = vld [vmem:[#allocation9_spill] sm:$0xff] }
 0x4b7   : > { %3126 = vrot.lane.b32.xlu0 %v7636_v8, %s5024_s10  ;;  %v3831_v20 = vsel %vm279_vm0, %v8694_v36, %v8693_v0  ;;  %v2786_v34 = vld [vmem:[#allocation3 + $0x13a] sm:$0xff]  ;;  %v2756_v0 = vld [vmem:[#allocation3 + $0x151] sm:$0xff] }
 0x4b8   : > { %v3359_v18 = vpop.permute.xlu1 %3358  ;;  %v3863_v14 = vsel %vm1731_vm3, %v3831_v20, %v8695_v12  ;;  %v8705_v36 = vld [vmem:[#allocation70_spill] sm:$0xff]  ;;  %v8706_v20 = vld [vmem:[#allocation21_spill] sm:$0xff] }
 0x4b9   : > { %v3739_v60 = vpop.permute.xlu0 %3738  ;;  %v3957_v35 = vsel %vm1830_vm6, %v3925_v7, %v3359_v18  ;;  %v3834_v12 = vsel %vm279_vm0, %v8706_v20, %v8705_v36 }
 0x4ba   : > { %v4051_v13 = vsel %vm1929_vm9, %v4019_v41, %v3739_v60  ;;  %3760 = vrot.lane.b32.xlu1 %v2782_v56, %s5029_s20  ;;  %v8696_v41 = vld [vmem:[#allocation17_spill] sm:$0xff] }
 0x4bb   : > { %3634 = vrot.lane.b32.xlu0 %v2751_v57, %s5028_s19  ;;  %4892 = vmatmul.mubr.msk.f32.gmra.mrb[6].mxu1 %vm1971_vm10, %v4051_v13  ;;  %v3895_v60 = vsel %vm1764_vm4, %v3863_v14, %v8696_v41  ;;  %v2627_v13 = vld [vmem:[#allocation3 + $0x138] sm:$0xff] }
 0x4bc   : > { %v3487_v32 = vpop.permute.xlu1 %3486  ;;  %v2725_v14 = vld [vmem:[#allocation3 + $0x158] sm:$0xff] }
 0x4bd   : > { %v3485_v30 = vpop.permute.xlu0 %3484  ;;  %v3989_v19 = vsel %vm1863_vm7, %v3957_v35, %v3487_v32 }
 0x4be   : > { %3380 = vrot.lane.b32.xlu1 %v2782_v56, %s5026_s12  ;;  %v3988_v50 = vsel %vm1863_vm7, %v3956_v6, %v3485_v30  ;;  %v8697_v6 = vld [vmem:[#allocation11_spill] sm:$0xff] }
 0x4bf   : > { %3254 = vrot.lane.b32.xlu0 %v2751_v57, %s5025_s11 }
 0x4c0   : > { %v3233_v16 = vpop.permute.xlu1 %3232 }
 0x4c1   : > { %v3613_v39 = vpop.permute.xlu0 %3612  ;;  %v3926_v61 = vsel %vm1797_vm5, %v3894_v1, %v3233_v16  ;;  %v2692_v1 = vld [vmem:[#allocation3 + $0x142] sm:$0xff] }
 0x4c2   : > { %3382 = vrot.lane.b32.xlu1 %v2688_v52, %s5026_s12  ;;  %v4020_v4 = vsel %vm1896_vm8, %v3988_v50, %v3613_v39  ;;  %v8698_v50 = vld [vmem:[#allocation72_spill] sm:$0xff] }
 0x4c3   : > { %3762 = vrot.lane.b32.xlu0 %v2688_v52, %s5029_s20 }
 0x4c4   : > { %v3741_v9 = vpop.permute.xlu1 %3740 }
 0x4c5   : > { %v4052_v15 = vsel %vm1929_vm9, %v4020_v4, %v3741_v9  ;;  %v3615_v62 = vpop.permute.xlu0 %3614  ;;  %v3832_v4 = vsel %vm279_vm0, %v8698_v50, %v8697_v6  ;;  %v8699_v9 = vld [vmem:[#allocation78_spill] sm:$0xff]  ;;  %v8710_v6 = vld [vmem:[#allocation16_spill] sm:$0xff] }
 0x4c6   : > { %3128 = vrot.lane.b32.xlu1 %v7675_v28, %s5024_s10  ;;  %4894 = vmatprep.mubr.msk.f32.mxu1 %vm1971_vm10, %v4052_v15  ;;  %v4021_v44 = vsel %vm1896_vm8, %v3989_v19, %v3615_v62  ;;  %v3864_v15 = vsel %vm1731_vm3, %v3832_v4, %v8699_v9  ;;  %v8700_v62 = vld [vmem:[#allocation60_spill] sm:$0xff]  ;;  %v8711_v4 = vld [vmem:[#allocation27_spill] sm:$0xff] }
 0x4c7   : > { %3508 = vrot.lane.b32.xlu0 %v7675_v28, %s5027_s13  ;;  %v3896_v3 = vsel %vm1764_vm4, %v3864_v15, %v8700_v62  ;;  %v8712_v62 = vld [vmem:[#allocation133_spill] sm:$0xff] }
 0x4c8   : > { %v3361_v31 = vpop.permute.xlu1 %3360 }
 0x4c9   : > { %v3235_v11 = vpop.permute.xlu0 %3234  ;;  %v3958_v5 = vsel %vm1830_vm6, %v3926_v61, %v3361_v31 }
 0x4ca   : > { %3636 = vrot.lane.b32.xlu1 %v2752_v42, %s5028_s19  ;;  %v3927_v57 = vsel %vm1797_vm5, %v3895_v60, %v3235_v11  ;;  %v8708_v60 = vld [vmem:[#allocation37_spill] sm:$0xff] }
 0x4cb   : > { %3510 = vrot.lane.b32.xlu0 %v7690_v10, %s5027_s13 }
 0x4cc   : > { %v3363_v54 = vpop.permute.xlu1 %3362 }
 0x4cd   : > { %v3743_v17 = vpop.permute.xlu0 %3742  ;;  %v3959_v32 = vsel %vm1830_vm6, %v3927_v57, %v3363_v54 }
 0x4ce   : > { %v4053_v24 = vsel %vm1929_vm9, %v4021_v44, %v3743_v17  ;;  %3256 = vrot.lane.b32.xlu1 %v2752_v42, %s5025_s11  ;;  %v2755_v42 = vld [vmem:[#allocation3 + $0x141] sm:$0xff] }
 0x4cf   : > { %3130 = vrot.lane.b32.xlu0 %v7690_v10, %s5024_s10  ;;  %4895 = vmatmul.mubr.msk.f32.gmra.mrb[8].mxu1 %vm1971_vm10, %v4053_v24  ;;  %v8701_v17 = vld [vmem:[#allocation67_spill] sm:$0xff]  ;;  %v8702_v24 = vld [vmem:[#allocation73_spill] sm:$0xff] }
 0x4d0   : > { %v3491_v47 = vpop.permute.xlu1 %3490 }
 0x4d1   : > { %v3489_v49 = vpop.permute.xlu0 %3488  ;;  %v3991_v30 = vsel %vm1863_vm7, %v3959_v32, %v3491_v47  ;;  %v3833_v47 = vsel %vm279_vm0, %v8702_v24, %v8701_v17  ;;  %v2631_v17 = vld [vmem:[#allocation3 + $0x168] sm:$0xff]  ;;  %v8713_v24 = vld [vmem:[#allocation12_spill] sm:$0xff] }
 0x4d2   : > { %3764 = vrot.lane.b32.xlu1 %v2784_v21, %s5029_s20  ;;  %v3990_v43 = vsel %vm1863_vm7, %v3958_v5, %v3489_v49  ;;  %v8703_v49 = vld [vmem:[#allocation29_spill] sm:$0xff] }
 0x4d3   : > { %3638 = vrot.lane.b32.xlu0 %v2753_v22, %s5028_s19 }
 0x4d4   : > { %v3237_v53 = vpop.permute.xlu1 %3236 }
 0x4d5   : > { %v3617_v38 = vpop.permute.xlu0 %3616  ;;  %v3928_v27 = vsel %vm1797_vm5, %v3896_v3, %v3237_v53 }
 0x4d6   : > { %3384 = vrot.lane.b32.xlu1 %v2784_v21, %s5026_s12  ;;  %v4022_v55 = vsel %vm1896_vm8, %v3990_v43, %v3617_v38  ;;  %v3865_v21 = vsel %vm1731_vm3, %v3833_v47, %v8703_v49  ;;  %v3836_v47 = vsel %vm279_vm0, %v7202_v58, %v8713_v24  ;;  %v8714_v49 = vld [vmem:[#allocation14_spill] sm:$0xff]  ;;  %v2727_v58 = vld [vmem:[#allocation3 + $0x170] sm:$0xff] }
 0x4d7   : > { %3258 = vrot.lane.b32.xlu0 %v2753_v22, %s5025_s11  ;;  %v3897_v22 = vsel %vm1764_vm4, %v3865_v21, %v8704_v23  ;;  %v3868_v21 = vsel %vm1731_vm3, %v3836_v47, %v8714_v49  ;;  %v8722_v24 = vld [vmem:[#allocation18_spill] sm:$0xff] }
 0x4d8   : > { %v3745_v46 = vpop.permute.xlu1 %3744  ;;  %v8723_v49 = vld [vmem:[#allocation98_spill] sm:$0xff] }
 0x4d9   : > { %v4054_v33 = vsel %vm1929_vm9, %v4022_v55, %v3745_v46  ;;  %v3619_v45 = vpop.permute.xlu0 %3618  ;;  %v2629_v46 = vld [vmem:[#allocation3 + $0x150] sm:$0xff] }
 0x4da   : > { %3386 = vrot.lane.b32.xlu1 %v2690_v51, %s5026_s12  ;;  %4897 = vmatprep.mubr.msk.f32.mxu1 %vm1971_vm10, %v4054_v33  ;;  %v4023_v29 = vsel %vm1896_vm8, %v3991_v30, %v3619_v45 }
 0x4db   : > { %3766 = vrot.lane.b32.xlu0 %v2690_v51, %s5029_s20 }
 0x4dc   : > { %v3365_v18 = vpop.permute.xlu1 %3364 }
 0x4dd   : > { %v3239_v56 = vpop.permute.xlu0 %3238  ;;  %v3960_v11 = vsel %vm1830_vm6, %v3928_v27, %v3365_v18  ;;  %v8707_v18 = vld [vmem:[#allocation99_spill] sm:$0xff] }
 0x4de   : > { %3132 = vrot.lane.b32.xlu1 %v2627_v13, %s5024_s10  ;;  %v3929_v53 = vsel %vm1797_vm5, %v3897_v22, %v3239_v56  ;;  %v3866_v41 = vsel %vm1731_vm3, %v3834_v12, %v8707_v18  ;;  %v8718_v12 = vld [vmem:[#allocation82_spill] sm:$0xff] }
 0x4df   : > { %3512 = vrot.lane.b32.xlu0 %v2627_v13, %s5027_s13  ;;  %v3898_v56 = vsel %vm1764_vm4, %v3866_v41, %v8708_v60  ;;  %v2790_v41 = vld [vmem:[#allocation3 + $0x16a] sm:$0xff] }
 0x4e0   : > { %v3367_v26 = vpop.permute.xlu1 %3366 }
 0x4e1   : > { %v3747_v25 = vpop.permute.xlu0 %3746  ;;  %v3961_v61 = vsel %vm1830_vm6, %v3929_v53, %v3367_v26  ;;  %v2758_v53 = vld [vmem:[#allocation3 + $0x169] sm:$0xff] }
 0x4e2   : > { %v4055_v16 = vsel %vm1929_vm9, %v4023_v29, %v3747_v25  ;;  %3640 = vrot.lane.b32.xlu1 %v2754_v37, %s5028_s19 }
 0x4e3   : > { %3514 = vrot.lane.b32.xlu0 %v2723_v2, %s5027_s13  ;;  %4898 = vmatmul.mubr.msk.f32.gmra.mrb[10].mxu1 %vm1971_vm10, %v4055_v16 }
 0x4e4   : > { %v3495_v39 = vpop.permute.xlu1 %3494 }
 0x4e5   : > { %v3493_v52 = vpop.permute.xlu0 %3492  ;;  %v3993_v38 = vsel %vm1863_vm7, %v3961_v61, %v3495_v39  ;;  %v2757_v39 = vld [vmem:[#allocation3 + $0x159] sm:$0xff] }
 0x4e6   : > { %3260 = vrot.lane.b32.xlu1 %v2754_v37, %s5025_s11  ;;  %v3992_v7 = vsel %vm1863_vm7, %v3960_v11, %v3493_v52  ;;  %v8709_v52 = vld [vmem:[#allocation71_spill] sm:$0xff] }
 0x4e7   : > { %3134 = vrot.lane.b32.xlu0 %v2723_v2, %s5024_s10  ;;  %v2788_v2 = vld [vmem:[#allocation3 + $0x152] sm:$0xff]  ;;  %v3835_v50 = vsel %vm279_vm0, %v8710_v6, %v8709_v52  ;;  %v2633_v52 = vld [vmem:[#allocation3 + $0x180] sm:$0xff] }
 0x4e8   : > { %v3241_v40 = vpop.permute.xlu1 %3240  ;;  %v3867_v9 = vsel %vm1731_vm3, %v3835_v50, %v8711_v4  ;;  %v5009_v6 = vld [vmem:[#allocation3 + $0xd8] sm:$0xff]  ;;  %v8719_v50 = vld [vmem:[#allocation74_spill] sm:$0xff] }
 0x4e9   : > { %v3621_v31 = vpop.permute.xlu0 %3620  ;;  %v3930_v57 = vsel %vm1797_vm5, %v3898_v56, %v3241_v40  ;;  %v3899_v3 = vsel %vm1764_vm4, %v3867_v9, %v8712_v62  ;;  %v2759_v56 = vld [vmem:[#allocation3 + $0x171] sm:$0xff]  ;;  %v3838_v4 = vsel %vm279_vm0, %v5009_v6, %v8719_v50  ;;  %v8720_v9 = vld [vmem:[#allocation58_spill] sm:$0xff] }
 0x4ea   : > { %3768 = vrot.lane.b32.xlu1 %v2786_v34, %s5029_s20  ;;  %v4024_v35 = vsel %vm1896_vm8, %v3992_v7, %v3621_v31  ;;  %v8721_v62 = vld [vmem:[#allocation81_spill] sm:$0xff] }
 0x4eb   : > { %3642 = vrot.lane.b32.xlu0 %v2755_v42, %s5028_s19  ;;  %v2794_v6 = vld [vmem:[#allocation3 + $0x19a] sm:$0xff] }
 0x4ec   : > { %v3749_v19 = vpop.permute.xlu1 %3748 }
 0x4ed   : > { %v4056_v54 = vsel %vm1929_vm9, %v4024_v35, %v3749_v19  ;;  %v3623_v44 = vpop.permute.xlu0 %3622  ;;  %v2694_v35 = vld [vmem:[#allocation3 + $0x15a] sm:$0xff] }
 0x4ee   : > { %3388 = vrot.lane.b32.xlu1 %v2786_v34, %s5026_s12  ;;  %4900 = vmatprep.mubr.msk.f32.mxu1 %vm1971_vm10, %v4056_v54  ;;  %v4025_v43 = vsel %vm1896_vm8, %v3993_v38, %v3623_v44 }
 0x4ef   : > { %3262 = vrot.lane.b32.xlu0 %v2755_v42, %s5025_s11 }
 0x4f0   : > { %v3369_v63 = vpop.permute.xlu1 %3368 }
 0x4f1   : > { %v3243_v59 = vpop.permute.xlu0 %3242  ;;  %v3962_v30 = vsel %vm1830_vm6, %v3930_v57, %v3369_v63  ;;  %v8715_v63 = vld [vmem:[#allocation35_spill] sm:$0xff] }
 0x4f2   : > { %3390 = vrot.lane.b32.xlu1 %v2692_v1, %s5026_s12  ;;  %v3931_v27 = vsel %vm1797_vm5, %v3899_v3, %v3243_v59  ;;  %v3900_v23 = vsel %vm1764_vm4, %v3868_v21, %v8715_v63 }
 0x4f3   : > { %3770 = vrot.lane.b32.xlu0 %v2692_v1, %s5029_s20 }
 0x4f4   : > { %v3371_v5 = vpop.permute.xlu1 %3370 }
 0x4f5   : > { %v3751_v55 = vpop.permute.xlu0 %3750  ;;  %v3963_v31 = vsel %vm1830_vm6, %v3931_v27, %v3371_v5 }
 0x4f6   : > { %v4057_v33 = vsel %vm1929_vm9, %v4025_v43, %v3751_v55  ;;  %3136 = vrot.lane.b32.xlu1 %v2629_v46, %s5024_s10 }
 0x4f7   : > { %3516 = vrot.lane.b32.xlu0 %v2629_v46, %s5027_s13  ;;  %4901 = vmatmul.mubr.msk.f32.gmra.mrb[12].mxu1 %vm1971_vm10, %v4057_v33  ;;  %v5008_v33 = vld [vmem:[#allocation3 + $0xc8] sm:$0xff] }
 0x4f8   : > { %v3499_v45 = vpop.permute.xlu1 %3498 }
 0x4f9   : > { %v3497_v51 = vpop.permute.xlu0 %3496  ;;  %v3995_v34 = vsel %vm1863_vm7, %v3963_v31, %v3499_v45  ;;  %v8716_v45 = vld [vmem:[#allocation15_spill] sm:$0xff] }
 0x4fa   : > { %3644 = vrot.lane.b32.xlu1 %v2756_v0, %s5028_s19  ;;  %v3994_v26 = vsel %vm1863_vm7, %v3962_v30, %v3497_v51  ;;  %v3837_v51 = vsel %vm279_vm0, %v5008_v33, %v8716_v45 }
 0x4fb   : > { %3518 = vrot.lane.b32.xlu0 %v2725_v14, %s5027_s13 }
 0x4fc   : > { %v3245_v13 = vpop.permute.xlu1 %3244 }
 0x4fd   : > { %v3625_v32 = vpop.permute.xlu0 %3624  ;;  %v3932_v59 = vsel %vm1797_vm5, %v3900_v23, %v3245_v13  ;;  %v8724_v23 = vld [vmem:[#allocation103_spill] sm:$0xff] }
 0x4fe   : > { %3264 = vrot.lane.b32.xlu1 %v2756_v0, %s5025_s11  ;;  %v4026_v29 = vsel %vm1896_vm8, %v3994_v26, %v3625_v32  ;;  %v8717_v0 = vld [vmem:[#allocation77_spill] sm:$0xff] }
 0x4ff   : > { %3138 = vrot.lane.b32.xlu0 %v2725_v14, %s5024_s10  ;;  %v3869_v36 = vsel %vm1731_vm3, %v3837_v51, %v8717_v0  ;;  %v2698_v51 = vld [vmem:[#allocation3 + $0x18a] sm:$0xff]  ;;  %v2731_v0 = vld [vmem:[#allocation3 + $0x1a0] sm:$0xff] }
 0x500   : > { %v3753_v25 = vpop.permute.xlu1 %3752  ;;  %v3901_v14 = vsel %vm1764_vm4, %v3869_v36, %v8718_v12 }
 0x501   : > { %v4058_v37 = vsel %vm1929_vm9, %v4026_v29, %v3753_v25  ;;  %v3627_v16 = vpop.permute.xlu0 %3626 }
 0x502   : > { %3772 = vrot.lane.b32.xlu1 %v2788_v2, %s5029_s20  ;;  %4903 = vmatprep.mubr.msk.f32.mxu1 %vm1971_vm10, %v4058_v37  ;;  %v4027_v42 = vsel %vm1896_vm8, %v3995_v34, %v3627_v16  ;;  %v2696_v16 = vld [vmem:[#allocation3 + $0x172] sm:$0xff]  ;;  %v2760_v34 = vld [vmem:[#allocation3 + $0x181] sm:$0xff] }
 0x503   : > { %3646 = vrot.lane.b32.xlu0 %v2757_v39, %s5028_s19 }
 0x504   : > { %v3373_v15 = vpop.permute.xlu1 %3372 }
 0x505   : > { %v3247_v40 = vpop.permute.xlu0 %3246  ;;  %v3964_v61 = vsel %vm1830_vm6, %v3932_v59, %v3373_v15  ;;  %v3870_v15 = vsel %vm1731_vm3, %v3838_v4, %v8720_v9  ;;  %v5012_v4 = vld [vmem:[#allocation3 + $0xf8] sm:$0xff]  ;;  %v8727_v9 = vld [vmem:[#allocation19_spill] sm:$0xff] }
 0x506   : > { %3392 = vrot.lane.b32.xlu1 %v2788_v2, %s5026_s12  ;;  %v3933_v60 = vsel %vm1797_vm5, %v3901_v14, %v3247_v40  ;;  %v3902_v3 = vsel %vm1764_vm4, %v3870_v15, %v8721_v62  ;;  %v5011_v14 = vld [vmem:[#allocation3 + $0xf0] sm:$0xff]  ;;  %v3841_v15 = vsel %vm279_vm0, %v5012_v4, %v8727_v9  ;;  %v8728_v62 = vld [vmem:[#allocation10_spill] sm:$0xff] }
 0x507   : > { %3266 = vrot.lane.b32.xlu0 %v2757_v39, %s5025_s11 }
 0x508   : > { %v3375_v11 = vpop.permute.xlu1 %3374 }
 0x509   : > { %v3755_v7 = vpop.permute.xlu0 %3754  ;;  %v3965_v13 = vsel %vm1830_vm6, %v3933_v60, %v3375_v11  ;;  %v8726_v60 = vld [vmem:[#allocation132_spill] sm:$0xff] }
 0x50a   : > { %v4059_v19 = vsel %vm1929_vm9, %v4027_v42, %v3755_v7  ;;  %3394 = vrot.lane.b32.xlu1 %v2694_v35, %s5026_s12  ;;  %v2729_v42 = vld [vmem:[#allocation3 + $0x188] sm:$0xff] }
 0x50b   : > { %3774 = vrot.lane.b32.xlu0 %v2694_v35, %s5029_s20  ;;  %4904 = vmatmul.mubr.msk.f32.gmra.mrb[14].mxu1 %vm1971_vm10, %v4059_v19 }
 0x50c   : > { %v3503_v54 = vpop.permute.xlu1 %3502 }
 0x50d   : > { %v3501_v44 = vpop.permute.xlu0 %3500  ;;  %v3997_v57 = vsel %vm1863_vm7, %v3965_v13, %v3503_v54  ;;  %v2763_v13 = vld [vmem:[#allocation3 + $0x1a1] sm:$0xff] }
 0x50e   : > { %3140 = vrot.lane.b32.xlu1 %v2631_v17, %s5024_s10  ;;  %v3996_v38 = vsel %vm1863_vm7, %v3964_v61, %v3501_v44  ;;  %v2761_v61 = vld [vmem:[#allocation3 + $0x189] sm:$0xff] }
 0x50f   : > { %3520 = vrot.lane.b32.xlu0 %v2631_v17, %s5027_s13  ;;  %v5010_v17 = vld [vmem:[#allocation3 + $0xe0] sm:$0xff] }
 0x510   : > { %v3249_v22 = vpop.permute.xlu1 %3248  ;;  %v3839_v47 = vsel %vm279_vm0, %v5010_v17, %v8722_v24 }
 0x511   : > { %v3629_v1 = vpop.permute.xlu0 %3628  ;;  %v3934_v27 = vsel %vm1797_vm5, %v3902_v3, %v3249_v22  ;;  %v3871_v21 = vsel %vm1731_vm3, %v3839_v47, %v8723_v49  ;;  %v3873_v3 = vsel %vm1731_vm3, %v3841_v15, %v8728_v62  ;;  %v7933_v49 = vld [vmem:[%s8234_s6] ss:$0 sm:$0xff] }
 0x512   : > { %3648 = vrot.lane.b32.xlu1 %v2758_v53, %s5028_s19  ;;  %v4028_v5 = vsel %vm1896_vm8, %v3996_v38, %v3629_v1  ;;  %v3903_v22 = vsel %vm1764_vm4, %v3871_v21, %v8724_v23  ;;  %v2792_v1 = vld [vmem:[#allocation3 + $0x182] sm:$0xff]  ;;  %v2404_v23 = vld [vmem:[%s5244_s30 + $0x8] sm:$0xff] }
 0x513   : > { %3522 = vrot.lane.b32.xlu0 %v2727_v58, %s5027_s13 }
 0x514   : > { %v3757_v43 = vpop.permute.xlu1 %3756 }
 0x515   : > { %v4060_v55 = vsel %vm1929_vm9, %v4028_v5, %v3757_v43  ;;  %v3631_v46 = vpop.permute.xlu0 %3630 }
 0x516   : > { %3268 = vrot.lane.b32.xlu1 %v2758_v53, %s5025_s11  ;;  %4906 = vmatprep.mubr.msk.f32.mxu1 %vm1971_vm10, %v4060_v55  ;;  %v4029_v30 = vsel %vm1896_vm8, %v3997_v57, %v3631_v46 }
 0x517   : > { %3142 = vrot.lane.b32.xlu0 %v2727_v58, %s5024_s10 }
 0x518   : > { %v3377_v20 = vpop.permute.xlu1 %3376 }
 0x519   : > { %v3251_v18 = vpop.permute.xlu0 %3250  ;;  %v3966_v11 = vsel %vm1830_vm6, %v3934_v27, %v3377_v20  ;;  %v2730_v20 = vld [vmem:[#allocation3 + $0x198] sm:$0xff] }
 0x51a   : > { %3776 = vrot.lane.b32.xlu1 %v2790_v41, %s5029_s20  ;;  %v3935_v53 = vsel %vm1797_vm5, %v3903_v22, %v3251_v18  ;;  %v8725_v18 = vld [vmem:[#allocation25_spill] sm:$0xff] }
 0x51b   : > { %3650 = vrot.lane.b32.xlu0 %v2759_v56, %s5028_s19 }
 0x51c   : > { %v3379_v32 = vpop.permute.xlu1 %3378 }
 0x51d   : > { %v3759_v26 = vpop.permute.xlu0 %3758  ;;  %v3967_v58 = vsel %vm1830_vm6, %v3935_v53, %v3379_v32  ;;  %v2403_v53 = vld [vmem:[%s5244_s30] sm:$0xff] }
 0x51e   : > { %v4061_v29 = vsel %vm1929_vm9, %v4029_v30, %v3759_v26  ;;  %3396 = vrot.lane.b32.xlu1 %v2790_v41, %s5026_s12  ;;  %v3840_v41 = vsel %vm279_vm0, %v5011_v14, %v8725_v18  ;;  %v2762_v30 = vld [vmem:[#allocation3 + $0x199] sm:$0xff] }
 0x51f   : > { %3270 = vrot.lane.b32.xlu0 %v2759_v56, %s5025_s11  ;;  %4907 = vmatmul.mubr.msk.f32.gmra.mrb[16].mxu1 %vm1971_vm10, %v4061_v29  ;;  %v3872_v56 = vsel %vm1731_vm3, %v3840_v41, %v8726_v60 }
 0x520   : > { %v7847_v25 = vpop.permute.xlu1 %3124 }
 0x521   : > { %v3505_v37 = vpop.permute.xlu0 %3504  ;;  %v3904_v57 = vsel %vm1764_vm4, %v3872_v56, %v7847_v25 }
 0x522   : > { %3398 = vrot.lane.b32.xlu1 %v2696_v16, %s5026_s12  ;;  %v3998_v7 = vsel %vm1863_vm7, %v3966_v11, %v3505_v37 }
 0x523   : > { %3778 = vrot.lane.b32.xlu0 %v2696_v16, %s5029_s20 }
 0x524   : > { %v3633_v2 = vpop.permute.xlu1 %3632 }
 0x525   : > { %v3507_v39 = vpop.permute.xlu0 %3506  ;;  %v4030_v35 = vsel %vm1896_vm8, %v3998_v7, %v3633_v2  ;;  %v2795_v2 = vld [vmem:[#allocation3 + $0x1a2] sm:$0xff] }
 0x526   : > { %3144 = vrot.lane.b32.xlu1 %v2633_v52, %s5024_s10  ;;  %v3999_v38 = vsel %vm1863_vm7, %v3967_v58, %v3507_v39  ;;  %v8729_v58 = vld [vmem:[#allocation23_spill] sm:$0xff] }
 0x527   : > { %3524 = vrot.lane.b32.xlu0 %v2633_v52, %s5027_s13 }
 0x528   : > { %v3253_v40 = vpop.permute.xlu1 %3252 }
 0x529   : > { %v7860_v31 = vpop.permute.xlu0 %3126  ;;  %v3936_v26 = vsel %vm1797_vm5, %v3904_v57, %v3253_v40 }
 0x52a   : > { %3652 = vrot.lane.b32.xlu1 %v2760_v34, %s5028_s19  ;;  %v3905_v27 = vsel %vm1764_vm4, %v3873_v3, %v7860_v31  ;;  %v7928_v31 = vld [vmem:[%s8233_s5] ss:$0 sm:$0xff] }
 0x52b   : > { %3526 = vrot.lane.b32.xlu0 %v2729_v42, %s5027_s13 }
 0x52c   : > { %v3761_v19 = vpop.permute.xlu1 %3760 }
 0x52d   : > { %v4062_v54 = vsel %vm1929_vm9, %v4030_v35, %v3761_v19  ;;  %v3635_v44 = vpop.permute.xlu0 %3634 }
 0x52e   : > { %4909 = vmatprep.mubr.msk.f32.mxu1 %vm1971_vm10, %v4062_v54  ;;  %3272 = vrot.lane.b32.xlu1 %v2760_v34, %s5025_s11  ;;  %v4031_v43 = vsel %vm1896_vm8, %v3999_v38, %v3635_v44  ;;  %v3842_v38 = vsel %vm279_vm0, %v7625_v48, %v8729_v58 }
 0x52f   : > { %3146 = vrot.lane.b32.xlu0 %v2729_v42, %s5024_s10 }
 0x530   : > { %v3381_v63 = vpop.permute.xlu1 %3380 }
 0x531   : > { %v3255_v59 = vpop.permute.xlu0 %3254  ;;  %v3968_v37 = vsel %vm1830_vm6, %v3936_v26, %v3381_v63 }
 0x532   : > { %3780 = vrot.lane.b32.xlu1 %v2792_v1, %s5029_s20  ;;  %v3937_v11 = vsel %vm1797_vm5, %v3905_v27, %v3255_v59  ;;  %v2405_v27 = vld [vmem:[%s5244_s30 + $0x10] sm:$0xff] }
 0x533   : > { %3654 = vrot.lane.b32.xlu0 %v2761_v61, %s5028_s19 }
 0x534   : > { %v3383_v5 = vpop.permute.xlu1 %3382 }
 0x535   : > { %v3763_v55 = vpop.permute.xlu0 %3762  ;;  %v3969_v42 = vsel %vm1830_vm6, %v3937_v11, %v3383_v5 }
 0x536   : > { %v4063_v46 = vsel %vm1929_vm9, %v4031_v43, %v3763_v55  ;;  %3400 = vrot.lane.b32.xlu1 %v2792_v1, %s5026_s12  ;;  %v8730_v43 = vld [vmem:[#allocation131_spill] sm:$0xff] }
 0x537   : > { %4910 = vmatmul.mubr.msk.f32.gmra.mrb[18].mxu1 %vm1971_vm10, %v4063_v46  ;;  %3274 = vrot.lane.b32.xlu0 %v2761_v61, %s5025_s11  ;;  %v3874_v55 = vsel %vm1731_vm3, %v3842_v38, %v8730_v43 }
 0x538   : > { %v7887_v33 = vpop.permute.xlu1 %3128 }
 0x539   : > { %v3509_v45 = vpop.permute.xlu0 %3508 }
 0x53a   : > { %3402 = vrot.lane.b32.xlu1 %v2698_v51, %s5026_s12  ;;  %v4000_v16 = vsel %vm1863_vm7, %v3968_v37, %v3509_v45  ;;  %v3906_v45 = vsel %vm1764_vm4, %v3874_v55, %v7887_v33  ;;  %v8736_v55 = vld [vmem:[#allocation33_spill] sm:$0xff] }
 0x53b   : > { %3782 = vrot.lane.b32.xlu0 %v2698_v51, %s5029_s20 }
 0x53c   : > { %v3637_v36 = vpop.permute.xlu1 %3636 }
 0x53d   : > { %v3511_v12 = vpop.permute.xlu0 %3510  ;;  %v4032_v39 = vsel %vm1896_vm8, %v4000_v16, %v3637_v36 }
 0x53e   : > { %3530 = vrot.lane.b32.xlu1 %v2731_v0, %s5027_s13  ;;  %v4001_v7 = vsel %vm1863_vm7, %v3969_v42, %v3511_v12 }
 0x53f   : > { %3528 = vrot.lane.b32.xlu0 %v2730_v20, %s5027_s13 }
 0x540   : > { %v3257_v32 = vpop.permute.xlu1 %3256 }
 0x541   : > { %v7900_v29 = vpop.permute.xlu0 %3130  ;;  %v3938_v48 = vsel %vm1797_vm5, %v3906_v45, %v3257_v32  ;;  %v8732_v32 = vld [vmem:[#allocation56_spill] sm:$0xff] }
 0x542   : > { %3658 = vrot.lane.b32.xlu1 %v2763_v13, %s5028_s19  ;;  %v8731_v13 = vld [vmem:[#allocation76_spill] sm:$0xff] }
 0x543   : > { %3656 = vrot.lane.b32.xlu0 %v2762_v30, %s5028_s19  ;;  %v3843_v57 = vsel %vm279_vm0, %v7636_v8, %v8731_v13  ;;  %v2407_v13 = vld [vmem:[%s5244_s30 + $0x20] sm:$0xff] }
 0x544   : > { %v3765_v52 = vpop.permute.xlu1 %3764  ;;  %v3875_v30 = vsel %vm1731_vm3, %v3843_v57, %v8732_v32 }
 0x545   : > { %v4064_v25 = vsel %vm1929_vm9, %v4032_v39, %v3765_v52  ;;  %v3639_v50 = vpop.permute.xlu0 %3638  ;;  %v3907_v37 = vsel %vm1764_vm4, %v3875_v30, %v7900_v29  ;;  %v2406_v29 = vld [vmem:[%s5244_s30 + $0x18] sm:$0xff] }
 0x546   : > { %4912 = vmatprep.mubr.msk.f32.mxu1 %vm1971_vm10, %v4064_v25  ;;  %3786 = vrot.lane.b32.xlu1 %v2795_v2, %s5029_s20  ;;  %v4033_v19 = vsel %vm1896_vm8, %v4001_v7, %v3639_v50 }
 0x547   : > { %3784 = vrot.lane.b32.xlu0 %v2794_v6, %s5029_s20 }
 0x548   : > { %v3385_v40 = vpop.permute.xlu1 %3384 }
 0x549   : > { %v3259_v34 = vpop.permute.xlu0 %3258  ;;  %v3970_v12 = vsel %vm1830_vm6, %v3938_v48, %v3385_v40 }
 0x54a   : > { %v3939_v2 = vsel %vm1797_vm5, %v3907_v37, %v3259_v34 }
 0x54c   : > { %v3387_v35 = vpop.permute.xlu1 %3386 }
 0x54d   : > { %v3767_v54 = vpop.permute.xlu0 %3766  ;;  %v3971_v39 = vsel %vm1830_vm6, %v3939_v2, %v3387_v35 }
 0x54e   : > { %v4065_v44 = vsel %vm1929_vm9, %v4033_v19, %v3767_v54 }
 0x54f   : > { %4913 = vmatmul.mubr.msk.f32.gmra.mrb[20].mxu1 %vm1971_vm10, %v4065_v44  ;;  %v8733_v44 = vld [vmem:[#allocation75_spill] sm:$0xff] }
 0x550   : > { %v7923_v17 = vpop.permute.xlu1 %3132 }
 0x551   : > { %v3513_v24 = vpop.permute.xlu0 %3512 }
 0x552   : > { %v4884_v47 = vpop.f32.mrb[0].mxu1  ;;  %v4002_v18 = vsel %vm1863_vm7, %v3970_v12, %v3513_v24  ;;  %v3844_v24 = vsel %vm279_vm0, %v7675_v28, %v8733_v44 }
 0x553   : > { %v4414_v21 = vmul.f32 %v4884_v47, %v7928_v31  ;;  %v4247_v63 = vpop.f32.mrb[1].mxu1 }
 0x554   : > { %v4413_v22 = vmul.f32 %v7928_v31, %v4247_v63  ;;  %v3641_v59 = vpop.permute.xlu1 %3640 }
 0x555   : > { %v4453_v1 = vadd.f32 %v7933_v49, %v4414_v21  ;;  %v3515_v61 = vpop.permute.xlu0 %3514  ;;  %v4034_v33 = vsel %vm1896_vm8, %v4002_v18, %v3641_v59  ;;  %v8734_v21 = vld [vmem:[#allocation80_spill] sm:$0xff] }
 0x556   : > { %v4452_v5 = vadd.f32 %v7933_v49, %v4413_v22  ;;  %v4003_v52 = vsel %vm1863_vm7, %v3971_v39, %v3515_v61  ;;  %v3876_v63 = vsel %vm1731_vm3, %v3844_v24, %v8734_v21 }
 0x557   : > { %v4485_v46 = vadd.f32 %v4453_v1, %v2404_v23  ;;  %v3908_v23 = vsel %vm1764_vm4, %v3876_v63, %v7923_v17  ;;  %v8735_v17 = vld [vmem:[#allocation97_spill] sm:$0xff]  ;;  %v8740_v63 = vld [vmem:[#allocation31_spill] sm:$0xff] }
 0x558   : > { %v4484_v51 = vadd.f32 %v4452_v5, %v2403_v53  ;;  %v3261_v0 = vpop.permute.xlu1 %3260  ;;  %v3845_v43 = vsel %vm279_vm0, %v7690_v10, %v8735_v17 }
 0x559   : > { %v4517_v36 = vmax.f32 %v4485_v46, 0.0  ;;  %v3135_v20 = vpop.permute.xlu0 %3134  ;;  %v3940_v59 = vsel %vm1797_vm5, %v3908_v23, %v3261_v0  ;;  %v3877_v46 = vsel %vm1731_vm3, %v3845_v43, %v8736_v55 }
 0x55a   : > { %v4516_v14 = vmax.f32 %v4484_v51, 0.0  ;;  %v3909_v51 = vsel %vm1764_vm4, %v3877_v46, %v3135_v20 }
 0x55b   : > { %4549 = vst.msk [vmem:[%s7953_s15 + $0x8] sm:$0xff] %vm279_vm0, %v4517_v36 }
 0x55c   : > { %4548 = vst.msk [vmem:[%s7953_s15] sm:$0xff] %vm279_vm0, %v4516_v14  ;;  %v3769_v41 = vpop.permute.xlu1 %3768 }
 0x55d   : > { %v4066_v60 = vsel %vm1929_vm9, %v4034_v33, %v3769_v41  ;;  %v3643_v56 = vpop.permute.xlu0 %3642  ;;  %v2408_v41 = vld [vmem:[%s5244_s30 + $0x28] sm:$0xff] }
 0x55e   : > { %4915 = vmatprep.mubr.msk.f32.mxu1 %vm1971_vm10, %v4066_v60  ;;  %v4035_v25 = vsel %vm1896_vm8, %v4003_v52, %v3643_v56 }
 0x560   : > { %v3389_v26 = vpop.permute.xlu1 %3388 }
 0x561   : > { %v3263_v16 = vpop.permute.xlu0 %3262  ;;  %v3972_v53 = vsel %vm1830_vm6, %v3940_v59, %v3389_v26 }
 0x562   : > { %v3941_v48 = vsel %vm1797_vm5, %v3909_v51, %v3263_v16 }
 0x564   : > { %v3391_v6 = vpop.permute.xlu1 %3390 }
 0x565   : > { %v3771_v8 = vpop.permute.xlu0 %3770  ;;  %v3973_v12 = vsel %vm1830_vm6, %v3941_v48, %v3391_v6 }
 0x566   : > { %v4067_v50 = vsel %vm1929_vm9, %v4035_v25, %v3771_v8  ;;  %v4887_v4 = vpop.f32.mrb[2].mxu1  ;;  %v2533_v25 = vld [vmem:[#allocation3 + $0x138] sm:$0xff] }
 0x567   : > { %v4416_v9 = vmul.f32 %v4887_v4, %v7928_v31  ;;  %v4257_v15 = vpop.f32.mrb[3].mxu1  ;;  %4916 = vmatmul.mubr.msk.f32.gmra.mrb[22].mxu1 %vm1971_vm10, %v4067_v50  ;;  %v8737_v50 = vld [vmem:[#allocation96_spill] sm:$0xff] }
 0x568   : > { %v4415_v62 = vmul.f32 %v7928_v31, %v4257_v15  ;;  %v3137_v3 = vpop.permute.xlu1 %3136  ;;  %v3846_v4 = vsel %vm279_vm0, %v2533_v25, %v8737_v50 }
 0x569   : > { %v4455_v40 = vadd.f32 %v7933_v49, %v4416_v9  ;;  %v3517_v34 = vpop.permute.xlu0 %3516  ;;  %v8738_v9 = vld [vmem:[#allocation101_spill] sm:$0xff] }
 0x56a   : > { %v4454_v11 = vadd.f32 %v7933_v49, %v4415_v62  ;;  %v4004_v28 = vsel %vm1863_vm7, %v3972_v53, %v3517_v34  ;;  %v3878_v15 = vsel %vm1731_vm3, %v3846_v4, %v8738_v9  ;;  %v2411_v9 = vld [vmem:[%s5244_s30 + $0x40] sm:$0xff] }
 0x56b   : > { %v4487_v42 = vadd.f32 %v4455_v40, %v2406_v29  ;;  %v3910_v29 = vsel %vm1764_vm4, %v3878_v15, %v3137_v3  ;;  %v8739_v3 = vld [vmem:[#allocation8_spill] sm:$0xff] }
 0x56c   : > { %v4486_v7 = vadd.f32 %v4454_v11, %v2405_v27  ;;  %v3645_v35 = vpop.permute.xlu1 %3644 }
 0x56d   : > { %v4519_v19 = vmax.f32 %v4487_v42, 0.0  ;;  %v3519_v54 = vpop.permute.xlu0 %3518  ;;  %v4036_v61 = vsel %vm1896_vm8, %v4004_v28, %v3645_v35 }
 0x56e   : > { %v4518_v47 = vmax.f32 %v4486_v7, 0.0  ;;  %v4005_v33 = vsel %vm1863_vm7, %v3973_v12, %v3519_v54  ;;  %v2534_v54 = vld [vmem:[#allocation3 + $0x140] sm:$0xff] }
 0x56f   : > { %4551 = vst.msk [vmem:[%s7953_s15 + $0x18] sm:$0xff] %vm279_vm0, %v4519_v19  ;;  %v3847_v24 = vsel %vm279_vm0, %v2534_v54, %v8739_v3 }
 0x570   : > { %4550 = vst.msk [vmem:[%s7953_s15 + $0x10] sm:$0xff] %vm279_vm0, %v4518_v47  ;;  %v3265_v22 = vpop.permute.xlu1 %3264  ;;  %v3879_v23 = vsel %vm1731_vm3, %v3847_v24, %v8740_v63 }
 0x571   : > { %v7996_v1 = vpop.permute.xlu0 %3138  ;;  %v3942_v40 = vsel %vm1797_vm5, %v3910_v29, %v3265_v22  ;;  %v2410_v22 = vld [vmem:[%s5244_s30 + $0x38] sm:$0xff] }
 0x572   : > { %v3911_v28 = vsel %vm1764_vm4, %v3879_v23, %v7996_v1 }
 0x574   : > { %v3773_v58 = vpop.permute.xlu1 %3772 }
 0x575   : > { %v4068_v38 = vsel %vm1929_vm9, %v4036_v61, %v3773_v58  ;;  %v3647_v5 = vpop.permute.xlu0 %3646  ;;  %v2409_v58 = vld [vmem:[%s5244_s30 + $0x30] sm:$0xff] }
 0x576   : > { %4918 = vmatprep.mubr.msk.f32.mxu1 %vm1971_vm10, %v4068_v38  ;;  %v4037_v56 = vsel %vm1896_vm8, %v4005_v33, %v3647_v5 }
 0x578   : > { %v3393_v45 = vpop.permute.xlu1 %3392 }
 0x579   : > { %v3267_v0 = vpop.permute.xlu0 %3266  ;;  %v3974_v34 = vsel %vm1830_vm6, %v3942_v40, %v3393_v45 }
 0x57a   : > { %v4890_v36 = vpop.f32.mrb[4].mxu1  ;;  %v3943_v5 = vsel %vm1797_vm5, %v3911_v28, %v3267_v0 }
 0x57b   : > { %v4418_v14 = vmul.f32 %v4890_v36, %v7928_v31  ;;  %v4267_v18 = vpop.f32.mrb[5].mxu1 }
 0x57c   : > { %v4417_v10 = vmul.f32 %v7928_v31, %v4267_v18  ;;  %v3395_v60 = vpop.permute.xlu1 %3394 }
 0x57d   : > { %v4457_v20 = vadd.f32 %v7933_v49, %v4418_v14  ;;  %v3775_v57 = vpop.permute.xlu0 %3774  ;;  %v3975_v43 = vsel %vm1830_vm6, %v3943_v5, %v3395_v60  ;;  %v8741_v60 = vld [vmem:[#allocation6_spill] sm:$0xff]  ;;  %v8745_v5 = vld [vmem:[#allocation52_spill] sm:$0xff] }
 0x57e   : > { %v4456_v32 = vadd.f32 %v7933_v49, %v4417_v10  ;;  %v4069_v30 = vsel %vm1929_vm9, %v4037_v56, %v3775_v57 }
 0x57f   : > { %v4489_v26 = vadd.f32 %v4457_v20, %v2408_v41  ;;  %4919 = vmatmul.mubr.msk.f32.gmra.mrb[24].mxu1 %vm1971_vm10, %v4069_v30  ;;  %v2535_v41 = vld [vmem:[#allocation3 + $0x150] sm:$0xff] }
 0x580   : > { %v4488_v37 = vadd.f32 %v4456_v32, %v2407_v13  ;;  %v3141_v16 = vpop.permute.xlu1 %3140  ;;  %v3848_v56 = vsel %vm279_vm0, %v2535_v41, %v8741_v60  ;;  %v8742_v20 = vld [vmem:[#allocation20_spill] sm:$0xff] }
 0x581   : > { %v4521_v2 = vmax.f32 %v4489_v26, 0.0  ;;  %v3521_v39 = vpop.permute.xlu0 %3520  ;;  %v3880_v13 = vsel %vm1731_vm3, %v3848_v56, %v8742_v20 }
 0x582   : > { %v4520_v52 = vmax.f32 %v4488_v37, 0.0  ;;  %v4006_v11 = vsel %vm1863_vm7, %v3974_v34, %v3521_v39  ;;  %v3912_v57 = vsel %vm1764_vm4, %v3880_v13, %v3141_v16  ;;  %v8743_v34 = vld [vmem:[#allocation54_spill] sm:$0xff] }
 0x583   : > { %4553 = vst.msk [vmem:[%s7953_s15 + $0x28] sm:$0xff] %vm279_vm0, %v4521_v2 }
 0x584   : > { %4552 = vst.msk [vmem:[%s7953_s15 + $0x20] sm:$0xff] %vm279_vm0, %v4520_v52  ;;  %v3649_v6 = vpop.permute.xlu1 %3648 }
 0x585   : > { %v3523_v8 = vpop.permute.xlu0 %3522  ;;  %v4038_v42 = vsel %vm1896_vm8, %v4006_v11, %v3649_v6 }
 0x586   : > { %v4007_v46 = vsel %vm1863_vm7, %v3975_v43, %v3523_v8  ;;  %v2412_v8 = vld [vmem:[%s5244_s30 + $0x48] sm:$0xff]  ;;  %v8746_v43 = vld [vmem:[#allocation130_spill] sm:$0xff] }
 0x588   : > { %v3269_v62 = vpop.permute.xlu1 %3268 }
 0x589   : > { %v8031_v27 = vpop.permute.xlu0 %3142  ;;  %v3944_v30 = vsel %vm1797_vm5, %v3912_v57, %v3269_v62  ;;  %v2536_v62 = vld [vmem:[#allocation3 + $0x158] sm:$0xff]  ;;  %v2414_v57 = vld [vmem:[%s5244_s30 + $0x58] sm:$0xff] }
 0x58a   : > { %v3849_v11 = vsel %vm279_vm0, %v2536_v62, %v8743_v34 }
 0x58c   : > { %v3777_v7 = vpop.permute.xlu1 %3776 }
 0x58d   : > { %v4070_v35 = vsel %vm1929_vm9, %v4038_v42, %v3777_v7  ;;  %v3651_v19 = vpop.permute.xlu0 %3650  ;;  %v8744_v7 = vld [vmem:[#allocation79_spill] sm:$0xff] }
 0x58e   : > { %v4893_v44 = vpop.f32.mrb[6].mxu1  ;;  %4921 = vmatprep.mubr.msk.f32.mxu1 %vm1971_vm10, %v4070_v35  ;;  %v4039_v48 = vsel %vm1896_vm8, %v4007_v46, %v3651_v19  ;;  %v3881_v35 = vsel %vm1731_vm3, %v3849_v11, %v8744_v7  ;;  %v8747_v46 = vld [vmem:[#allocation62_spill] sm:$0xff] }
 0x58f   : > { %v4420_v47 = vmul.f32 %v4893_v44, %v7928_v31  ;;  %v4277_v21 = vpop.f32.mrb[7].mxu1  ;;  %v3913_v44 = vsel %vm1764_vm4, %v3881_v35, %v8031_v27 }
 0x590   : > { %v4419_v59 = vmul.f32 %v7928_v31, %v4277_v21  ;;  %v3397_v53 = vpop.permute.xlu1 %3396 }
 0x591   : > { %v4459_v61 = vadd.f32 %v7933_v49, %v4420_v47  ;;  %v3271_v38 = vpop.permute.xlu0 %3270  ;;  %v3976_v37 = vsel %vm1830_vm6, %v3944_v30, %v3397_v53 }
 0x592   : > { %v4458_v17 = vadd.f32 %v7933_v49, %v4419_v59  ;;  %v3945_v47 = vsel %vm1797_vm5, %v3913_v44, %v3271_v38  ;;  %v2538_v38 = vld [vmem:[#allocation3 + $0x170] sm:$0xff] }
 0x593   : > { %v4491_v55 = vadd.f32 %v4459_v61, %v2410_v22 }
 0x594   : > { %v4490_v45 = vadd.f32 %v4458_v17, %v2409_v58  ;;  %v3399_v51 = vpop.permute.xlu1 %3398  ;;  %v2537_v58 = vld [vmem:[#allocation3 + $0x168] sm:$0xff] }
 0x595   : > { %v4523_v1 = vmax.f32 %v4491_v55, 0.0  ;;  %v3779_v36 = vpop.permute.xlu0 %3778  ;;  %v3977_v63 = vsel %vm1830_vm6, %v3945_v47, %v3399_v51  ;;  %v3850_v17 = vsel %vm279_vm0, %v2537_v58, %v8745_v5  ;;  %v3851_v55 = vsel %vm279_vm0, %v2538_v38, %v8746_v43 }
 0x596   : > { %v4522_v12 = vmax.f32 %v4490_v45, 0.0  ;;  %v4071_v14 = vsel %vm1929_vm9, %v4039_v48, %v3779_v36  ;;  %v3882_v45 = vsel %vm1731_vm3, %v3850_v17, %v8747_v46  ;;  %v8748_v48 = vld [vmem:[#allocation100_spill] sm:$0xff]  ;;  %v2420_v17 = vld [vmem:[%s5244_s30 + $0x88] sm:$0xff] }
 0x597   : > { %4555 = vst.msk [vmem:[%s7953_s15 + $0x38] sm:$0xff] %vm279_vm0, %v4523_v1  ;;  %4922 = vmatmul.mubr.msk.f32.gmra.mrb[26].mxu1 %vm1971_vm10, %v4071_v14  ;;  %v3883_v1 = vsel %vm1731_vm3, %v3851_v55, %v8748_v48  ;;  %v2419_v46 = vld [vmem:[%s5244_s30 + $0x80] sm:$0xff] }
 0x598   : > { %4554 = vst.msk [vmem:[%s7953_s15 + $0x30] sm:$0xff] %vm279_vm0, %v4522_v12  ;;  %v3145_v0 = vpop.permute.xlu1 %3144 }
 0x599   : > { %v3525_v18 = vpop.permute.xlu0 %3524  ;;  %v3914_v36 = vsel %vm1764_vm4, %v3882_v45, %v3145_v0 }
 0x59a   : > { %v4008_v39 = vsel %vm1863_vm7, %v3976_v37, %v3525_v18 }
 0x59c   : > { %v3653_v33 = vpop.permute.xlu1 %3652 }
 0x59d   : > { %v3527_v10 = vpop.permute.xlu0 %3526  ;;  %v4040_v25 = vsel %vm1896_vm8, %v4008_v39, %v3653_v33 }
 0x59e   : > { %v4009_v23 = vsel %vm1863_vm7, %v3977_v63, %v3527_v10 }
 0x5a0   : > { %v3273_v32 = vpop.permute.xlu1 %3272 }
 0x5a1   : > { %v3147_v26 = vpop.permute.xlu0 %3146  ;;  %v3946_v14 = vsel %vm1797_vm5, %v3914_v36, %v3273_v32 }
 0x5a2   : > { %v4896_v2 = vpop.f32.mrb[8].mxu1  ;;  %v3915_v18 = vsel %vm1764_vm4, %v3883_v1, %v3147_v26 }
 0x5a3   : > { %v4422_v52 = vmul.f32 %v4896_v2, %v7928_v31  ;;  %v4287_v6 = vpop.f32.mrb[9].mxu1  ;;  %v2413_v2 = vld [vmem:[%s5244_s30 + $0x50] sm:$0xff] }
 0x5a4   : > { %v4421_v50 = vmul.f32 %v7928_v31, %v4287_v6  ;;  %v3781_v4 = vpop.permute.xlu1 %3780 }
 0x5a5   : > { %v4461_v16 = vadd.f32 %v7933_v49, %v4422_v52  ;;  %v4072_v15 = vsel %vm1929_vm9, %v4040_v25, %v3781_v4  ;;  %v3655_v29 = vpop.permute.xlu0 %3654 }
 0x5a6   : > { %v4460_v40 = vadd.f32 %v7933_v49, %v4421_v50  ;;  %4924 = vmatprep.mubr.msk.f32.mxu1 %vm1971_vm10, %v4072_v15  ;;  %v4041_v59 = vsel %vm1896_vm8, %v4009_v23, %v3655_v29 }
 0x5a7   : > { %v4493_v42 = vadd.f32 %v4461_v16, %v2412_v8 }
 0x5a8   : > { %v4492_v19 = vadd.f32 %v4460_v40, %v2411_v9  ;;  %v3401_v54 = vpop.permute.xlu1 %3400  ;;  %v2416_v40 = vld [vmem:[%s5244_s30 + $0x68] sm:$0xff] }
 0x5a9   : > { %v4525_v3 = vmax.f32 %v4493_v42, 0.0  ;;  %v3275_v24 = vpop.permute.xlu0 %3274  ;;  %v3978_v41 = vsel %vm1830_vm6, %v3946_v14, %v3401_v54  ;;  %v2415_v42 = vld [vmem:[%s5244_s30 + $0x60] sm:$0xff] }
 0x5aa   : > { %v4524_v21 = vmax.f32 %v4492_v19, 0.0  ;;  %v3947_v10 = vsel %vm1797_vm5, %v3915_v18, %v3275_v24 }
 0x5ab   : > { %4557 = vst.msk [vmem:[%s7953_s15 + $0x48] sm:$0xff] %vm279_vm0, %v4525_v3 }
 0x5ac   : > { %4556 = vst.msk [vmem:[%s7953_s15 + $0x40] sm:$0xff] %vm279_vm0, %v4524_v21  ;;  %v3403_v22 = vpop.permute.xlu1 %3402  ;;  %v2418_v21 = vld [vmem:[%s5244_s30 + $0x78] sm:$0xff] }
 0x5ad   : > { %v3783_v53 = vpop.permute.xlu0 %3782  ;;  %v3979_v20 = vsel %vm1830_vm6, %v3947_v10, %v3403_v22  ;;  %v2417_v22 = vld [vmem:[%s5244_s30 + $0x70] sm:$0xff] }
 0x5ae   : > { %v4073_v28 = vsel %vm1929_vm9, %v4041_v59, %v3783_v53 }
 0x5af   : > { %4925 = vmatmul.mubr.msk.f32.gmra.mrb[28].mxu1 %vm1971_vm10, %v4073_v28 }
 0x5b0   : > { %v3531_v27 = vpop.permute.xlu1 %3530 }
 0x5b1   : > { %v3529_v61 = vpop.permute.xlu0 %3528  ;;  %v4011_v32 = vsel %vm1863_vm7, %v3979_v20, %v3531_v27 }
 0x5b2   : > { %v4010_v13 = vsel %vm1863_vm7, %v3978_v41, %v3529_v61 }
 0x5b4   : > { %v3659_v51 = vpop.permute.xlu1 %3658 }
 0x5b5   : > { %v3657_v12 = vpop.permute.xlu0 %3656  ;;  %v4043_v52 = vsel %vm1896_vm8, %v4011_v32, %v3659_v51 }
 0x5b6   : > { %v4899_v33 = vpop.f32.mrb[10].mxu1  ;;  %v4042_v26 = vsel %vm1896_vm8, %v4010_v13, %v3657_v12 }
 0x5b7   : > { %v4424_v60 = vmul.f32 %v4899_v33, %v7928_v31  ;;  %v4297_v56 = vpop.f32.mrb[11].mxu1  ;;  %v2422_v33 = vld [vmem:[%s5244_s30 + $0x98] sm:$0xff] }
 0x5b8   : > { %v4423_v0 = vmul.f32 %v7928_v31, %v4297_v56  ;;  %v3787_v30 = vpop.permute.xlu1 %3786 }
 0x5b9   : > { %v4463_v37 = vadd.f32 %v7933_v49, %v4424_v60  ;;  %v3785_v39 = vpop.permute.xlu0 %3784  ;;  %v4075_v50 = vsel %vm1929_vm9, %v4043_v52, %v3787_v30  ;;  %v2421_v60 = vld [vmem:[%s5244_s30 + $0x90] sm:$0xff]  ;;  %v2423_v52 = vld [vmem:[%s5244_s30 + $0xa0] sm:$0xff] }
 0x5ba   : > { %v4462_v6 = vadd.f32 %v7933_v49, %v4423_v0  ;;  %v4074_v25 = vsel %vm1929_vm9, %v4042_v26, %v3785_v39 }
 0x5bb   : > { %v4495_v8 = vadd.f32 %v4463_v37, %v2414_v57  ;;  %4927 = vmatprep.mubr.msk.f32.mxu1 %vm1971_vm10, %v4074_v25  ;;  %v2424_v37 = vld [vmem:[%s5244_s30 + $0xa8] sm:$0xff] }
 0x5bc   : > { %v4494_v4 = vadd.f32 %v4462_v6, %v2413_v2  ;;  %4928 = vmatmul.mubr.msk.f32.gmra.mrb[30].mxu1 %vm1971_vm10, %v4075_v50 }
 0x5bd   : > { %v4527_v16 = vmax.f32 %v4495_v8, 0.0 }
 0x5be   : > { %v4526_v9 = vmax.f32 %v4494_v4, 0.0 }
 0x5bf   : > { %4559 = vst.msk [vmem:[%s7953_s15 + $0x58] sm:$0xff] %vm279_vm0, %v4527_v16 }
 0x5c0   : > { %4558 = vst.msk [vmem:[%s7953_s15 + $0x50] sm:$0xff] %vm279_vm0, %v4526_v9 }
 0x5ca   : > { %v4902_v15 = vpop.f32.mrb[12].mxu1 }
 0x5cb   : > { %v4426_v29 = vmul.f32 %v4902_v15, %v7928_v31  ;;  %v4307_v62 = vpop.f32.mrb[13].mxu1 }
 0x5cc   : > { %v4425_v34 = vmul.f32 %v7928_v31, %v4307_v62 }
 0x5cd   : > { %v4465_v11 = vadd.f32 %v7933_v49, %v4426_v29  ;;  %v2426_v29 = vld [vmem:[%s5244_s30 + $0xb8] sm:$0xff] }
 0x5ce   : > { %v4464_v7 = vadd.f32 %v7933_v49, %v4425_v34  ;;  %v2425_v34 = vld [vmem:[%s5244_s30 + $0xb0] sm:$0xff] }
 0x5cf   : > { %v4497_v35 = vadd.f32 %v4465_v11, %v2416_v40 }
 0x5d0   : > { %v4496_v19 = vadd.f32 %v4464_v7, %v2415_v42 }
 0x5d1   : > { %v4529_v54 = vmax.f32 %v4497_v35, 0.0 }
 0x5d2   : > { %v4528_v44 = vmax.f32 %v4496_v19, 0.0 }
 0x5d3   : > { %4561 = vst.msk [vmem:[%s7953_s15 + $0x68] sm:$0xff] %vm279_vm0, %v4529_v54 }
 0x5d4   : > { %4560 = vst.msk [vmem:[%s7953_s15 + $0x60] sm:$0xff] %vm279_vm0, %v4528_v44 }
 0x5de   : > { %v4905_v3 = vpop.f32.mrb[14].mxu1 }
 0x5df   : > { %v4428_v24 = vmul.f32 %v4905_v3, %v7928_v31  ;;  %v4317_v47 = vpop.f32.mrb[15].mxu1 }
 0x5e0   : > { %v4427_v63 = vmul.f32 %v7928_v31, %v4317_v47 }
 0x5e1   : > { %v4467_v23 = vadd.f32 %v7933_v49, %v4428_v24  ;;  %v2428_v24 = vld [vmem:[%s5244_s30 + $0xc8] sm:$0xff] }
 0x5e2   : > { %v4466_v59 = vadd.f32 %v7933_v49, %v4427_v63  ;;  %v2427_v63 = vld [vmem:[%s5244_s30 + $0xc0] sm:$0xff] }
 0x5e3   : > { %v4499_v53 = vadd.f32 %v4467_v23, %v2418_v21 }
 0x5e4   : > { %v4498_v28 = vadd.f32 %v4466_v59, %v2417_v22 }
 0x5e5   : > { %v4531_v27 = vmax.f32 %v4499_v53, 0.0 }
 0x5e6   : > { %v4530_v61 = vmax.f32 %v4498_v28, 0.0 }
 0x5e7   : > { %4563 = vst.msk [vmem:[%s7953_s15 + $0x78] sm:$0xff] %vm279_vm0, %v4531_v27 }
 0x5e8   : > { %4562 = vst.msk [vmem:[%s7953_s15 + $0x70] sm:$0xff] %vm279_vm0, %v4530_v61 }
 0x5f2   : > { %v4908_v58 = vpop.f32.mrb[16].mxu1 }
 0x5f3   : > { %v4430_v38 = vmul.f32 %v4908_v58, %v7928_v31  ;;  %v4327_v5 = vpop.f32.mrb[17].mxu1 }
 0x5f4   : > { %v4429_v43 = vmul.f32 %v7928_v31, %v4327_v5 }
 0x5f5   : > { %v4469_v55 = vadd.f32 %v7933_v49, %v4430_v38  ;;  %v2430_v38 = vld [vmem:[%s5244_s30 + $0xd8] sm:$0xff] }
 0x5f6   : > { %v4468_v45 = vadd.f32 %v7933_v49, %v4429_v43  ;;  %v2429_v43 = vld [vmem:[%s5244_s30 + $0xd0] sm:$0xff] }
 0x5f7   : > { %v4501_v51 = vadd.f32 %v4469_v55, %v2420_v17 }
 0x5f8   : > { %v4500_v48 = vadd.f32 %v4468_v45, %v2419_v46 }
 0x5f9   : > { %v4533_v1 = vmax.f32 %v4501_v51, 0.0 }
 0x5fa   : > { %v4532_v36 = vmax.f32 %v4500_v48, 0.0 }
 0x5fb   : > { %4565 = vst.msk [vmem:[%s7953_s15 + $0x88] sm:$0xff] %vm279_vm0, %v4533_v1 }
 0x5fc   : > { %4564 = vst.msk [vmem:[%s7953_s15 + $0x80] sm:$0xff] %vm279_vm0, %v4532_v36 }
 0x60a   : > { %v4911_v12 = vpop.f32.mrb[18].mxu1 }
 0x60b   : > { %v4432_v14 = vmul.f32 %v4911_v12, %v7928_v31  ;;  %v4337_v18 = vpop.f32.mrb[19].mxu1 }
 0x60c   : > { %v4431_v41 = vmul.f32 %v7928_v31, %v4337_v18 }
 0x60d   : > { %v4471_v10 = vadd.f32 %v7933_v49, %v4432_v14  ;;  %v2432_v14 = vld [vmem:[%s5244_s30 + $0xe8] sm:$0xff] }
 0x60e   : > { %v4470_v56 = vadd.f32 %v7933_v49, %v4431_v41  ;;  %v2431_v41 = vld [vmem:[%s5244_s30 + $0xe0] sm:$0xff] }
 0x60f   : > { %v4503_v20 = vadd.f32 %v4471_v10, %v2422_v33 }
 0x610   : > { %v4502_v13 = vadd.f32 %v4470_v56, %v2421_v60 }
 0x611   : > { %v4535_v57 = vmax.f32 %v4503_v20, 0.0 }
 0x612   : > { %v4534_v0 = vmax.f32 %v4502_v13, 0.0 }
 0x613   : > { %4567 = vst.msk [vmem:[%s7953_s15 + $0x98] sm:$0xff] %vm279_vm0, %v4535_v57 }
 0x614   : > { %4566 = vst.msk [vmem:[%s7953_s15 + $0x90] sm:$0xff] %vm279_vm0, %v4534_v0 }
 0x622   : > { %v4914_v30 = vpop.f32.mrb[20].mxu1 }
 0x623   : > { %v4434_v32 = vmul.f32 %v4914_v30, %v7928_v31  ;;  %v4347_v26 = vpop.f32.mrb[21].mxu1 }
 0x624   : > { %v4433_v2 = vmul.f32 %v7928_v31, %v4347_v26 }
 0x625   : > { %v4473_v39 = vadd.f32 %v7933_v49, %v4434_v32  ;;  %v2434_v32 = vld [vmem:[%s5244_s30 + $0xf8] sm:$0xff] }
 0x626   : > { %v4472_v6 = vadd.f32 %v7933_v49, %v4433_v2  ;;  %v2433_v2 = vld [vmem:[%s5244_s30 + $0xf0] sm:$0xff] }
 0x627   : > { %v4505_v25 = vadd.f32 %v4473_v39, %v2424_v37 }
 0x628   : > { %v4504_v8 = vadd.f32 %v4472_v6, %v2423_v52 }
 0x629   : > { %v4537_v50 = vmax.f32 %v4505_v25, 0.0 }
 0x62a   : > { %v4536_v4 = vmax.f32 %v4504_v8, 0.0 }
 0x62b   : > { %4569 = vst.msk [vmem:[%s7953_s15 + $0xa8] sm:$0xff] %vm279_vm0, %v4537_v50 }
 0x62c   : > { %4568 = vst.msk [vmem:[%s7953_s15 + $0xa0] sm:$0xff] %vm279_vm0, %v4536_v4 }
 0x63a   : > { %v4917_v16 = vpop.f32.mrb[22].mxu1 }
 0x63b   : > { %v4436_v9 = vmul.f32 %v4917_v16, %v7928_v31  ;;  %v4357_v15 = vpop.f32.mrb[23].mxu1 }
 0x63c   : > { %v4435_v62 = vmul.f32 %v7928_v31, %v4357_v15 }
 0x63d   : > { %v4475_v40 = vadd.f32 %v7933_v49, %v4436_v9 }
 0x63e   : > { %v4474_v11 = vadd.f32 %v7933_v49, %v4435_v62 }
 0x63f   : > { %v4507_v42 = vadd.f32 %v4475_v40, %v2426_v29 }
 0x640   : > { %v4506_v7 = vadd.f32 %v4474_v11, %v2425_v34 }
 0x641   : > { %v4539_v35 = vmax.f32 %v4507_v42, 0.0 }
 0x642   : > { %v4538_v19 = vmax.f32 %v4506_v7, 0.0 }
 0x643   : > { %4571 = vst.msk [vmem:[%s7953_s15 + $0xb8] sm:$0xff] %vm279_vm0, %v4539_v35 }
 0x644   : > { %4570 = vst.msk [vmem:[%s7953_s15 + $0xb0] sm:$0xff] %vm279_vm0, %v4538_v19 }
 0x652   : > { %v4920_v54 = vpop.f32.mrb[24].mxu1 }
 0x653   : > { %v4438_v44 = vmul.f32 %v4920_v54, %v7928_v31  ;;  %v4367_v3 = vpop.f32.mrb[25].mxu1 }
 0x654   : > { %v4437_v47 = vmul.f32 %v7928_v31, %v4367_v3 }
 0x655   : > { %v4477_v21 = vadd.f32 %v7933_v49, %v4438_v44 }
 0x656   : > { %v4476_v23 = vadd.f32 %v7933_v49, %v4437_v47 }
 0x657   : > { %v4509_v22 = vadd.f32 %v4477_v21, %v2428_v24 }
 0x658   : > { %v4508_v59 = vadd.f32 %v4476_v23, %v2427_v63 }
 0x659   : > { %v4541_v53 = vmax.f32 %v4509_v22, 0.0 }
 0x65a   : > { %v4540_v28 = vmax.f32 %v4508_v59, 0.0 }
 0x65b   : > { %4573 = vst.msk [vmem:[%s7953_s15 + $0xc8] sm:$0xff] %vm279_vm0, %v4541_v53 }
 0x65c   : > { %4572 = vst.msk [vmem:[%s7953_s15 + $0xc0] sm:$0xff] %vm279_vm0, %v4540_v28 }
 0x66a   : > { %v4923_v27 = vpop.f32.mrb[26].mxu1 }
 0x66b   : > { %v4440_v61 = vmul.f32 %v4923_v27, %v7928_v31  ;;  %v4377_v58 = vpop.f32.mrb[27].mxu1 }
 0x66c   : > { %v4439_v5 = vmul.f32 %v7928_v31, %v4377_v58 }
 0x66d   : > { %v4479_v17 = vadd.f32 %v7933_v49, %v4440_v61 }
 0x66e   : > { %v4478_v55 = vadd.f32 %v7933_v49, %v4439_v5 }
 0x66f   : > { %v4511_v46 = vadd.f32 %v4479_v17, %v2430_v38 }
 0x670   : > { %v4510_v45 = vadd.f32 %v4478_v55, %v2429_v43 }
 0x671   : > { %v4543_v51 = vmax.f32 %v4511_v46, 0.0 }
 0x672   : > { %v4542_v48 = vmax.f32 %v4510_v45, 0.0 }
 0x673   : > { %4575 = vst.msk [vmem:[%s7953_s15 + $0xd8] sm:$0xff] %vm279_vm0, %v4543_v51 }
 0x674   : > { %4574 = vst.msk [vmem:[%s7953_s15 + $0xd0] sm:$0xff] %vm279_vm0, %v4542_v48 }
 0x682   : > { %v4926_v1 = vpop.f32.mrb[28].mxu1 }
 0x683   : > { %v4442_v36 = vmul.f32 %v4926_v1, %v7928_v31  ;;  %v4387_v12 = vpop.f32.mrb[29].mxu1 }
 0x684   : > { %v4441_v18 = vmul.f32 %v7928_v31, %v4387_v12 }
 0x685   : > { %v4481_v33 = vadd.f32 %v7933_v49, %v4442_v36 }
 0x686   : > { %v4480_v10 = vadd.f32 %v7933_v49, %v4441_v18 }
 0x687   : > { %v4513_v60 = vadd.f32 %v4481_v33, %v2432_v14 }
 0x688   : > { %v4512_v56 = vadd.f32 %v4480_v10, %v2431_v41 }
 0x689   : > { %v4545_v20 = vmax.f32 %v4513_v60, 0.0 }
 0x68a   : > { %v4544_v13 = vmax.f32 %v4512_v56, 0.0 }
 0x68b   : > { %4577 = vst.msk [vmem:[%s7953_s15 + $0xe8] sm:$0xff] %vm279_vm0, %v4545_v20 }
 0x68c   : > { %4576 = vst.msk [vmem:[%s7953_s15 + $0xe0] sm:$0xff] %vm279_vm0, %v4544_v13 }
 0x68f   : > { %v4929_v57 = vpop.f32.mrb[30].mxu1 }
 0x690   : > { %v4444_v0 = vmul.f32 %v4929_v57, %v7928_v31  ;;  %v4397_v30 = vpop.f32.mrb[31].mxu1 }
 0x691   : > { %v4443_v26 = vmul.f32 %v7928_v31, %v4397_v30 }
 0x692   : > { %v4483_v37 = vadd.f32 %v7933_v49, %v4444_v0 }
 0x693   : > { %v4482_v39 = vadd.f32 %v7933_v49, %v4443_v26 }
 0x694   : > { %v4515_v52 = vadd.f32 %v4483_v37, %v2434_v32 }
 0x695   : > { %v4514_v6 = vadd.f32 %v4482_v39, %v2433_v2 }
 0x696   : > { %v4547_v25 = vmax.f32 %v4515_v52, 0.0 }
 0x697   : > { %v4546_v8 = vmax.f32 %v4514_v6, 0.0 }
 0x698   : > { %4579 = vst.msk [vmem:[%s7953_s15 + $0xf8] sm:$0xff] %vm279_vm0, %v4547_v25 }
 0x699   : > { %4578 = vst.msk [vmem:[%s7953_s15 + $0xf0] sm:$0xff] %vm279_vm0, %v4546_v8 }
 0x69a PF: > { %s17_s24 = sadd.s32 1, %s5019_s24  }
 0x69b   : > { %p14_p4 = scmp.ge.s32.totalorder %s17_s24, 4  }
 0x69d   :  { %16 = sbr.rel (!%p14_p4) target bundleno = 1 (0x1), region = 84 }

</bundles_post_ra>
